<compile_context>
chip_gen: v6e
topology: v6e:2x2x1
jax: 0.10.0
libtpu: 0.0.40
codegen_flags: <defaults>
</compile_context>

<pallas_src>
import jax
import jax.numpy as jnp
from jax.experimental import pallas as pl
from jax.experimental.pallas import tpu as pltpu

D_IN, D_H1, D_H2, D_H3, D_OUT = 768, 512, 128, 32, 1


def _round_up(x, m):
    return ((x + m - 1) // m) * m


def _choose_tb(batch, tile_b_max):
    """Batch-tile size: sublane-aligned, generation-aware (see header)."""
    bp = _round_up(max(batch, 1), 8)
    if bp <= 16:
        return bp                                   # tiny: single compact tile
    if bp <= 1024:
        # Moderate batch: >= 2 grid steps so v7x's two TensorCores both get
        # work on the "parallel" batch axis (harmless on v5e/v6e).
        return _round_up(pl.cdiv(bp, 2), 8)
    # Large batch: tiles are multiples of 256 (full MXU row passes on
    # v6e/v7x), >= 4 grid steps so the x DMA of step i+1 overlaps compute of
    # step i, capped at tile_b_max for VMEM (double-buffered f32 x tile +
    # f32/bf16 intermediates ~ 25 MiB at 2048 rows).
    return min(tile_b_max, _round_up(pl.cdiv(bp, 4), 256))


def mlp_kernel(x_ref, w1_ref, b1_ref, w2_ref, b2_ref,
               w3_ref, b3_ref, w4_ref, b4_ref, o_ref):
    # x arrives f32 from HBM; cast to bf16 here (VPU) for the MXU matmuls,
    # accumulate in f32, keep bias add + ReLU in f32.
    x = x_ref[...].astype(jnp.bfloat16)
    # Layer 1: (tb, 768) @ (768, 512) — dominates FLOPs.
    h = jnp.dot(x, w1_ref[...], preferred_element_type=jnp.float32)
    h = jnp.maximum(h + b1_ref[...], 0.0)
    # TODO(synk): Dropout(0.2)/Dropout(0.1) are identity in eval/inference mode; omitted.
    # Layer 2: (tb, 512) @ (512, 128).
    h = jnp.dot(h.astype(jnp.bfloat16), w2_ref[...],
                preferred_element_type=jnp.float32)
    h = jnp.maximum(h + b2_ref[...], 0.0)
    # Layer 3: (tb, 128) @ (128, 32).
    h = jnp.dot(h.astype(jnp.bfloat16), w3_ref[...],
                preferred_element_type=jnp.float32)
    h = jnp.maximum(h + b3_ref[...], 0.0)
    # Layer 4 (32 -> 1): degenerate N=1 matmul done as VPU multiply + lane
    # reduction; w4 is the transposed (1, 32) f32 row, b4 an SMEM scalar.
    out = jnp.sum(h * w4_ref[...], axis=-1, keepdims=True) + b4_ref[0, 0]
    o_ref[...] = out.astype(o_ref.dtype)


def mlp_forward(x, params, *, tile_b_max=2048):
    """x: (B, 768) float32.  params: torch-default-style f32 weights/biases."""
    w1, b1, w2, b2, w3, b3, w4, b4 = params
    B = x.shape[0]

    tb = _choose_tb(B, tile_b_max)
    grid = (pl.cdiv(B, tb),)          # ragged tail block handled by Pallas masking

    # Weights to bf16 (tiny one-time cost, halves resident weight VMEM);
    # biases stay f32.  x is NOT pre-cast or padded — it streams in as f32.
    w1b = w1.astype(jnp.bfloat16)
    w2b = w2.astype(jnp.bfloat16)
    w3b = w3.astype(jnp.bfloat16)
    w4t = w4.reshape(1, D_H3).astype(jnp.float32)   # (32,1) -> (1,32) lane-reduce row
    b4s = b4.reshape(1, 1).astype(jnp.float32)      # SMEM scalar

    full = lambda i: (0, 0)  # constant index_map -> block stays resident across steps
    grid_spec = pltpu.PrefetchScalarGridSpec(
        num_scalar_prefetch=0,
        grid=grid,
        in_specs=[
            pl.BlockSpec((tb, D_IN), lambda i: (i, 0)),          # f32 x stream
            pl.BlockSpec((D_IN, D_H1), full), pl.BlockSpec((1, D_H1), full),
            pl.BlockSpec((D_H1, D_H2), full), pl.BlockSpec((1, D_H2), full),
            pl.BlockSpec((D_H2, D_H3), full), pl.BlockSpec((1, D_H3), full),
            pl.BlockSpec((1, D_H3), full),                       # w4 transposed row
            pl.BlockSpec(memory_space=pltpu.MemorySpace.SMEM),   # b4 scalar
        ],
        out_specs=pl.BlockSpec((tb, D_OUT), lambda i: (i, 0)),
    )

    flops = 2 * B * (D_IN * D_H1 + D_H1 * D_H2 + D_H2 * D_H3 + D_H3 * D_OUT)
    bytes_accessed = (
        2 * (D_IN * D_H1 + D_H1 * D_H2 + D_H2 * D_H3)      # bf16 weights
        + 4 * (D_H1 + D_H2 + D_H3 + D_H3 + 1)              # f32 biases + w4 row
        + 4 * B * D_IN                                      # f32 x stream (no pre-pass)
        + 4 * B * D_OUT)                                    # f32 output
    cost = pl.CostEstimate(flops=flops, transcendentals=0,
                           bytes_accessed=bytes_accessed)

    out = pl.pallas_call(
        mlp_kernel,
        out_shape=jax.ShapeDtypeStruct((B, D_OUT), jnp.float32),
        grid_spec=grid_spec,
        compiler_params=pltpu.CompilerParams(
            dimension_semantics=("parallel",),
            # > v5e's 16 MiB scoped default, < v7x's 64 MiB physical VMEM.
            vmem_limit_bytes=40 * 1024 * 1024),
        cost_estimate=cost,
    )(x.astype(jnp.float32), w1b, b1, w2b, b2, w3b, b3, w4t, b4s)

    return out


def init_params(key):
    """Deterministic parameter init (uniform, scaled like torch default)."""
    ks = jax.random.split(key, 8)
    def lin(kw, kb, fan_in, fan_out):
        bound = 1.0 / jnp.sqrt(fan_in)
        w = jax.random.uniform(kw, (fan_in, fan_out), jnp.float32, -bound, bound)
        b = jax.random.uniform(kb, (1, fan_out), jnp.float32, -bound, bound)
        return w, b
    w1, b1 = lin(ks[0], ks[1], D_IN, D_H1)
    w2, b2 = lin(ks[2], ks[3], D_H1, D_H2)
    w3, b3 = lin(ks[4], ks[5], D_H2, D_H3)
    w4, b4 = lin(ks[6], ks[7], D_H3, D_OUT)
    return (w1, b1, w2, b2, w3, b3, w4, b4)


def mlp_reference(x, params):
    w1, b1, w2, b2, w3, b3, w4, b4 = params
    h = jnp.maximum(x @ w1 + b1, 0.0)
    h = jnp.maximum(h @ w2 + b2, 0.0)
    h = jnp.maximum(h @ w3 + b3, 0.0)
    return h @ w4 + b4


if __name__ == "__main__":
    key = jax.random.PRNGKey(0)
    k_x, k_p = jax.random.split(key)
    # Non-multiple batch exercises the ragged (masked) tail block, and the tile
    # chooser gives a 2-step parallel grid (both TensorCores active on v7x).
    B = 300
    x = jax.random.normal(k_x, (B, D_IN), jnp.float32)
    params = init_params(k_p)

    out = mlp_forward(x, params)
    out = jax.block_until_ready(out)

    ref = mlp_reference(x, params)
    assert out.shape == (B, D_OUT)
    # bf16 MXU inputs (f32 accumulate) -> relaxed tolerance vs. pure-f32
    # reference; expected ~1e-2-level abs error, fine for inference.
    assert jnp.allclose(out, ref, atol=5e-2, rtol=5e-2), \
        f"max abs err {jnp.max(jnp.abs(out - ref))}"
    print("KERNEL_OK")
</pallas_src>

<mosaic_0001>
module attributes {stable_mosaic.version = 11 : i64} {
  func.func @mlp_kernel(%arg0: i32, %arg1: memref<152x768xf32, #tpu.memory_space<vmem>>, %arg2: memref<768x512xbf16, #tpu.memory_space<vmem>>, %arg3: memref<1x512xf32, #tpu.memory_space<vmem>>, %arg4: memref<512x128xbf16, #tpu.memory_space<vmem>>, %arg5: memref<1x128xf32, #tpu.memory_space<vmem>>, %arg6: memref<128x32xbf16, #tpu.memory_space<vmem>>, %arg7: memref<1x32xf32, #tpu.memory_space<vmem>>, %arg8: memref<1x32xf32, #tpu.memory_space<vmem>>, %arg9: memref<1x1xf32, #tpu.memory_space<smem>>, %arg10: memref<152x1xf32, #tpu.memory_space<vmem>>) attributes {dimension_semantics = [#tpu.dimension_semantics<parallel>], iteration_bounds = array<i64: 2>, scalar_prefetch = 0 : i64, scratch_operands = 0 : i64, tpu.core_type = #tpu.core_type<tc>, window_params = [{transform_indices = @transform_0, window_bounds = array<i64: 152, 768>}, {pipeline_mode = #tpu.pipeline_mode<synchronous>, transform_indices = @transform_1, window_bounds = array<i64: 768, 512>}, {pipeline_mode = #tpu.pipeline_mode<synchronous>, transform_indices = @transform_2, window_bounds = array<i64: 1, 512>}, {pipeline_mode = #tpu.pipeline_mode<synchronous>, transform_indices = @transform_3, window_bounds = array<i64: 512, 128>}, {pipeline_mode = #tpu.pipeline_mode<synchronous>, transform_indices = @transform_4, window_bounds = array<i64: 1, 128>}, {pipeline_mode = #tpu.pipeline_mode<synchronous>, transform_indices = @transform_5, window_bounds = array<i64: 128, 32>}, {pipeline_mode = #tpu.pipeline_mode<synchronous>, transform_indices = @transform_6, window_bounds = array<i64: 1, 32>}, {pipeline_mode = #tpu.pipeline_mode<synchronous>, transform_indices = @transform_7, window_bounds = array<i64: 1, 32>}, {transform_indices = @transform_8, window_bounds = array<i64: 1, 1>}, {transform_indices = @transform_9, window_bounds = array<i64: 152, 1>}]} {
    %c0 = arith.constant 0 : index
    %c0_0 = arith.constant 0 : index
    %0 = vector.load %arg1[%c0, %c0_0] : memref<152x768xf32, #tpu.memory_space<vmem>>, vector<152x768xf32>
    %1 = arith.truncf %0 : vector<152x768xf32> to vector<152x768xbf16>
    %c0_1 = arith.constant 0 : index
    %c0_2 = arith.constant 0 : index
    %2 = vector.load %arg2[%c0_1, %c0_2] : memref<768x512xbf16, #tpu.memory_space<vmem>>, vector<768x512xbf16>
    %cst = arith.constant dense<0.000000e+00> : vector<152x512xf32>
    %3 = tpu.matmul %1, %2, %cst {dimension_numbers = #tpu.dot_dimension_numbers<[1], [0], [0], [1], [0, 0, 1, 1], [], []>} : vector<152x768xbf16>, vector<768x512xbf16>, vector<152x512xf32> -> vector<152x512xf32>
    %c0_3 = arith.constant 0 : index
    %c0_4 = arith.constant 0 : index
    %4 = vector.load %arg3[%c0_3, %c0_4] : memref<1x512xf32, #tpu.memory_space<vmem>>, vector<1x512xf32>
    %5 = vector.broadcast %4 : vector<1x512xf32> to vector<152x512xf32>
    %6 = arith.addf %3, %5 : vector<152x512xf32>
    %cst_5 = arith.constant 0.000000e+00 : f32
    %7 = vector.broadcast %cst_5 : f32 to vector<152x512xf32>
    %8 = arith.maximumf %6, %7 : vector<152x512xf32>
    %9 = arith.truncf %8 : vector<152x512xf32> to vector<152x512xbf16>
    %c0_6 = arith.constant 0 : index
    %c0_7 = arith.constant 0 : index
    %10 = vector.load %arg4[%c0_6, %c0_7] : memref<512x128xbf16, #tpu.memory_space<vmem>>, vector<512x128xbf16>
    %cst_8 = arith.constant dense<0.000000e+00> : vector<152x128xf32>
    %11 = tpu.matmul %9, %10, %cst_8 {dimension_numbers = #tpu.dot_dimension_numbers<[1], [0], [0], [1], [0, 0, 1, 1], [], []>} : vector<152x512xbf16>, vector<512x128xbf16>, vector<152x128xf32> -> vector<152x128xf32>
    %c0_9 = arith.constant 0 : index
    %c0_10 = arith.constant 0 : index
    %12 = vector.load %arg5[%c0_9, %c0_10] : memref<1x128xf32, #tpu.memory_space<vmem>>, vector<1x128xf32>
    %13 = vector.broadcast %12 : vector<1x128xf32> to vector<152x128xf32>
    %14 = arith.addf %11, %13 : vector<152x128xf32>
    %cst_11 = arith.constant 0.000000e+00 : f32
    %15 = vector.broadcast %cst_11 : f32 to vector<152x128xf32>
    %16 = arith.maximumf %14, %15 : vector<152x128xf32>
    %17 = arith.truncf %16 : vector<152x128xf32> to vector<152x128xbf16>
    %c0_12 = arith.constant 0 : index
    %c0_13 = arith.constant 0 : index
    %18 = vector.load %arg6[%c0_12, %c0_13] : memref<128x32xbf16, #tpu.memory_space<vmem>>, vector<128x32xbf16>
    %cst_14 = arith.constant dense<0.000000e+00> : vector<152x32xf32>
    %19 = tpu.matmul %17, %18, %cst_14 {dimension_numbers = #tpu.dot_dimension_numbers<[1], [0], [0], [1], [0, 0, 1, 1], [], []>} : vector<152x128xbf16>, vector<128x32xbf16>, vector<152x32xf32> -> vector<152x32xf32>
    %c0_15 = arith.constant 0 : index
    %c0_16 = arith.constant 0 : index
    %20 = vector.load %arg7[%c0_15, %c0_16] : memref<1x32xf32, #tpu.memory_space<vmem>>, vector<1x32xf32>
    %21 = vector.broadcast %20 : vector<1x32xf32> to vector<152x32xf32>
    %22 = arith.addf %19, %21 : vector<152x32xf32>
    %cst_17 = arith.constant 0.000000e+00 : f32
    %23 = vector.broadcast %cst_17 : f32 to vector<152x32xf32>
    %24 = arith.maximumf %22, %23 : vector<152x32xf32>
    %c0_18 = arith.constant 0 : index
    %c0_19 = arith.constant 0 : index
    %25 = vector.load %arg8[%c0_18, %c0_19] : memref<1x32xf32, #tpu.memory_space<vmem>>, vector<1x32xf32>
    %26 = vector.broadcast %25 : vector<1x32xf32> to vector<152x32xf32>
    %27 = arith.mulf %24, %26 : vector<152x32xf32>
    %cst_20 = arith.constant dense<0.000000e+00> : vector<152xf32>
    %28 = vector.multi_reduction <add>, %27, %cst_20 [1] : vector<152x32xf32> to vector<152xf32>
    %29 = vector.shape_cast %28 : vector<152xf32> to vector<152x1xf32>
    %c0_21 = arith.constant 0 : index
    %c0_22 = arith.constant 0 : index
    %30 = memref.load %arg9[%c0_21, %c0_22] : memref<1x1xf32, #tpu.memory_space<smem>>
    %31 = vector.broadcast %30 : f32 to vector<152x1xf32>
    %32 = arith.addf %29, %31 : vector<152x1xf32>
    %c0_23 = arith.constant 0 : index
    %c0_24 = arith.constant 0 : index
    %33 = vector.load %arg10[%c0_23, %c0_24] : memref<152x1xf32, #tpu.memory_space<vmem>>, vector<152x1xf32>
    tpu.vector_store %arg10[%c0_23, %c0_24], %32 {strides = array<i32>} : memref<152x1xf32, #tpu.memory_space<vmem>>, vector<152x1xf32>,
    return
  }
  func.func @transform_0(%arg0: i32) -> (i32, i32) {
    %c0_i32 = arith.constant 0 : i32
    %c0_i32_0 = arith.constant 0 : i32
    return %arg0, %c0_i32 : i32, i32
  }
  func.func @transform_1(%arg0: i32) -> (i32, i32) {
    %c0_i32 = arith.constant 0 : i32
    %c0_i32_0 = arith.constant 0 : i32
    %c0_i32_1 = arith.constant 0 : i32
    return %c0_i32, %c0_i32_0 : i32, i32
  }
  func.func @transform_2(%arg0: i32) -> (i32, i32) {
    %c0_i32 = arith.constant 0 : i32
    %c0_i32_0 = arith.constant 0 : i32
    %c0_i32_1 = arith.constant 0 : i32
    return %c0_i32, %c0_i32_0 : i32, i32
  }
  func.func @transform_3(%arg0: i32) -> (i32, i32) {
    %c0_i32 = arith.constant 0 : i32
    %c0_i32_0 = arith.constant 0 : i32
    %c0_i32_1 = arith.constant 0 : i32
    return %c0_i32, %c0_i32_0 : i32, i32
  }
  func.func @transform_4(%arg0: i32) -> (i32, i32) {
    %c0_i32 = arith.constant 0 : i32
    %c0_i32_0 = arith.constant 0 : i32
    %c0_i32_1 = arith.constant 0 : i32
    return %c0_i32, %c0_i32_0 : i32, i32
  }
  func.func @transform_5(%arg0: i32) -> (i32, i32) {
    %c0_i32 = arith.constant 0 : i32
    %c0_i32_0 = arith.constant 0 : i32
    %c0_i32_1 = arith.constant 0 : i32
    return %c0_i32, %c0_i32_0 : i32, i32
  }
  func.func @transform_6(%arg0: i32) -> (i32, i32) {
    %c0_i32 = arith.constant 0 : i32
    %c0_i32_0 = arith.constant 0 : i32
    %c0_i32_1 = arith.constant 0 : i32
    return %c0_i32, %c0_i32_0 : i32, i32
  }
  func.func @transform_7(%arg0: i32) -> (i32, i32) {
    %c0_i32 = arith.constant 0 : i32
    %c0_i32_0 = arith.constant 0 : i32
    %c0_i32_1 = arith.constant 0 : i32
    return %c0_i32, %c0_i32_0 : i32, i32
  }
  func.func @transform_8(%arg0: i32) -> (i32, i32) {
    %c0_i32 = arith.constant 0 : i32
    %c0_i32_0 = arith.constant 0 : i32
    %c0_i32_1 = arith.constant 0 : i32
    return %c0_i32, %c0_i32_0 : i32, i32
  }
  func.func @transform_9(%arg0: i32) -> (i32, i32) {
    %c0_i32 = arith.constant 0 : i32
    %c0_i32_0 = arith.constant 0 : i32
    return %arg0, %c0_i32 : i32, i32
  }
}

</mosaic_0001>

<bundles_post_ra>
// kernel: tpu_custom_call.1
= control target key start
LH: loop header
LB: loop body
LE: loop exit
PB: predicated region body
PF: predicated region fallthrough
CT: control target
= control target key end

     0   :  { %s5666_s0 = inlined_call_operand.hbm [shape: f32[300,768], index: 0, kind: input, shape index: {}]   ;;  %s5667_s1 = inlined_call_operand.hbm [shape: bf16[768,512], index: 1, kind: input, shape index: {}]   ;;  %s5668_s2 = inlined_call_operand.vmem [shape: f32[1,512], index: 2, kind: input, shape index: {}]   ;;  %s5669_s3 = inlined_call_operand.hbm [shape: bf16[512,128], index: 3, kind: input, shape index: {}]   ;;  %s5670_s4 = inlined_call_operand.vmem [shape: f32[1,128], index: 4, kind: input, shape index: {}]   ;;  %s5671_s5 = inlined_call_operand.vmem [shape: bf16[128,32], index: 5, kind: input, shape index: {}]   ;;  %s5672_s6 = inlined_call_operand.vmem [shape: f32[1,32], index: 6, kind: input, shape index: {}]   ;;  %s5673_s7 = inlined_call_operand.vmem [shape: f32[1,32], index: 7, kind: input, shape index: {}]   ;;  %s5674_s8 = inlined_call_operand.<no memory space> [shape: f32[1,1], index: 8, kind: input, shape index: {}]   ;;  %s5675_s9 = inlined_call_operand.vmem [shape: f32[300,1], index: 9, kind: output, shape index: {}]  }
   0x1   :  { %14 = sst [smem:[#allocation2]] %s5674_s8 }
   0x2   :  { %15 = vsyncpa [#allocation4], 0 }
   0x3   :  { %17 = vsyncpa [#allocation4 + $0x1], 0 }
   0x4   :  { %18 = vsyncpa [#allocation6], 0  ;;  %s4616_s11 = smov 0   ;;  %s4618_s12 = smov 0  }
   0x5   :  { %s4620_s13 = smov 0   ;;  %s4622_s14 = smov 0  }
   0x6 LB: > { %s3566_s8 = sadd.s32 4294967295, %s4552_s14   ;;  %p44_p0 = scmp.ne.s32.totalorder %s4544_s12, %s4540_s11  ;;  %s4552_s14 = sphi %s4622_s14, %s5699_s14   ;;  %s4548_s13 = sphi %s4620_s13, %s5698_s13   ;;  %s4544_s12 = sphi %s4618_s12, %s5697_s12   ;;  %s4540_s11 = sphi %s4616_s11, %s5696_s11  }
   0x7   : > { %p4638_p1 = scmp.eq.s32.totalorder %s3566_s8, 0  ;;  %p3568_p2 = scmp.ge.s32.totalorder %s4552_s14, 1 }
   0x8   : > { %p249_p3 = scmp.lt.s32.totalorder %s4552_s14, 3  ;;  %s4554_s18 = smov [#allocation5]  }
   0x9   : > { %s5680_s15 = scalar_select %p4638_p1, 1, 0 }
   0xa   : > { %p4646_p4 = por %p4638_p1, %p44_p0  ;;  %p4650_p5 = pnand %p3568_p2, %p249_p3 }
   0xb   : > { %s261_s19 = sshll.u32 %s4554_s18, 4  ;;  %s4555_s21 = smov [#allocation7]   ;;  %s262_s19 = int_to_ptr.vmem [resolvable:$true] %s261_s19 }
   0xc   : > { %s5681_s16 = scalar_select %p4646_p4, 1, 0 }
   0xd   : > { %s5682_s17 = scalar_select %p4650_p5, 1, 0 }
   0xe   : > { %p4049_p6 = pneg %p4650_p5  ;;  %s277_s22 = sshll.u32 %s4555_s21, 4  ;;  %s278_s22 = int_to_ptr.vmem [resolvable:$true] %s277_s22 }
   0xf   : > { %s4445_s23 = scalar_lea.vmem %s262_s19, 24576  ;;  %p4453_p12 = scmp.lt.s32.totalorder %s262_s19, %s262_s19 }
  0x10   : > { %p4658_p7 = pnand %p4049_p6, %p4638_p1  ;;  %p4446_p9 = scmp.ne.s32.totalorder %s262_s19, %s4445_s23 }
  0x11   : > { %p4454_p13 = scmp.lt.s32.totalorder %s4445_s23, %s4445_s23 }
  0x12   : > { %p4436_p8 = pneg %p4658_p7 }
  0x13   : > { %p4455_p0 = por %p4454_p13, %p4453_p12 }
  0x14   : > { %p4448_p10 = pnand %p4446_p9, %p4436_p8 }
  0x16   : > { %p4449_p11 = pneg %p4448_p10 }
  0x18   : > { %p4456_p2 = pnand %p4455_p0, %p4449_p11 }
  0x1a   : > { %4459 = shalt.err (!%p4456_p2)
}
  0x1b   : > { %s4556_s24 = smov 256   ;;  %s4557_s25 = smov 16  }
  0x1c   : > { %4052 = dma.hbm_to_vmem [thread:$0]  (!%p4658_p7), %s5667_s1, 24576, %s262_s19, [#allocation6], %s4556_s24, %s4556_s24, %s4557_s25  }
  0x1d   : > { %s4471_s28 = scalar_lea.vmem %s278_s22, 4096  ;;  %p4479_p10 = scmp.lt.s32.totalorder %s278_s22, %s278_s22 }
  0x1e   : > { %p4472_p3 = scmp.ne.s32.totalorder %s278_s22, %s4471_s28  ;;  %p4480_p1 = scmp.lt.s32.totalorder %s4471_s28, %s4471_s28 }
  0x20   : > { %p4474_p6 = pnand %p4472_p3, %p4436_p8  ;;  %p4481_p12 = por %p4480_p1, %p4479_p10 }
  0x22   : > { %p4475_p9 = pneg %p4474_p6 }
  0x24   : > { %p4482_p11 = pnand %p4481_p12, %p4475_p9 }
  0x26   : > { %4485 = shalt.err (!%p4482_p11)
}
  0x27   : > { %s4558_s29 = smov 64   ;;  %s4559_s30 = smov 4  }
  0x28   : > { %4055 = dma.hbm_to_vmem [thread:$0]  (!%p4658_p7), %s5669_s3, 4096, %s278_s22, [#allocation6], %s4558_s29, %s4558_s29, %s4559_s30  }
  0x29   : > { %s4681_s18 = sadd.s32 1, %s4552_s14   ;;  %s31_s21 = sadd.s32 1, %s4548_s13 }
  0x2a   : > { %s28_s19 = ssub.s32 %s4552_s14, %s4681_s18  ;;  %p38_p8 = scmp.ne.s32.totalorder %s4548_s13, %s4544_s12 }
  0x2b   : > { %p29_p1 = scmp.eq.s32.totalorder %s28_s19, 0  ;;  %p39_p13 = scmp.eq.s32.totalorder %s4552_s14, 0 }
  0x2c   : > { %p4062_p0 = scmp.lt.s32.totalorder %s4552_s14, 2  ;;  %s306_s24 = sand.u32 1, %s4548_s13  }
  0x2d   : > { %s4691_s23 = scalar_select %p29_p1, %s4548_s13, %s31_s21  }
  0x2e   : > { %p40_p2 = por %p39_p13, %p38_p8  ;;  %s4036_s25 = smul.u32 912, %s306_s24 }
  0x2f   : > { %s4063_s26 = smul.u32 14592, %s4552_s14  ;;  %s4706_s10 = scalar_lea.sflag [#allocation4], %s306_s24 }
  0x30   : > { %p4695_p3 = pnand %p4062_p0, %p40_p2  ;;  %s310_s29 = scalar_lea.vmem [#allocation3], %s4036_s25 }
  0x31   : > { %s4702_s28 = scalar_lea.hbm %s5666_s0, %s4063_s26  ;;  %s318_s30 = sshll.u32 %s310_s29, 4  ;;  %s4704_s30 = int_to_ptr.vmem [resolvable:$true] %s318_s30 }
  0x32   : > { %s4486_s11 = scalar_lea.hbm %s4702_s28, 14592  ;;  %p4488_p6 = pneg %p4695_p3 }
  0x33   : > { %p4487_p7 = scmp.ne.s32.totalorder %s4702_s28, %s4486_s11  ;;  %s4491_s26 = scalar_lea.hbm %s5666_s0, 29184 }
  0x34   : > { %p4492_p12 = scmp.lt.s32.totalorder %s4702_s28, %s5666_s0  ;;  %p4493_p11 = scmp.lt.s32.totalorder %s4491_s26, %s4486_s11 }
  0x35   : > { %p4489_p9 = pnand %p4488_p6, %p4487_p7 }
  0x36   : > { %p4494_p1 = por %p4493_p11, %p4492_p12 }
  0x37   : > { %p4490_p10 = pneg %p4489_p9 }
  0x39   : > { %p4495_p8 = pnand %p4494_p1, %p4490_p10 }
  0x3b   : > { %4498 = shalt.err (!%p4495_p8)
}
  0x3c   : > { %s4499_s24 = scalar_lea.vmem %s4704_s30, 14592  ;;  %s4560_s25 = smov [#allocation3]  }
  0x3d   : > { %p4500_p13 = scmp.ne.s32.totalorder %s4704_s30, %s4499_s24  ;;  %s4504_s29 = sshll.u32 %s4560_s25, 4  ;;  %s4505_s29 = int_to_ptr.vmem [resolvable:$false] %s4504_s29 }
  0x3e   : > { %s4506_s19 = scalar_lea.vmem %s4505_s29, 29184  ;;  %p4507_p7 = scmp.lt.s32.totalorder %s4704_s30, %s4505_s29 }
  0x3f   : > { %p4502_p0 = pnand %p4500_p13, %p4488_p6  ;;  %p4508_p9 = scmp.lt.s32.totalorder %s4506_s19, %s4499_s24 }
  0x41   : > { %p4503_p2 = pneg %p4502_p0  ;;  %p4509_p4 = por %p4508_p9, %p4507_p7 }
  0x43   : > { %p4510_p5 = pnand %p4509_p4, %p4503_p2 }
  0x45   : > { %4513 = shalt.err (!%p4510_p5)
}
  0x46   : > { %s4561_s11 = smov 768   ;;  %s4562_s21 = smov 48  }
  0x47   : > { %4059 = dma.hbm_to_vmem [thread:$0]  (!%p4695_p3), %s4702_s28, 14592, %s4704_s30, %s4706_s10, %s4561_s11, %s4561_s11, %s4562_s21  }
  0x48   : > { %p5685_p6 = scmp.ne.s32.totalorder %s5682_s17, 0 }
  0x4a   : > { %330 = sbr.rel (%p5685_p6) target bundleno = 1142 (0x476), region = 56 }
  0x4f   : > { %s332_s26 = sand.u32 1, %s4544_s12   ;;  %p5686_p4 = scmp.ne.s32.totalorder %s5681_s16, 0 }
  0x50   : > { %s4038_s22 = smul.u32 912, %s332_s26  ;;  %s333_s27 = scalar_lea.sflag [#allocation4], %s332_s26 }
  0x52   : > { %s4730_s24 = scalar_lea.vmem [#allocation3], %s4038_s22 }
  0x53   : > { %4531 = dma.done.wait (%p5686_p4), %s333_s27, 14592  }
  0x54   : > { %4533 = vsyncadd (%p5686_p4), %s333_s27, 4294952704  ;;  %p5687_p5 = scmp.ne.s32.totalorder %s5680_s15, 0 }
  0x56   : > { %4535 = dma.done.wait (%p5687_p5), [#allocation6], 28672  }
  0x57   : > { %4537 = vsyncadd (%p5687_p5), [#allocation6], 4294938624  ;;  %v4106_v0 = vld [vmem:[#allocation5 + $0xe4] ss:$16 sps:$4 sm:$0xff]   ;;  %v4110_v2 = vld [vmem:[#allocation5 + $0xe0] ss:$16 sps:$4 sm:$0xff]  }
  0x58   : > { %v4108_v1 = vld [vmem:[#allocation5 + $0x2e4] ss:$16 sps:$4 sm:$0xff]   ;;  %1735 = vmatprep.subr.bf16.mxu0 %v4106_v0  ;;  %v4111_v3 = vld [vmem:[#allocation5 + $0x2e0] ss:$16 sps:$4 sm:$0xff]   ;;  %v388_v46 = vld [vmem:[%s4730_s24 + $0x8] sm:$0xff]  ;;  %vm3381_vm0 = vcmask 261120  }
  0x59   : > { %1866 = vmatprep.subr.bf16.mxu1 %v4108_v1  ;;  %v4112_v4 = vld [vmem:[#allocation5 + $0xc4] ss:$16 sps:$4 sm:$0xff]   ;;  %1736 = vmatpush1.bf16.msra.mxu0 %v4110_v2  ;;  %v4116_v6 = vld [vmem:[#allocation5 + $0xc0] ss:$16 sps:$4 sm:$0xff]   ;;  %v394_v47 = vld [vmem:[%s4730_s24 + $0x38] sm:$0xff]  ;;  %s380_s29 = smul.u32 19, %s3566_s8 }
  0x5a   : > { %1867 = vmatpush1.bf16.msra.mxu1 %v4111_v3  ;;  %v4114_v5 = vld [vmem:[#allocation5 + $0x2c4] ss:$16 sps:$4 sm:$0xff]   ;;  %1737 = vmatprep.subr.bf16.mxu0 %v4112_v4  ;;  %v4117_v7 = vld [vmem:[#allocation5 + $0x2c0] ss:$16 sps:$4 sm:$0xff]   ;;  %v390_v48 = vld [vmem:[%s4730_s24 + $0x18] sm:$0xff]  ;;  %v4744_v53 = vpack.c.bf16 %v394_v47, %v388_v46  ;;  %s3439_s19 = sld [smem:[#allocation2]] }
  0x5b   : > { %1868 = vmatprep.subr.bf16.mxu1 %v4114_v5  ;;  %v4118_v8 = vld [vmem:[#allocation5 + $0xa4] ss:$16 sps:$4 sm:$0xff]   ;;  %v4122_v10 = vld [vmem:[#allocation5 + $0xa0] ss:$16 sps:$4 sm:$0xff]   ;;  %v396_v49 = vld [vmem:[%s4730_s24 + $0x48] sm:$0xff]  ;;  %p381_p3 = scmp.lt.s32.totalorder %s380_s29, 37 }
  0x5c   : > { %v4120_v9 = vld [vmem:[#allocation5 + $0x2a4] ss:$16 sps:$4 sm:$0xff]   ;;  %v4123_v11 = vld [vmem:[#allocation5 + $0x2a0] ss:$16 sps:$4 sm:$0xff]   ;;  %v4746_v54 = vpack.c.bf16 %v396_v49, %v390_v48  ;;  %1767 = vmatprep.mubr.bf16.mxu0 %v4744_v53  ;;  %v4225_v47 = vld [vmem:[#allocation5 + $0x8c] ss:$16 sps:$4 sm:$0xff]  }
  0x5d   : > { %1738 = vmatpush1.bf16.msra.mxu0 %v4116_v6  ;;  %v4124_v12 = vld [vmem:[#allocation5 + $0x84] ss:$16 sps:$4 sm:$0xff]   ;;  %v4128_v14 = vld [vmem:[#allocation5 + $0x80] ss:$16 sps:$4 sm:$0xff]   ;;  %v4223_v49 = vld [vmem:[#allocation5 + $0x88] ss:$16 sps:$4 sm:$0xff]  }
  0x5e   : > { %1869 = vmatpush1.bf16.msra.mxu1 %v4117_v7  ;;  %1739 = vmatprep.subr.bf16.mxu0 %v4118_v8  ;;  %v4126_v13 = vld [vmem:[#allocation5 + $0x284] ss:$16 sps:$4 sm:$0xff]   ;;  %v4129_v15 = vld [vmem:[#allocation5 + $0x280] ss:$16 sps:$4 sm:$0xff]   ;;  %s5701_s29 = smov (!%p381_p3, %s380_s29), 37  ;;  %vm3460_vm1 = vcmask 7168  }
  0x5f   : > { %1870 = vmatprep.subr.bf16.mxu1 %v4120_v9  ;;  %v4130_v16 = vld [vmem:[#allocation5 + $0x64] ss:$16 sps:$4 sm:$0xff]   ;;  %v4134_v18 = vld [vmem:[#allocation5 + $0x60] ss:$16 sps:$4 sm:$0xff]   ;;  %1898 = vmatprep.mubr.bf16.mxu1 %v4746_v54  ;;  %s3576_s11 = sshll.u32 %s5701_s29, 3 }
  0x60   : > { %v4132_v17 = vld [vmem:[#allocation5 + $0x264] ss:$16 sps:$4 sm:$0xff]   ;;  %v4135_v19 = vld [vmem:[#allocation5 + $0x260] ss:$16 sps:$4 sm:$0xff]   ;;  %s5613_s22 = scalar_lea.vmem %s5675_s9, %s3576_s11 }
  0x61   : > { %1740 = vmatpush1.bf16.msra.mxu0 %v4122_v10  ;;  %v4136_v20 = vld [vmem:[#allocation5 + $0x44] ss:$16 sps:$4 sm:$0xff]   ;;  %v4140_v22 = vld [vmem:[#allocation5 + $0x40] ss:$16 sps:$4 sm:$0xff]  }
  0x62   : > { %1871 = vmatpush1.bf16.msra.mxu1 %v4123_v11  ;;  %1741 = vmatprep.subr.bf16.mxu0 %v4124_v12  ;;  %v4138_v21 = vld [vmem:[#allocation5 + $0x244] ss:$16 sps:$4 sm:$0xff]   ;;  %v4141_v23 = vld [vmem:[#allocation5 + $0x240] ss:$16 sps:$4 sm:$0xff]   ;;  %v4207_v11 = vld [vmem:[#allocation5 + $0xec] ss:$16 sps:$4 sm:$0xff]  }
  0x63   : > { %1872 = vmatprep.subr.bf16.mxu1 %v4126_v13  ;;  %v4142_v24 = vld [vmem:[#allocation5 + $0x24] ss:$16 sps:$4 sm:$0xff]   ;;  %v4146_v26 = vld [vmem:[#allocation5 + $0x20] ss:$16 sps:$4 sm:$0xff]   ;;  %v400_v12 = vld [vmem:[%s4730_s24 + $0x68] sm:$0xff] }
  0x64   : > { %v4144_v25 = vld [vmem:[#allocation5 + $0x224] ss:$16 sps:$4 sm:$0xff]   ;;  %v4147_v27 = vld [vmem:[#allocation5 + $0x220] ss:$16 sps:$4 sm:$0xff]   ;;  %v406_v13 = vld [vmem:[%s4730_s24 + $0x98] sm:$0xff] }
  0x65   : > { %1742 = vmatpush1.bf16.msra.mxu0 %v4128_v14  ;;  %v4148_v28 = vld [vmem:[#allocation5 + $0x4] ss:$16 sps:$4 sm:$0xff]   ;;  %v4152_v30 = vld [vmem:[#allocation5] ss:$16 sps:$4 sm:$0xff]  }
  0x66   : > { %1873 = vmatpush1.bf16.msra.mxu1 %v4129_v15  ;;  %1743 = vmatprep.subr.bf16.mxu0 %v4130_v16  ;;  %v4150_v29 = vld [vmem:[#allocation5 + $0x204] ss:$16 sps:$4 sm:$0xff]   ;;  %v4153_v31 = vld [vmem:[#allocation5 + $0x200] ss:$16 sps:$4 sm:$0xff]   ;;  %v402_v16 = vld [vmem:[%s4730_s24 + $0x78] sm:$0xff] }
  0x67   : > { %1874 = vmatprep.subr.bf16.mxu1 %v4132_v17  ;;  %v4154_v32 = vld [vmem:[#allocation5 + $0x1e4] ss:$16 sps:$4 sm:$0xff]   ;;  %v4158_v34 = vld [vmem:[#allocation5 + $0x1e0] ss:$16 sps:$4 sm:$0xff]   ;;  %v408_v17 = vld [vmem:[%s4730_s24 + $0xa8] sm:$0xff] }
  0x68   : > { %v4156_v33 = vld [vmem:[#allocation5 + $0x3e4] ss:$16 sps:$4 sm:$0xff]   ;;  %v4159_v35 = vld [vmem:[#allocation5 + $0x3e0] ss:$16 sps:$4 sm:$0xff]  }
  0x69   : > { %1744 = vmatpush1.bf16.msra.mxu0 %v4134_v18  ;;  %v4160_v36 = vld [vmem:[#allocation5 + $0x1c4] ss:$16 sps:$4 sm:$0xff]   ;;  %v4164_v38 = vld [vmem:[#allocation5 + $0x1c0] ss:$16 sps:$4 sm:$0xff]  }
  0x6a   : > { %1875 = vmatpush1.bf16.msra.mxu1 %v4135_v19  ;;  %1745 = vmatprep.subr.bf16.mxu0 %v4136_v20  ;;  %v4162_v37 = vld [vmem:[#allocation5 + $0x3c4] ss:$16 sps:$4 sm:$0xff]   ;;  %v4165_v39 = vld [vmem:[#allocation5 + $0x3c0] ss:$16 sps:$4 sm:$0xff]   ;;  %v4205_v19 = vld [vmem:[#allocation5 + $0xe8] ss:$16 sps:$4 sm:$0xff]  }
  0x6b   : > { %1876 = vmatprep.subr.bf16.mxu1 %v4138_v21  ;;  %v4166_v40 = vld [vmem:[#allocation5 + $0x1a4] ss:$16 sps:$4 sm:$0xff]   ;;  %v4170_v42 = vld [vmem:[#allocation5 + $0x1a0] ss:$16 sps:$4 sm:$0xff]   ;;  %v4762_v21 = vpack.c.bf16 %v406_v13, %v400_v12  ;;  %v444_v12 = vld [vmem:[%s4730_s24 + $0x1c8] sm:$0xff] }
  0x6c   : > { %v4168_v41 = vld [vmem:[#allocation5 + $0x3a4] ss:$16 sps:$4 sm:$0xff]   ;;  %v4171_v43 = vld [vmem:[#allocation5 + $0x3a0] ss:$16 sps:$4 sm:$0xff]   ;;  %v4243_v13 = vld [vmem:[#allocation5 + $0x2c] ss:$16 sps:$4 sm:$0xff]  }
  0x6d   : > { %1746 = vmatpush1.bf16.msra.mxu0 %v4140_v22  ;;  %v4172_v44 = vld [vmem:[#allocation5 + $0x184] ss:$16 sps:$4 sm:$0xff]   ;;  %v4176_v50 = vld [vmem:[#allocation5 + $0x180] ss:$16 sps:$4 sm:$0xff]   ;;  %v4213_v22 = vld [vmem:[#allocation5 + $0xcc] ss:$16 sps:$4 sm:$0xff]  }
  0x6e   : > { %1877 = vmatpush1.bf16.msra.mxu1 %v4141_v23  ;;  %1747 = vmatprep.subr.bf16.mxu0 %v4142_v24  ;;  %v4174_v45 = vld [vmem:[#allocation5 + $0x384] ss:$16 sps:$4 sm:$0xff]   ;;  %v4177_v51 = vld [vmem:[#allocation5 + $0x380] ss:$16 sps:$4 sm:$0xff]   ;;  %v4764_v24 = vpack.c.bf16 %v408_v17, %v402_v16 }
  0x6f   : > { %1878 = vmatprep.subr.bf16.mxu1 %v4144_v25  ;;  %v4178_v52 = vld [vmem:[#allocation5 + $0x164] ss:$16 sps:$4 sm:$0xff]   ;;  %v4182_v56 = vld [vmem:[#allocation5 + $0x160] ss:$16 sps:$4 sm:$0xff]   ;;  %v4211_v25 = vld [vmem:[#allocation5 + $0xc8] ss:$16 sps:$4 sm:$0xff]  }
  0x70   : > { %v4180_v55 = vld [vmem:[#allocation5 + $0x364] ss:$16 sps:$4 sm:$0xff]   ;;  %v4183_v57 = vld [vmem:[#allocation5 + $0x360] ss:$16 sps:$4 sm:$0xff]  }
  0x71   : > { %1748 = vmatpush1.bf16.msra.mxu0 %v4146_v26  ;;  %v4184_v58 = vld [vmem:[#allocation5 + $0x144] ss:$16 sps:$4 sm:$0xff]   ;;  %v4188_v60 = vld [vmem:[#allocation5 + $0x140] ss:$16 sps:$4 sm:$0xff]  }
  0x72   : > { %1879 = vmatpush1.bf16.msra.mxu1 %v4147_v27  ;;  %1749 = vmatprep.subr.bf16.mxu0 %v4148_v28  ;;  %v4186_v59 = vld [vmem:[#allocation5 + $0x344] ss:$16 sps:$4 sm:$0xff]   ;;  %v4189_v61 = vld [vmem:[#allocation5 + $0x340] ss:$16 sps:$4 sm:$0xff]  }
  0x73   : > { %1880 = vmatprep.subr.bf16.mxu1 %v4150_v29  ;;  %v4190_v62 = vld [vmem:[#allocation5 + $0x124] ss:$16 sps:$4 sm:$0xff]   ;;  %v4194_v0 = vld [vmem:[#allocation5 + $0x120] ss:$16 sps:$4 sm:$0xff]  }
  0x74   : > { %v4192_v63 = vld [vmem:[#allocation5 + $0x324] ss:$16 sps:$4 sm:$0xff]   ;;  %v4195_v1 = vld [vmem:[#allocation5 + $0x320] ss:$16 sps:$4 sm:$0xff]  }
  0x75   : > { %1750 = vmatpush1.bf16.msra.mxu0 %v4152_v30  ;;  %v4196_v2 = vld [vmem:[#allocation5 + $0x104] ss:$16 sps:$4 sm:$0xff]   ;;  %v4200_v4 = vld [vmem:[#allocation5 + $0x100] ss:$16 sps:$4 sm:$0xff]  }
  0x76   : > { %1881 = vmatpush1.bf16.msra.mxu1 %v4153_v31  ;;  %1751 = vmatprep.subr.bf16.mxu0 %v4154_v32  ;;  %v4198_v3 = vld [vmem:[#allocation5 + $0x304] ss:$16 sps:$4 sm:$0xff]   ;;  %v4201_v5 = vld [vmem:[#allocation5 + $0x300] ss:$16 sps:$4 sm:$0xff]   ;;  %v4219_v31 = vld [vmem:[#allocation5 + $0xac] ss:$16 sps:$4 sm:$0xff]  }
  0x77   : > { %1882 = vmatprep.subr.bf16.mxu1 %v4156_v33  ;;  %v387_v6 = vld [vmem:[%s4730_s24] sm:$0xff]  ;;  %v393_v7 = vld [vmem:[%s4730_s24 + $0x30] sm:$0xff]  ;;  %v412_v32 = vld [vmem:[%s4730_s24 + $0xc8] sm:$0xff] }
  0x78   : > { %v389_v8 = vld [vmem:[%s4730_s24 + $0x10] sm:$0xff]  ;;  %v395_v9 = vld [vmem:[%s4730_s24 + $0x40] sm:$0xff]  ;;  %v4756_v14 = vpack.c.bf16 %v393_v7, %v387_v6  ;;  %v418_v33 = vld [vmem:[%s4730_s24 + $0xf8] sm:$0xff] }
  0x79   : > { %1752 = vmatpush2.bf16.msra.mxu0 %v4158_v34  ;;  %v4204_v10 = vld [vmem:[#allocation5 + $0x4e4] ss:$16 sps:$4 sm:$0xff]   ;;  %v4758_v15 = vpack.c.bf16 %v395_v9, %v389_v8  ;;  %v4202_v18 = vld [vmem:[#allocation5 + $0x4e0] ss:$16 sps:$4 sm:$0xff]   ;;  %v414_v34 = vld [vmem:[%s4730_s24 + $0xd8] sm:$0xff] }
  0x7a   : > { %1883 = vmatpush2.bf16.msra.mxu1 %v4159_v35  ;;  %1753 = vmatprep.subr.bf16.mxu0 %v4160_v36  ;;  %v4210_v20 = vld [vmem:[#allocation5 + $0x4c4] ss:$16 sps:$4 sm:$0xff]   ;;  %v4208_v23 = vld [vmem:[#allocation5 + $0x4c0] ss:$16 sps:$4 sm:$0xff]   ;;  %v420_v35 = vld [vmem:[%s4730_s24 + $0x108] sm:$0xff] }
  0x7b   : > { %1884 = vmatprep.subr.bf16.mxu1 %v4162_v37  ;;  %v399_v26 = vld [vmem:[%s4730_s24 + $0x60] sm:$0xff]  ;;  %v405_v27 = vld [vmem:[%s4730_s24 + $0x90] sm:$0xff]  ;;  %v4237_v6 = vld [vmem:[#allocation5 + $0x4c] ss:$16 sps:$4 sm:$0xff]  }
  0x7c   : > { %v401_v28 = vld [vmem:[%s4730_s24 + $0x70] sm:$0xff]  ;;  %v407_v29 = vld [vmem:[%s4730_s24 + $0xa0] sm:$0xff]  ;;  %v4778_v36 = vpack.c.bf16 %v405_v27, %v399_v26  ;;  %v4235_v7 = vld [vmem:[#allocation5 + $0x48] ss:$16 sps:$4 sm:$0xff]  }
  0x7d   : > { %1754 = vmatpush2.bf16.msra.mxu0 %v4164_v38  ;;  %v4216_v30 = vld [vmem:[#allocation5 + $0x4a4] ss:$16 sps:$4 sm:$0xff]   ;;  %v4780_v37 = vpack.c.bf16 %v407_v29, %v401_v28  ;;  %v4214_v38 = vld [vmem:[#allocation5 + $0x4a0] ss:$16 sps:$4 sm:$0xff]   ;;  %v436_v9 = vld [vmem:[%s4730_s24 + $0x188] sm:$0xff] }
  0x7e   : > { %1885 = vmatpush2.bf16.msra.mxu1 %v4165_v39  ;;  %1755 = vmatprep.subr.bf16.mxu0 %v4166_v40  ;;  %v4217_v39 = vld [vmem:[#allocation5 + $0xa8] ss:$16 sps:$4 sm:$0xff]   ;;  %v4782_v40 = vpack.c.bf16 %v418_v33, %v412_v32  ;;  %v413_v46 = vld [vmem:[%s4730_s24 + $0xd0] sm:$0xff]  ;;  %v419_v48 = vld [vmem:[%s4730_s24 + $0x100] sm:$0xff] }
  0x7f   : > { %1886 = vmatprep.subr.bf16.mxu1 %v4168_v41  ;;  %v4784_v41 = vpack.c.bf16 %v420_v35, %v414_v34  ;;  %v4240_v8 = vld [vmem:[#allocation5 + $0x424] ss:$16 sps:$4 sm:$0xff]   ;;  %v4249_v28 = vld [vmem:[#allocation5 + $0xc] ss:$16 sps:$4 sm:$0xff]  }
  0x80   : > { %v437_v26 = vld [vmem:[%s4730_s24 + $0x190] sm:$0xff]  ;;  %v443_v29 = vld [vmem:[%s4730_s24 + $0x1c0] sm:$0xff]  ;;  %v448_v32 = vld [vmem:[%s4730_s24 + $0x1e8] sm:$0xff] }
  0x81   : > { %1756 = vmatpush2.bf16.msra.mxu0 %v4170_v42  ;;  %v4222_v42 = vld [vmem:[#allocation5 + $0x484] ss:$16 sps:$4 sm:$0xff]   ;;  %v454_v33 = vld [vmem:[%s4730_s24 + $0x218] sm:$0xff]  ;;  %v456_v35 = vld [vmem:[%s4730_s24 + $0x228] sm:$0xff] }
  0x82   : > { %1887 = vmatpush2.bf16.msra.mxu1 %v4171_v43  ;;  %1757 = vmatprep.subr.bf16.mxu0 %v4172_v44  ;;  %v4220_v43 = vld [vmem:[#allocation5 + $0x480] ss:$16 sps:$4 sm:$0xff]   ;;  %v4246_v27 = vld [vmem:[#allocation5 + $0x404] ss:$16 sps:$4 sm:$0xff]   ;;  %v450_v34 = vld [vmem:[%s4730_s24 + $0x1f8] sm:$0xff] }
  0x83   : > { %1888 = vmatprep.subr.bf16.mxu1 %v4174_v45  ;;  %v411_v44 = vld [vmem:[%s4730_s24 + $0xc0] sm:$0xff]  ;;  %v417_v45 = vld [vmem:[%s4730_s24 + $0xf0] sm:$0xff] }
  0x85   : > { %1758 = vmatpush2.bf16.msra.mxu0 %v4176_v50  ;;  %v4228_v50 = vld [vmem:[#allocation5 + $0x464] ss:$16 sps:$4 sm:$0xff]  }
  0x86   : > { %1889 = vmatpush2.bf16.msra.mxu1 %v4177_v51  ;;  %1759 = vmatprep.subr.bf16.mxu0 %v4178_v52  ;;  %v4231_v51 = vld [vmem:[#allocation5 + $0x6c] ss:$16 sps:$4 sm:$0xff]  }
  0x87   : > { %1890 = vmatprep.subr.bf16.mxu1 %v4180_v55  ;;  %v424_v52 = vld [vmem:[%s4730_s24 + $0x128] sm:$0xff]  ;;  %v430_v55 = vld [vmem:[%s4730_s24 + $0x158] sm:$0xff] }
  0x89   : > { %1760 = vmatpush2.bf16.msra.mxu0 %v4182_v56  ;;  %v426_v56 = vld [vmem:[%s4730_s24 + $0x138] sm:$0xff] }
  0x8a   : > { %1891 = vmatpush2.bf16.msra.mxu1 %v4183_v57  ;;  %1761 = vmatprep.subr.bf16.mxu0 %v4184_v58  ;;  %v432_v57 = vld [vmem:[%s4730_s24 + $0x168] sm:$0xff]  ;;  %v4798_v58 = vpack.c.bf16 %v417_v45, %v411_v44  ;;  %v4842_v44 = vpack.c.bf16 %v454_v33, %v448_v32  ;;  %v4844_v45 = vpack.c.bf16 %v456_v35, %v450_v34 }
  0x8b   : > { %1892 = vmatprep.subr.bf16.mxu1 %v4186_v59  ;;  %v4800_v59 = vpack.c.bf16 %v419_v48, %v413_v46  ;;  %v4250_v46 = vld [vmem:[#allocation5 + $0x5e0] ss:$16 sps:$4 sm:$0xff]  }
  0x8c   : > { %v447_v48 = vld [vmem:[%s4730_s24 + $0x1e0] sm:$0xff] }
  0x8d   : > { %1762 = vmatpush2.bf16.msra.mxu0 %v4188_v60  ;;  %v4226_v60 = vld [vmem:[#allocation5 + $0x460] ss:$16 sps:$4 sm:$0xff]  }
  0x8e   : > { %1893 = vmatpush2.bf16.msra.mxu1 %v4189_v61  ;;  %1763 = vmatprep.subr.bf16.mxu0 %v4190_v62  ;;  %v4802_v61 = vpack.c.bf16 %v430_v55, %v424_v52  ;;  %v4229_v62 = vld [vmem:[#allocation5 + $0x68] ss:$16 sps:$4 sm:$0xff]   ;;  %v4261_v52 = vld [vmem:[#allocation5 + $0x1cc] ss:$16 sps:$4 sm:$0xff]   ;;  %v455_v55 = vld [vmem:[%s4730_s24 + $0x220] sm:$0xff] }
  0x8f   : > { %1894 = vmatprep.subr.bf16.mxu1 %v4192_v63  ;;  %v4804_v63 = vpack.c.bf16 %v432_v57, %v426_v56  ;;  %v4256_v56 = vld [vmem:[#allocation5 + $0x5c0] ss:$16 sps:$4 sm:$0xff]   ;;  %v460_v57 = vld [vmem:[%s4730_s24 + $0x248] sm:$0xff] }
  0x91   : > { %1764 = vmatpush2.bf16.msra.mxu0 %v4194_v0  ;;  %v423_v0 = vld [vmem:[%s4730_s24 + $0x120] sm:$0xff] }
  0x92   : > { %1895 = vmatpush2.bf16.msra.mxu1 %v4195_v1  ;;  %1765 = vmatprep.subr.bf16.mxu0 %v4196_v2  ;;  %v429_v1 = vld [vmem:[%s4730_s24 + $0x150] sm:$0xff] }
  0x93   : > { %1896 = vmatprep.subr.bf16.mxu1 %v4198_v3  ;;  %v425_v2 = vld [vmem:[%s4730_s24 + $0x130] sm:$0xff]  ;;  %v431_v3 = vld [vmem:[%s4730_s24 + $0x160] sm:$0xff]  ;;  %v4818_v16 = vpack.c.bf16 %v429_v1, %v423_v0  ;;  %v468_v0 = vld [vmem:[%s4730_s24 + $0x288] sm:$0xff] }
  0x94   : > { %v4820_v17 = vpack.c.bf16 %v431_v3, %v425_v2  ;;  %v4259_v1 = vld [vmem:[#allocation5 + $0x1c8] ss:$16 sps:$4 sm:$0xff]   ;;  %v4264_v2 = vld [vmem:[#allocation5 + $0x5a4] ss:$16 sps:$4 sm:$0xff]   ;;  %v4267_v3 = vld [vmem:[#allocation5 + $0x1ac] ss:$16 sps:$4 sm:$0xff]  }
  0x95   : > { %1766 = vmatpush2.bf16.msra.mxu0 %v4200_v4  ;;  %v4232_v4 = vld [vmem:[#allocation5 + $0x440] ss:$16 sps:$4 sm:$0xff]  }
  0x96   : > { %1897 = vmatpush2.bf16.msra.mxu1 %v4201_v5  ;;  %1997 = vmatprep.subr.bf16.mxu0 %v4204_v10  ;;  %v4234_v5 = vld [vmem:[#allocation5 + $0x444] ss:$16 sps:$4 sm:$0xff]   ;;  %v442_v10 = vld [vmem:[%s4730_s24 + $0x1b8] sm:$0xff] }
  0x97   : > { %2128 = vmatprep.subr.bf16.mxu1 %v4207_v11  ;;  %v438_v11 = vld [vmem:[%s4730_s24 + $0x198] sm:$0xff] }
  0x98   : > { %1768 = vmatmul.mubr.bf16.vlgmr.msra.gmra.mxu0 %v4756_v14 }
  0x99   : > { %1899 = vmatmul.mubr.bf16.vlgmr.msra.gmra.mxu1 %v4758_v15  ;;  %1998 = vmatpush1.bf16.msra.mxu0 %v4202_v18  ;;  %v4238_v18 = vld [vmem:[#allocation5 + $0x420] ss:$16 sps:$4 sm:$0xff]  }
  0x9a   : > { %2129 = vmatpush1.bf16.msra.mxu1 %v4205_v19  ;;  %1999 = vmatprep.subr.bf16.mxu0 %v4210_v20  ;;  %v4822_v19 = vpack.c.bf16 %v442_v10, %v436_v9  ;;  %v4824_v20 = vpack.c.bf16 %v444_v12, %v438_v11  ;;  %v4265_v9 = vld [vmem:[#allocation5 + $0x1a8] ss:$16 sps:$4 sm:$0xff]   ;;  %v459_v10 = vld [vmem:[%s4730_s24 + $0x240] sm:$0xff]  ;;  %v465_v11 = vld [vmem:[%s4730_s24 + $0x270] sm:$0xff] }
  0x9b   : > { %1777 = vmatprep.mubr.bf16.mxu0 %v4762_v21  ;;  %1908 = vmatprep.mubr.bf16.mxu1 %v4764_v24  ;;  %v461_v12 = vld [vmem:[%s4730_s24 + $0x250] sm:$0xff]  ;;  %v4878_v32 = vpack.c.bf16 %v465_v11, %v459_v10  ;;  %v4289_v11 = vld [vmem:[#allocation5 + $0x128] ss:$16 sps:$4 sm:$0xff]  }
  0x9c   : > { %2130 = vmatprep.subr.bf16.mxu1 %v4213_v22  ;;  %v4241_v22 = vld [vmem:[#allocation5 + $0x28] ss:$16 sps:$4 sm:$0xff]   ;;  %v4286_v10 = vld [vmem:[#allocation5 + $0x520] ss:$16 sps:$4 sm:$0xff]  }
  0x9d   : > { %2000 = vmatpush1.bf16.msra.mxu0 %v4208_v23  ;;  %v435_v23 = vld [vmem:[%s4730_s24 + $0x180] sm:$0xff] }
  0x9e   : > { %2131 = vmatpush1.bf16.msra.mxu1 %v4211_v25  ;;  %2001 = vmatprep.subr.bf16.mxu0 %v4216_v30  ;;  %v441_v25 = vld [vmem:[%s4730_s24 + $0x1b0] sm:$0xff] }
  0x9f   : > { %2132 = vmatprep.subr.bf16.mxu1 %v4219_v31  ;;  %v4244_v30 = vld [vmem:[#allocation5 + $0x400] ss:$16 sps:$4 sm:$0xff]   ;;  %v4247_v31 = vld [vmem:[#allocation5 + $0x8] ss:$16 sps:$4 sm:$0xff]  }
  0xa0   : > { %1778 = vmatmul.mubr.bf16.gmra.mxu0 %v4778_v36 }
  0xa1   : > { %1909 = vmatmul.mubr.bf16.gmra.mxu1 %v4780_v37  ;;  %2002 = vmatpush1.bf16.msra.mxu0 %v4214_v38  ;;  %v4252_v38 = vld [vmem:[#allocation5 + $0x5e4] ss:$16 sps:$4 sm:$0xff]  }
  0xa2   : > { %2133 = vmatpush1.bf16.msra.mxu1 %v4217_v39  ;;  %1787 = vmatprep.mubr.bf16.mxu0 %v4782_v40  ;;  %v4255_v39 = vld [vmem:[#allocation5 + $0x1ec] ss:$16 sps:$4 sm:$0xff]  }
  0xa3   : > { %1918 = vmatprep.mubr.bf16.mxu1 %v4784_v41  ;;  %2003 = vmatprep.subr.bf16.mxu0 %v4222_v42  ;;  %v4838_v42 = vpack.c.bf16 %v441_v25, %v435_v23  ;;  %v472_v23 = vld [vmem:[%s4730_s24 + $0x2a8] sm:$0xff]  ;;  %v478_v25 = vld [vmem:[%s4730_s24 + $0x2d8] sm:$0xff] }
  0xa4   : > { %2134 = vmatprep.subr.bf16.mxu1 %v4225_v47  ;;  %v4253_v47 = vld [vmem:[#allocation5 + $0x1e8] ss:$16 sps:$4 sm:$0xff]   ;;  %v4882_v34 = vpack.c.bf16 %v478_v25, %v472_v23  ;;  %v4297_v23 = vld [vmem:[#allocation5 + $0x10c] ss:$16 sps:$4 sm:$0xff]   ;;  %v491_v25 = vld [vmem:[%s4730_s24 + $0x340] sm:$0xff] }
  0xa5   : > { %2004 = vmatpush1.bf16.msra.mxu0 %v4220_v43  ;;  %v4840_v43 = vpack.c.bf16 %v443_v29, %v437_v26  ;;  %v474_v26 = vld [vmem:[%s4730_s24 + $0x2b8] sm:$0xff] }
  0xa6   : > { %2135 = vmatpush1.bf16.msra.mxu1 %v4223_v49  ;;  %2005 = vmatprep.subr.bf16.mxu0 %v4228_v50  ;;  %v453_v49 = vld [vmem:[%s4730_s24 + $0x210] sm:$0xff]  ;;  %v4271_v29 = vld [vmem:[#allocation5 + $0x188] ss:$16 sps:$4 sm:$0xff]  }
  0xa7   : > { %2136 = vmatprep.subr.bf16.mxu1 %v4231_v51  ;;  %v449_v50 = vld [vmem:[%s4730_s24 + $0x1f0] sm:$0xff] }
  0xa8   : > { %1788 = vmatmul.mubr.bf16.gmra.mxu0 %v4798_v58  ;;  %v4258_v51 = vld [vmem:[#allocation5 + $0x5c4] ss:$16 sps:$4 sm:$0xff]  }
  0xa9   : > { %1919 = vmatmul.mubr.bf16.gmra.mxu1 %v4800_v59  ;;  %2006 = vmatpush1.bf16.msra.mxu0 %v4226_v60  ;;  %v466_v60 = vld [vmem:[%s4730_s24 + $0x278] sm:$0xff] }
  0xaa   : > { %1797 = vmatprep.mubr.bf16.mxu0 %v4802_v61  ;;  %1928 = vmatprep.mubr.bf16.mxu1 %v4804_v63 }
  0xab   : > { %2137 = vmatpush1.bf16.msra.mxu1 %v4229_v62  ;;  %2007 = vmatprep.subr.bf16.mxu0 %v4234_v5  ;;  %v462_v62 = vld [vmem:[%s4730_s24 + $0x258] sm:$0xff]  ;;  %v4860_v5 = vpack.c.bf16 %v455_v55, %v449_v50  ;;  %v4282_v50 = vld [vmem:[#allocation5 + $0x544] ss:$16 sps:$4 sm:$0xff]  }
  0xac   : > { %2138 = vmatprep.subr.bf16.mxu1 %v4237_v6  ;;  %v4862_v6 = vpack.c.bf16 %v466_v60, %v460_v57  ;;  %v490_v55 = vld [vmem:[%s4730_s24 + $0x338] sm:$0xff]  ;;  %v492_v57 = vld [vmem:[%s4730_s24 + $0x348] sm:$0xff]  ;;  %v4280_v60 = vld [vmem:[#allocation5 + $0x540] ss:$16 sps:$4 sm:$0xff]  }
  0xad   : > { %2008 = vmatpush1.bf16.msra.mxu0 %v4232_v4  ;;  %v4858_v4 = vpack.c.bf16 %v453_v49, %v447_v48  ;;  %v473_v48 = vld [vmem:[%s4730_s24 + $0x2b0] sm:$0xff]  ;;  %v479_v49 = vld [vmem:[%s4730_s24 + $0x2e0] sm:$0xff] }
  0xae   : > { %2009 = vmatprep.subr.bf16.mxu0 %v4240_v8  ;;  %v4262_v8 = vld [vmem:[#allocation5 + $0x5a0] ss:$16 sps:$4 sm:$0xff]  }
  0xaf   : > { %2139 = vmatpush1.bf16.msra.mxu1 %v4235_v7  ;;  %v4864_v7 = vpack.c.bf16 %v468_v0, %v462_v62  ;;  %v4283_v62 = vld [vmem:[#allocation5 + $0x148] ss:$16 sps:$4 sm:$0xff]   ;;  %v4288_v0 = vld [vmem:[#allocation5 + $0x524] ss:$16 sps:$4 sm:$0xff]  }
  0xb0   : > { %2140 = vmatprep.subr.bf16.mxu1 %v4243_v13  ;;  %1798 = vmatmul.mubr.bf16.gmra.mxu0 %v4818_v16  ;;  %v467_v13 = vld [vmem:[%s4730_s24 + $0x280] sm:$0xff] }
  0xb1   : > { %1929 = vmatmul.mubr.bf16.gmra.mxu1 %v4820_v17  ;;  %1807 = vmatprep.mubr.bf16.mxu0 %v4822_v19  ;;  %v4880_v33 = vpack.c.bf16 %v467_v13, %v461_v12  ;;  %v4294_v12 = vld [vmem:[#allocation5 + $0x504] ss:$16 sps:$4 sm:$0xff]  }
  0xb2   : > { %1938 = vmatprep.mubr.bf16.mxu1 %v4824_v20  ;;  %2010 = vmatpush1.bf16.msra.mxu0 %v4238_v18  ;;  %v4270_v18 = vld [vmem:[#allocation5 + $0x584] ss:$16 sps:$4 sm:$0xff]  }
  0xb3   : > { %2141 = vmatpush1.bf16.msra.mxu1 %v4241_v22  ;;  %2011 = vmatprep.subr.bf16.mxu0 %v4246_v27  ;;  %v4273_v22 = vld [vmem:[#allocation5 + $0x18c] ss:$16 sps:$4 sm:$0xff]   ;;  %v483_v13 = vld [vmem:[%s4730_s24 + $0x300] sm:$0xff] }
  0xb4   : > { %2142 = vmatprep.subr.bf16.mxu1 %v4249_v28  ;;  %v480_v27 = vld [vmem:[%s4730_s24 + $0x2e8] sm:$0xff]  ;;  %v4268_v28 = vld [vmem:[#allocation5 + $0x580] ss:$16 sps:$4 sm:$0xff]  }
  0xb5   : > { %v4884_v35 = vpack.c.bf16 %v480_v27, %v474_v26  ;;  %v496_v26 = vld [vmem:[%s4730_s24 + $0x368] sm:$0xff]  ;;  %v498_v27 = vld [vmem:[%s4730_s24 + $0x378] sm:$0xff] }
  0xb6   : > { %2012 = vmatpush1.bf16.msra.mxu0 %v4244_v30  ;;  %v4276_v30 = vld [vmem:[#allocation5 + $0x564] ss:$16 sps:$4 sm:$0xff]  }
  0xb7   : > { %2143 = vmatpush1.bf16.msra.mxu1 %v4247_v31  ;;  %2013 = vmatprep.subr.bf16.mxu0 %v4252_v38  ;;  %v4279_v31 = vld [vmem:[#allocation5 + $0x16c] ss:$16 sps:$4 sm:$0xff]   ;;  %v4274_v38 = vld [vmem:[#allocation5 + $0x560] ss:$16 sps:$4 sm:$0xff]  }
  0xb8   : > { %2144 = vmatprep.subr.bf16.mxu1 %v4255_v39  ;;  %1808 = vmatmul.mubr.bf16.gmra.mxu0 %v4838_v42  ;;  %v4277_v39 = vld [vmem:[#allocation5 + $0x168] ss:$16 sps:$4 sm:$0xff]  }
  0xb9   : > { %1939 = vmatmul.mubr.bf16.gmra.mxu1 %v4840_v43  ;;  %1817 = vmatprep.mubr.bf16.mxu0 %v4842_v44 }
  0xba   : > { %1948 = vmatprep.mubr.bf16.mxu1 %v4844_v45  ;;  %2014 = vmatpush2.bf16.msra.mxu0 %v4250_v46  ;;  %v471_v46 = vld [vmem:[%s4730_s24 + $0x2a0] sm:$0xff] }
  0xbb   : > { %2145 = vmatpush2.bf16.msra.mxu1 %v4253_v47  ;;  %2015 = vmatprep.subr.bf16.mxu0 %v4258_v51  ;;  %v477_v47 = vld [vmem:[%s4730_s24 + $0x2d0] sm:$0xff]  ;;  %v4285_v51 = vld [vmem:[#allocation5 + $0x14c] ss:$16 sps:$4 sm:$0xff]  }
  0xbc   : > { %2146 = vmatprep.subr.bf16.mxu1 %v4261_v52  ;;  %v484_v52 = vld [vmem:[%s4730_s24 + $0x308] sm:$0xff] }
  0xbe   : > { %2016 = vmatpush2.bf16.msra.mxu0 %v4256_v56  ;;  %v486_v56 = vld [vmem:[%s4730_s24 + $0x318] sm:$0xff] }
  0xbf   : > { %2147 = vmatpush2.bf16.msra.mxu1 %v4259_v1  ;;  %2017 = vmatprep.subr.bf16.mxu0 %v4264_v2  ;;  %v4291_v1 = vld [vmem:[#allocation5 + $0x12c] ss:$16 sps:$4 sm:$0xff]   ;;  %v4898_v2 = vpack.c.bf16 %v477_v47, %v471_v46  ;;  %v4920_v46 = vpack.c.bf16 %v496_v26, %v496_v26  ;;  %v4922_v47 = vpack.c.bf16 %v498_v27, %v498_v27 }
  0xc0   : > { %2148 = vmatprep.subr.bf16.mxu1 %v4267_v3  ;;  %1818 = vmatmul.mubr.bf16.gmra.mxu0 %v4858_v4  ;;  %v4900_v3 = vpack.c.bf16 %v479_v49, %v473_v48  ;;  %v495_v48 = vld [vmem:[%s4730_s24 + $0x360] sm:$0xff]  ;;  %v497_v49 = vld [vmem:[%s4730_s24 + $0x370] sm:$0xff]  ;;  %v4312_v26 = vld [vmem:[#allocation5 + $0x2ac] ss:$16 sps:$4 sm:$0xff]  }
  0xc1   : > { %1949 = vmatmul.mubr.bf16.gmra.mxu1 %v4860_v5  ;;  %1827 = vmatprep.mubr.bf16.mxu0 %v4862_v6  ;;  %v4315_v27 = vld [vmem:[#allocation5 + $0x4ac] ss:$16 sps:$4 sm:$0xff]  }
  0xc2   : > { %1958 = vmatprep.mubr.bf16.mxu1 %v4864_v7  ;;  %2018 = vmatpush2.bf16.msra.mxu0 %v4262_v8  ;;  %v4902_v8 = vpack.c.bf16 %v490_v55, %v484_v52  ;;  %v4932_v52 = vpack.c.bf16 %v495_v48, %v495_v48  ;;  %v4934_v55 = vpack.c.bf16 %v497_v49, %v497_v49  ;;  %v4318_v49 = vld [vmem:[#allocation5 + $0x28c] ss:$16 sps:$4 sm:$0xff]  }
  0xc3   : > { %2149 = vmatpush2.bf16.msra.mxu1 %v4265_v9  ;;  %2019 = vmatprep.subr.bf16.mxu0 %v4270_v18  ;;  %v4904_v9 = vpack.c.bf16 %v492_v57, %v486_v56  ;;  %v489_v18 = vld [vmem:[%s4730_s24 + $0x330] sm:$0xff]  ;;  %v391_v57 = vld [vmem:[%s4730_s24 + $0x20] sm:$0xff] }
  0xc4   : > { %2150 = vmatprep.subr.bf16.mxu1 %v4273_v22  ;;  %v485_v22 = vld [vmem:[%s4730_s24 + $0x310] sm:$0xff] }
  0xc6   : > { %2020 = vmatpush2.bf16.msra.mxu0 %v4268_v28  ;;  %v4292_v28 = vld [vmem:[#allocation5 + $0x500] ss:$16 sps:$4 sm:$0xff]  }
  0xc7   : > { %2151 = vmatpush2.bf16.msra.mxu1 %v4271_v29  ;;  %2021 = vmatprep.subr.bf16.mxu0 %v4276_v30  ;;  %v4295_v29 = vld [vmem:[#allocation5 + $0x108] ss:$16 sps:$4 sm:$0xff]   ;;  %v4300_v30 = vld [vmem:[#allocation5 + $0x2ec] ss:$16 sps:$4 sm:$0xff]  }
  0xc8   : > { %2152 = vmatprep.subr.bf16.mxu1 %v4279_v31  ;;  %1828 = vmatmul.mubr.bf16.gmra.mxu0 %v4878_v32  ;;  %v4303_v31 = vld [vmem:[#allocation5 + $0x4ec] ss:$16 sps:$4 sm:$0xff]  }
  0xc9   : > { %1959 = vmatmul.mubr.bf16.gmra.mxu1 %v4880_v33  ;;  %1837 = vmatprep.mubr.bf16.mxu0 %v4882_v34 }
  0xca   : > { %1968 = vmatprep.mubr.bf16.mxu1 %v4884_v35  ;;  %2022 = vmatpush2.bf16.msra.mxu0 %v4274_v38  ;;  %v4916_v38 = vpack.c.bf16 %v489_v18, %v483_v13  ;;  %v4304_v18 = vld [vmem:[#allocation5 + $0x2c8] ss:$16 sps:$4 sm:$0xff]  }
  0xcb   : > { %2153 = vmatpush2.bf16.msra.mxu1 %v4277_v39  ;;  %2023 = vmatprep.subr.bf16.mxu0 %v4282_v50  ;;  %v4918_v39 = vpack.c.bf16 %v491_v25, %v485_v22  ;;  %v392_v50 = vld [vmem:[%s4730_s24 + $0x28] sm:$0xff]  ;;  %v409_v25 = vld [vmem:[%s4730_s24 + $0xb0] sm:$0xff] }
  0xcc   : > { %2154 = vmatprep.subr.bf16.mxu1 %v4285_v51  ;;  %v398_v51 = vld [vmem:[%s4730_s24 + $0x58] sm:$0xff] }
  0xcd   : > { %v4936_v56 = vpack.c.bf16 %v398_v51, %v392_v50  ;;  %v4309_v22 = vld [vmem:[#allocation5 + $0x4cc] ss:$16 sps:$4 sm:$0xff]   ;;  %v4316_v50 = vld [vmem:[#allocation5 + $0x288] ss:$16 sps:$4 sm:$0xff]   ;;  %v415_v51 = vld [vmem:[%s4730_s24 + $0xe0] sm:$0xff] }
  0xce   : > { %2024 = vmatpush2.bf16.msra.mxu0 %v4280_v60  ;;  %v397_v60 = vld [vmem:[%s4730_s24 + $0x50] sm:$0xff] }
  0xcf   : > { %2155 = vmatpush2.bf16.msra.mxu1 %v4283_v62  ;;  %2025 = vmatprep.subr.bf16.mxu0 %v4288_v0  ;;  %v404_v62 = vld [vmem:[%s4730_s24 + $0x88] sm:$0xff]  ;;  %v410_v0 = vld [vmem:[%s4730_s24 + $0xb8] sm:$0xff] }
  0xd0   : > { %2156 = vmatprep.subr.bf16.mxu1 %v4291_v1  ;;  %1838 = vmatmul.mubr.bf16.gmra.mxu0 %v4898_v2  ;;  %v4946_v1 = vpack.c.bf16 %v397_v60, %v391_v57  ;;  %v4948_v13 = vpack.c.bf16 %v410_v0, %v404_v62  ;;  %v4321_v57 = vld [vmem:[#allocation5 + $0x48c] ss:$16 sps:$4 sm:$0xff]   ;;  %v4319_v60 = vld [vmem:[#allocation5 + $0x488] ss:$16 sps:$4 sm:$0xff]  }
  0xd1   : > { %1969 = vmatmul.mubr.bf16.gmra.mxu1 %v4900_v3  ;;  %1847 = vmatprep.mubr.bf16.mxu0 %v4902_v8  ;;  %v4324_v62 = vld [vmem:[#allocation5 + $0x26c] ss:$16 sps:$4 sm:$0xff]  }
  0xd2   : > { %1978 = vmatprep.mubr.bf16.mxu1 %v4904_v9  ;;  %2026 = vmatpush2.bf16.msra.mxu0 %v4286_v10  ;;  %v4298_v10 = vld [vmem:[#allocation5 + $0x2e8] ss:$16 sps:$4 sm:$0xff]   ;;  %v4327_v0 = vld [vmem:[#allocation5 + $0x46c] ss:$16 sps:$4 sm:$0xff]  }
  0xd3   : > { %2157 = vmatpush2.bf16.msra.mxu1 %v4289_v11  ;;  %2027 = vmatprep.subr.bf16.mxu0 %v4294_v12  ;;  %v4301_v11 = vld [vmem:[#allocation5 + $0x4e8] ss:$16 sps:$4 sm:$0xff]   ;;  %v4306_v12 = vld [vmem:[#allocation5 + $0x2cc] ss:$16 sps:$4 sm:$0xff]  }
  0xd4   : > { %2158 = vmatprep.subr.bf16.mxu1 %v4297_v23  ;;  %v403_v23 = vld [vmem:[%s4730_s24 + $0x80] sm:$0xff] }
  0xd6   : > { %2028 = vmatpush2.bf16.msra.mxu0 %v4292_v28  ;;  %v416_v28 = vld [vmem:[%s4730_s24 + $0xe8] sm:$0xff] }
  0xd7   : > { %2159 = vmatpush2.bf16.msra.mxu1 %v4295_v29  ;;  %2259 = vmatprep.subr.bf16.mxu0 %v4300_v30  ;;  %v422_v29 = vld [vmem:[%s4730_s24 + $0x118] sm:$0xff]  ;;  %v4958_v30 = vpack.c.bf16 %v409_v25, %v403_v23  ;;  %v427_v23 = vld [vmem:[%s4730_s24 + $0x140] sm:$0xff]  ;;  %v433_v25 = vld [vmem:[%s4730_s24 + $0x170] sm:$0xff] }
  0xd8   : > { %2390 = vmatprep.subr.bf16.mxu1 %v4303_v31  ;;  %1848 = vmatmul.mubr.bf16.gmra.mxu0 %v4916_v38  ;;  %v4313_v31 = vld [vmem:[#allocation5 + $0x4a8] ss:$16 sps:$4 sm:$0xff]   ;;  %v4960_v48 = vpack.c.bf16 %v422_v29, %v416_v28  ;;  %v4336_v28 = vld [vmem:[#allocation5 + $0x22c] ss:$16 sps:$4 sm:$0xff]  }
  0xd9   : > { %1979 = vmatmul.mubr.bf16.gmra.mxu1 %v4918_v39  ;;  %1857 = vmatprep.mubr.bf16.mxu0 %v4920_v46  ;;  %v440_v29 = vld [vmem:[%s4730_s24 + $0x1a8] sm:$0xff] }
  0xda   : > { %1988 = vmatprep.mubr.bf16.mxu1 %v4922_v47 }
  0xe0   : > { %1858 = vmatmul.mubr.bf16.gmra.mxu0 %v4932_v52 }
  0xe1   : > { %1989 = vmatmul.mubr.bf16.gmra.mxu1 %v4934_v55  ;;  %2029 = vmatprep.mubr.bf16.mxu0 %v4936_v56 }
  0xe2   : > { %2160 = vmatprep.mubr.bf16.mxu1 %v4744_v53  ;;  %v4307_v53 = vld [vmem:[#allocation5 + $0x4c8] ss:$16 sps:$4 sm:$0xff]  }
  0xe8   : > { %2030 = vmatmul.mubr.bf16.vlgmr.msra.gmra.mxu0 %v4946_v1 }
  0xe9   : > { %2161 = vmatmul.mubr.bf16.vlgmr.msra.gmra.mxu1 %v4756_v14  ;;  %2260 = vmatpush1.bf16.msra.mxu0 %v4298_v10  ;;  %v4310_v14 = vld [vmem:[#allocation5 + $0x2a8] ss:$16 sps:$4 sm:$0xff]  }
  0xea   : > { %2391 = vmatpush1.bf16.msra.mxu1 %v4301_v11  ;;  %2261 = vmatprep.subr.bf16.mxu0 %v4306_v12  ;;  %v428_v10 = vld [vmem:[%s4730_s24 + $0x148] sm:$0xff]  ;;  %v434_v11 = vld [vmem:[%s4730_s24 + $0x178] sm:$0xff] }
  0xeb   : > { %2039 = vmatprep.mubr.bf16.mxu0 %v4948_v13  ;;  %2170 = vmatprep.mubr.bf16.mxu1 %v4762_v21  ;;  %v421_v21 = vld [vmem:[%s4730_s24 + $0x110] sm:$0xff] }
  0xec   : > { %2392 = vmatprep.subr.bf16.mxu1 %v4309_v22  ;;  %v4970_v12 = vpack.c.bf16 %v421_v21, %v415_v51  ;;  %v4325_v22 = vld [vmem:[#allocation5 + $0x468] ss:$16 sps:$4 sm:$0xff]   ;;  %v4345_v21 = vld [vmem:[#allocation5 + $0x40c] ss:$16 sps:$4 sm:$0xff]  }
  0xed   : > { %2262 = vmatpush1.bf16.msra.mxu0 %v4304_v18  ;;  %v4972_v18 = vpack.c.bf16 %v434_v11, %v428_v10  ;;  %v452_v10 = vld [vmem:[%s4730_s24 + $0x208] sm:$0xff]  ;;  %v458_v11 = vld [vmem:[%s4730_s24 + $0x238] sm:$0xff] }
  0xee   : > { %2393 = vmatpush1.bf16.msra.mxu1 %v4307_v53  ;;  %2263 = vmatprep.subr.bf16.mxu0 %v4312_v26  ;;  %v4330_v53 = vld [vmem:[#allocation5 + $0x24c] ss:$16 sps:$4 sm:$0xff]  }
  0xef   : > { %2394 = vmatprep.subr.bf16.mxu1 %v4315_v27  ;;  %v4333_v26 = vld [vmem:[#allocation5 + $0x44c] ss:$16 sps:$4 sm:$0xff]   ;;  %v4331_v27 = vld [vmem:[#allocation5 + $0x448] ss:$16 sps:$4 sm:$0xff]  }
  0xf0   : > { %2040 = vmatmul.mubr.bf16.gmra.mxu0 %v4958_v30 }
  0xf1   : > { %2171 = vmatmul.mubr.bf16.gmra.mxu1 %v4778_v36  ;;  %2264 = vmatpush1.bf16.msra.mxu0 %v4310_v14  ;;  %v4322_v36 = vld [vmem:[#allocation5 + $0x268] ss:$16 sps:$4 sm:$0xff]  }
  0xf2   : > { %2395 = vmatpush1.bf16.msra.mxu1 %v4313_v31  ;;  %2049 = vmatprep.mubr.bf16.mxu0 %v4960_v48  ;;  %v446_v14 = vld [vmem:[%s4730_s24 + $0x1d8] sm:$0xff] }
  0xf3   : > { %2180 = vmatprep.mubr.bf16.mxu1 %v4782_v40  ;;  %2265 = vmatprep.subr.bf16.mxu0 %v4318_v49  ;;  %v4328_v40 = vld [vmem:[#allocation5 + $0x248] ss:$16 sps:$4 sm:$0xff]   ;;  %v4339_v31 = vld [vmem:[#allocation5 + $0x42c] ss:$16 sps:$4 sm:$0xff]   ;;  %v4982_v49 = vpack.c.bf16 %v433_v25, %v427_v23  ;;  %v4984_v51 = vpack.c.bf16 %v446_v14, %v440_v29  ;;  %v4996_v25 = vpack.c.bf16 %v458_v11, %v452_v10 }
  0xf4   : > { %2396 = vmatprep.subr.bf16.mxu1 %v4321_v57  ;;  %v4342_v57 = vld [vmem:[#allocation5 + $0x20c] ss:$16 sps:$4 sm:$0xff]   ;;  %v4349_v23 = vld [vmem:[#allocation5 + $0x5e8] ss:$16 sps:$4 sm:$0xff]  }
  0xf5   : > { %2266 = vmatpush1.bf16.msra.mxu0 %v4316_v50  ;;  %v4337_v50 = vld [vmem:[#allocation5 + $0x428] ss:$16 sps:$4 sm:$0xff]  }
  0xf6   : > { %2397 = vmatpush1.bf16.msra.mxu1 %v4319_v60  ;;  %2267 = vmatprep.subr.bf16.mxu0 %v4324_v62  ;;  %v445_v60 = vld [vmem:[%s4730_s24 + $0x1d0] sm:$0xff]  ;;  %v4340_v62 = vld [vmem:[#allocation5 + $0x208] ss:$16 sps:$4 sm:$0xff]  }
  0xf7   : > { %2398 = vmatprep.subr.bf16.mxu1 %v4327_v0  ;;  %v4343_v0 = vld [vmem:[#allocation5 + $0x408] ss:$16 sps:$4 sm:$0xff]  }
  0xf8   : > { %2050 = vmatmul.mubr.bf16.gmra.mxu0 %v4970_v12  ;;  %v464_v29 = vld [vmem:[%s4730_s24 + $0x268] sm:$0xff]  ;;  %v470_v14 = vld [vmem:[%s4730_s24 + $0x298] sm:$0xff] }
  0xf9   : > { %2181 = vmatmul.mubr.bf16.gmra.mxu1 %v4798_v58  ;;  %2268 = vmatpush1.bf16.msra.mxu0 %v4322_v36  ;;  %v4334_v58 = vld [vmem:[#allocation5 + $0x228] ss:$16 sps:$4 sm:$0xff]   ;;  %v4348_v36 = vld [vmem:[#allocation5 + $0x3ec] ss:$16 sps:$4 sm:$0xff]  }
  0xfa   : > { %2059 = vmatprep.mubr.bf16.mxu0 %v4972_v18  ;;  %2190 = vmatprep.mubr.bf16.mxu1 %v4802_v61  ;;  %v439_v61 = vld [vmem:[%s4730_s24 + $0x1a0] sm:$0xff]  ;;  %v476_v10 = vld [vmem:[%s4730_s24 + $0x2c8] sm:$0xff]  ;;  %v482_v11 = vld [vmem:[%s4730_s24 + $0x2f8] sm:$0xff] }
  0xfb   : > { %2399 = vmatpush1.bf16.msra.mxu1 %v4325_v22  ;;  %2269 = vmatprep.subr.bf16.mxu0 %v4330_v53  ;;  %v4351_v22 = vld [vmem:[#allocation5 + $0x5ec] ss:$16 sps:$4 sm:$0xff]   ;;  %v4994_v53 = vpack.c.bf16 %v445_v60, %v439_v61  ;;  %v5008_v61 = vpack.c.bf16 %v470_v14, %v464_v29  ;;  %v481_v29 = vld [vmem:[%s4730_s24 + $0x2f0] sm:$0xff] }
  0xfc   : > { %2400 = vmatprep.subr.bf16.mxu1 %v4333_v26  ;;  %v4354_v26 = vld [vmem:[#allocation5 + $0x3cc] ss:$16 sps:$4 sm:$0xff]  }
  0xfd   : > { %2270 = vmatpush1.bf16.msra.mxu0 %v4328_v40  ;;  %v4357_v40 = vld [vmem:[#allocation5 + $0x5cc] ss:$16 sps:$4 sm:$0xff]  }
  0xfe   : > { %2271 = vmatprep.subr.bf16.mxu0 %v4336_v28  ;;  %v4352_v28 = vld [vmem:[#allocation5 + $0x3c8] ss:$16 sps:$4 sm:$0xff]   ;;  %v4366_v60 = vld [vmem:[#allocation5 + $0x38c] ss:$16 sps:$4 sm:$0xff]  }
  0xff   : > { %2401 = vmatpush1.bf16.msra.mxu1 %v4331_v27  ;;  %v457_v27 = vld [vmem:[%s4730_s24 + $0x230] sm:$0xff]  ;;  %v488_v14 = vld [vmem:[%s4730_s24 + $0x328] sm:$0xff] }
 0x100   : > { %2402 = vmatprep.subr.bf16.mxu1 %v4339_v31  ;;  %2060 = vmatmul.mubr.bf16.gmra.mxu0 %v4982_v49  ;;  %v4355_v31 = vld [vmem:[#allocation5 + $0x5c8] ss:$16 sps:$4 sm:$0xff]  }
 0x101   : > { %2191 = vmatmul.mubr.bf16.gmra.mxu1 %v4818_v16  ;;  %2069 = vmatprep.mubr.bf16.mxu0 %v4984_v51  ;;  %v4346_v16 = vld [vmem:[#allocation5 + $0x3e8] ss:$16 sps:$4 sm:$0xff]  }
 0x102   : > { %2200 = vmatprep.mubr.bf16.mxu1 %v4822_v19  ;;  %2272 = vmatpush1.bf16.msra.mxu0 %v4334_v58  ;;  %v451_v19 = vld [vmem:[%s4730_s24 + $0x200] sm:$0xff]  ;;  %v4360_v58 = vld [vmem:[#allocation5 + $0x3ac] ss:$16 sps:$4 sm:$0xff]  }
 0x103   : > { %2403 = vmatpush1.bf16.msra.mxu1 %v4337_v50  ;;  %2273 = vmatprep.subr.bf16.mxu0 %v4342_v57  ;;  %v4363_v50 = vld [vmem:[#allocation5 + $0x5ac] ss:$16 sps:$4 sm:$0xff]   ;;  %v5006_v57 = vpack.c.bf16 %v457_v27, %v451_v19  ;;  %v4373_v19 = vld [vmem:[#allocation5 + $0x568] ss:$16 sps:$4 sm:$0xff]  }
 0x104   : > { %2404 = vmatprep.subr.bf16.mxu1 %v4345_v21  ;;  %v4361_v21 = vld [vmem:[#allocation5 + $0x5a8] ss:$16 sps:$4 sm:$0xff]   ;;  %v4381_v27 = vld [vmem:[#allocation5 + $0x54c] ss:$16 sps:$4 sm:$0xff]  }
 0x106   : > { %2274 = vmatpush1.bf16.msra.mxu0 %v4340_v62  ;;  %v4369_v62 = vld [vmem:[#allocation5 + $0x58c] ss:$16 sps:$4 sm:$0xff]  }
 0x107   : > { %2405 = vmatpush1.bf16.msra.mxu1 %v4343_v0  ;;  %2275 = vmatprep.subr.bf16.mxu0 %v4348_v36  ;;  %v469_v0 = vld [vmem:[%s4730_s24 + $0x290] sm:$0xff]  ;;  %v4364_v36 = vld [vmem:[#allocation5 + $0x388] ss:$16 sps:$4 sm:$0xff]  }
 0x108   : > { %2406 = vmatprep.subr.bf16.mxu1 %v4351_v22  ;;  %2070 = vmatmul.mubr.bf16.gmra.mxu0 %v4994_v53  ;;  %v4367_v22 = vld [vmem:[#allocation5 + $0x588] ss:$16 sps:$4 sm:$0xff]  }
 0x109   : > { %2201 = vmatmul.mubr.bf16.gmra.mxu1 %v4838_v42  ;;  %2079 = vmatprep.mubr.bf16.mxu0 %v4996_v25  ;;  %v4358_v42 = vld [vmem:[#allocation5 + $0x3a8] ss:$16 sps:$4 sm:$0xff]  }
 0x10a   : > { %2210 = vmatprep.mubr.bf16.mxu1 %v4842_v44  ;;  %2276 = vmatpush2.bf16.msra.mxu0 %v4346_v16  ;;  %v463_v44 = vld [vmem:[%s4730_s24 + $0x260] sm:$0xff]  ;;  %v4372_v16 = vld [vmem:[#allocation5 + $0x36c] ss:$16 sps:$4 sm:$0xff]  }
 0x10b   : > { %2407 = vmatpush2.bf16.msra.mxu1 %v4349_v23  ;;  %2277 = vmatprep.subr.bf16.mxu0 %v4354_v26  ;;  %v4375_v23 = vld [vmem:[#allocation5 + $0x56c] ss:$16 sps:$4 sm:$0xff]   ;;  %v5018_v26 = vpack.c.bf16 %v469_v0, %v463_v44 }
 0x10c   : > { %2408 = vmatprep.subr.bf16.mxu1 %v4357_v40  ;;  %v4370_v40 = vld [vmem:[#allocation5 + $0x368] ss:$16 sps:$4 sm:$0xff]   ;;  %v4390_v44 = vld [vmem:[#allocation5 + $0x30c] ss:$16 sps:$4 sm:$0xff]  }
 0x10d   : > { %v4393_v0 = vld [vmem:[#allocation5 + $0x50c] ss:$16 sps:$4 sm:$0xff]  }
 0x10e   : > { %2278 = vmatpush2.bf16.msra.mxu0 %v4352_v28  ;;  %v475_v28 = vld [vmem:[%s4730_s24 + $0x2c0] sm:$0xff] }
 0x10f   : > { %2409 = vmatpush2.bf16.msra.mxu1 %v4355_v31  ;;  %2279 = vmatprep.subr.bf16.mxu0 %v4360_v58  ;;  %v494_v31 = vld [vmem:[%s4730_s24 + $0x358] sm:$0xff] }
 0x110   : > { %2410 = vmatprep.subr.bf16.mxu1 %v4363_v50  ;;  %2080 = vmatmul.mubr.bf16.gmra.mxu0 %v5006_v57  ;;  %v4376_v58 = vld [vmem:[#allocation5 + $0x348] ss:$16 sps:$4 sm:$0xff]  }
 0x111   : > { %2211 = vmatmul.mubr.bf16.gmra.mxu1 %v4858_v4  ;;  %2089 = vmatprep.mubr.bf16.mxu0 %v5008_v61  ;;  %v5020_v4 = vpack.c.bf16 %v482_v11, %v476_v10  ;;  %v4379_v50 = vld [vmem:[#allocation5 + $0x548] ss:$16 sps:$4 sm:$0xff]   ;;  %v487_v10 = vld [vmem:[%s4730_s24 + $0x320] sm:$0xff]  ;;  %v493_v11 = vld [vmem:[%s4730_s24 + $0x350] sm:$0xff] }
 0x112   : > { %2220 = vmatprep.mubr.bf16.mxu1 %v4862_v6  ;;  %2280 = vmatpush2.bf16.msra.mxu0 %v4358_v42  ;;  %v4378_v6 = vld [vmem:[#allocation5 + $0x34c] ss:$16 sps:$4 sm:$0xff]  }
 0x113   : > { %2411 = vmatpush2.bf16.msra.mxu1 %v4361_v21  ;;  %2281 = vmatprep.subr.bf16.mxu0 %v4366_v60  ;;  %v4384_v42 = vld [vmem:[#allocation5 + $0x32c] ss:$16 sps:$4 sm:$0xff]   ;;  %v5030_v60 = vpack.c.bf16 %v481_v29, %v475_v28  ;;  %v4413_v29 = vld [vmem:[#allocation7 + $0xb0] sm:$0xff]  }
 0x114   : > { %2412 = vmatprep.subr.bf16.mxu1 %v4369_v62  ;;  %v4387_v21 = vld [vmem:[#allocation5 + $0x52c] ss:$16 sps:$4 sm:$0xff]   ;;  %v4385_v62 = vld [vmem:[#allocation5 + $0x528] ss:$16 sps:$4 sm:$0xff]  }
 0x115   : > { %v4410_v28 = vld [vmem:[#allocation7 + $0xf8] sm:$0xff]  }
 0x116   : > { %2282 = vmatpush2.bf16.msra.mxu0 %v4364_v36  ;;  %v500_v36 = vld [vmem:[%s4730_s24 + $0x388] sm:$0xff] }
 0x117   : > { %2413 = vmatpush2.bf16.msra.mxu1 %v4367_v22  ;;  %2283 = vmatprep.subr.bf16.mxu0 %v4372_v16  ;;  %v4388_v22 = vld [vmem:[#allocation5 + $0x308] ss:$16 sps:$4 sm:$0xff]  }
 0x118   : > { %2414 = vmatprep.subr.bf16.mxu1 %v4375_v23  ;;  %2090 = vmatmul.mubr.bf16.gmra.mxu0 %v5018_v26  ;;  %v4391_v16 = vld [vmem:[#allocation5 + $0x508] ss:$16 sps:$4 sm:$0xff]  }
 0x119   : > { %2221 = vmatmul.mubr.bf16.gmra.mxu1 %v4878_v32  ;;  %2099 = vmatprep.mubr.bf16.mxu0 %v5020_v4  ;;  %v5032_v32 = vpack.c.bf16 %v494_v31, %v488_v14  ;;  %v4394_v23 = vld [vmem:[#allocation7 + $0x78] sm:$0xff]   ;;  %v4404_v14 = vld [vmem:[#allocation7 + $0x50] sm:$0xff]   ;;  %v4407_v31 = vld [vmem:[#allocation7 + $0x8] sm:$0xff]  }
 0x11a   : > { %2230 = vmatprep.mubr.bf16.mxu1 %v4882_v34  ;;  %2284 = vmatpush2.bf16.msra.mxu0 %v4370_v40  ;;  %v4382_v34 = vld [vmem:[#allocation5 + $0x328] ss:$16 sps:$4 sm:$0xff]   ;;  %v5041_v40 = vpack.c.bf16 %v493_v11, %v487_v10  ;;  %v4416_v10 = vld [vmem:[#allocation7 + $0xe0] sm:$0xff]  }
 0x11b   : > { %2415 = vmatpush2.bf16.msra.mxu1 %v4373_v19  ;;  %2285 = vmatprep.subr.bf16.mxu0 %v4378_v6  ;;  %v5043_v19 = vpack.c.bf16 %v500_v36, %v500_v36  ;;  %v4395_v6 = vld [vmem:[#allocation7 + $0x38] sm:$0xff]   ;;  %v4417_v11 = vld [vmem:[#allocation7 + $0xa0] sm:$0xff]  }
 0x11c   : > { %2416 = vmatprep.subr.bf16.mxu1 %v4381_v27  ;;  %v4396_v27 = vld [vmem:[#allocation7 + $0x70] sm:$0xff]  }
 0x11e   : > { %2286 = vmatpush2.bf16.msra.mxu0 %v4376_v58  ;;  %v4408_v58 = vld [vmem:[#allocation7 + $0x40] sm:$0xff]  }
 0x11f   : > { %2417 = vmatpush2.bf16.msra.mxu1 %v4379_v50  ;;  %2287 = vmatprep.subr.bf16.mxu0 %v4384_v42  ;;  %v4409_v50 = vld [vmem:[#allocation7] sm:$0xff]  }
 0x120   : > { %2418 = vmatprep.subr.bf16.mxu1 %v4387_v21  ;;  %2100 = vmatmul.mubr.bf16.gmra.mxu0 %v5030_v60 }
 0x121   : > { %2231 = vmatmul.mubr.bf16.gmra.mxu1 %v4898_v2  ;;  %2109 = vmatprep.mubr.bf16.mxu0 %v5032_v32  ;;  %v499_v2 = vld [vmem:[%s4730_s24 + $0x380] sm:$0xff] }
 0x122   : > { %2240 = vmatprep.mubr.bf16.mxu1 %v4902_v8  ;;  %2288 = vmatpush2.bf16.msra.mxu0 %v4382_v34  ;;  %v5050_v8 = vpack.c.bf16 %v499_v2, %v499_v2 }
 0x123   : > { %2419 = vmatpush2.bf16.msra.mxu1 %v4385_v62  ;;  %2289 = vmatprep.subr.bf16.mxu0 %v4390_v44 }
 0x124   : > { %2420 = vmatprep.subr.bf16.mxu1 %v4393_v0 }
 0x126   : > { %2290 = vmatpush2.bf16.msra.mxu0 %v4388_v22 }
 0x127   : > { %2421 = vmatpush2.bf16.msra.mxu1 %v4391_v16  ;;  %3814 = vmatprep.subr.bf16.mxu0 %v4394_v23 }
 0x128   : > { %2110 = vmatmul.mubr.bf16.gmra.mxu0 %v5041_v40  ;;  %3890 = vmatprep.subr.bf16.mxu1 %v4410_v28 }
 0x129   : > { %2241 = vmatmul.mubr.bf16.gmra.mxu1 %v4916_v38  ;;  %2119 = vmatprep.mubr.bf16.mxu0 %v5043_v19  ;;  %v4397_v38 = vld [vmem:[#allocation7 + $0x30] sm:$0xff]  }
 0x12a   : > { %2250 = vmatprep.mubr.bf16.mxu1 %v4920_v46  ;;  %v4398_v46 = vld [vmem:[#allocation7 + $0x68] sm:$0xff]  }
 0x130   : > { %2120 = vmatmul.mubr.bf16.gmra.mxu0 %v5050_v8 }
 0x131   : > { %2251 = vmatmul.mubr.bf16.gmra.mxu1 %v4932_v52  ;;  %2291 = vmatprep.mubr.bf16.mxu0 %v4746_v54  ;;  %v4411_v52 = vld [vmem:[#allocation7 + $0xb8] sm:$0xff]   ;;  %v4399_v54 = vld [vmem:[#allocation7 + $0x28] sm:$0xff]  }
 0x132   : > { %2422 = vmatprep.mubr.bf16.mxu1 %v4936_v56  ;;  %v4400_v56 = vld [vmem:[#allocation7 + $0x60] sm:$0xff]  }
 0x138   : > { %2292 = vmatmul.mubr.bf16.vlgmr.msra.gmra.mxu0 %v4758_v15  ;;  %v4401_v15 = vld [vmem:[#allocation7 + $0x20] sm:$0xff]  }
 0x139   : > { %2423 = vmatmul.mubr.bf16.vlgmr.msra.gmra.mxu1 %v4946_v1  ;;  %2301 = vmatprep.mubr.bf16.mxu0 %v4764_v24  ;;  %v4402_v24 = vld [vmem:[#allocation7 + $0x58] sm:$0xff]   ;;  %v4412_v1 = vld [vmem:[#allocation7 + $0xf0] sm:$0xff]  }
 0x13a   : > { %2432 = vmatprep.mubr.bf16.mxu1 %v4948_v13  ;;  %3815 = vmatpush3.bf16.msra.mxu0 %v4395_v6  ;;  %v4403_v13 = vld [vmem:[#allocation7 + $0x18] sm:$0xff]  }
 0x13b   : > { %3816 = vmatprep.subr.bf16.mxu0 %v4396_v27  ;;  %3891 = vmatpush3.bf16.msra.mxu1 %v4411_v52 }
 0x13c   : > { %3892 = vmatprep.subr.bf16.mxu1 %v4412_v1 }
 0x13e   : > { %3817 = vmatpush3.bf16.msra.mxu0 %v4397_v38 }
 0x13f   : > { %3818 = vmatprep.subr.bf16.mxu0 %v4398_v46  ;;  %3893 = vmatpush3.bf16.msra.mxu1 %v4413_v29 }
 0x140   : > { %2302 = vmatmul.mubr.bf16.gmra.mxu0 %v4780_v37  ;;  %v755_v37 = vlaneseq }
 0x141   : > { %2433 = vmatmul.mubr.bf16.gmra.mxu1 %v4958_v30  ;;  %2311 = vmatprep.mubr.bf16.mxu0 %v4784_v41  ;;  %v4405_v41 = vld [vmem:[#allocation7 + $0x10] sm:$0xff]   ;;  %v4406_v30 = vld [vmem:[#allocation7 + $0x48] sm:$0xff]  }
 0x142   : > { %2442 = vmatprep.mubr.bf16.mxu1 %v4960_v48  ;;  %3819 = vmatpush3.bf16.msra.mxu0 %v4399_v54  ;;  %v5068_v48 = vshrl.u32 %v755_v37, 7 }
 0x143   : > { %3820 = vmatprep.subr.bf16.mxu0 %v4400_v56  ;;  %v4418_v56 = vld [vmem:[#allocation7 + $0xd8] sm:$0xff]  }
 0x144   : > { %v761_v42 = vsub.s32 1, %v5068_v48 }
 0x146   : > { %3821 = vmatpush3.bf16.msra.mxu0 %v4401_v15  ;;  %v4419_v15 = vld [vmem:[#allocation7 + $0x98] sm:$0xff]  }
 0x147   : > { %3822 = vmatprep.subr.bf16.mxu0 %v4402_v24 }
 0x148   : > { %2312 = vmatmul.mubr.bf16.gmra.mxu0 %v4800_v59  ;;  %v757_v59 = vsub.s32 0, %v5068_v48 }
 0x149   : > { %2443 = vmatmul.mubr.bf16.gmra.mxu1 %v4970_v12  ;;  %2321 = vmatprep.mubr.bf16.mxu0 %v4804_v63  ;;  %v4414_v63 = vld [vmem:[#allocation7 + $0xe8] sm:$0xff]  }
 0x14a   : > { %2452 = vmatprep.mubr.bf16.mxu1 %v4972_v18  ;;  %3823 = vmatpush3.bf16.msra.mxu0 %v4403_v13  ;;  %v4415_v12 = vld [vmem:[#allocation7 + $0xa8] sm:$0xff]   ;;  %v5078_v18 = vld [vmem:[%s5668_s2] sm:$0xf] }
 0x14b   : > { %3824 = vmatprep.subr.bf16.mxu0 %v4404_v14  ;;  %3894 = vmatprep.subr.bf16.mxu1 %v4414_v63 }
 0x14c   : > { %3895 = vmatpush3.bf16.msra.mxu1 %v4415_v12 }
 0x14d   : > { %3896 = vmatprep.subr.bf16.mxu1 %v4416_v10 }
 0x14e   : > { %3825 = vmatpush3.bf16.msra.mxu0 %v4405_v41 }
 0x14f   : > { %3826 = vmatprep.subr.bf16.mxu0 %v4406_v30 }
 0x150   : > { %2322 = vmatmul.mubr.bf16.gmra.mxu0 %v4820_v17  ;;  %v5082_v17 = vrot.slane %v5078_v18, %v757_v59  ;;  %3897 = vmatpush3.bf16.msra.mxu1 %v4417_v11 }
 0x151   : > { %2453 = vmatmul.mubr.bf16.gmra.mxu1 %v4982_v49  ;;  %2331 = vmatprep.mubr.bf16.mxu0 %v4824_v20  ;;  %v5085_v20 = vrot.slane %v5078_v18, %v761_v42 }
 0x152   : > { %2462 = vmatprep.mubr.bf16.mxu1 %v4984_v51  ;;  %3827 = vmatpush3.bf16.msra.mxu0 %v4407_v31 }
 0x153   : > { %3828 = vmatprep.subr.bf16.mxu0 %v4408_v58  ;;  %3898 = vmatprep.subr.bf16.mxu1 %v4418_v56 }
 0x154   : > { %3899 = vmatpush3.bf16.msra.mxu1 %v4419_v15 }
 0x156   : > { %3829 = vmatpush3.bf16.msra.mxu0 %v4409_v50 }
 0x158   : > { %v1769_v49 = vpop.f32.mrf.mxu0  ;;  %2332 = vmatmul.mubr.bf16.gmra.mxu0 %v4840_v43 }
 0x159   : > { %v1900_v51 = vpop.f32.mrf.mxu1  ;;  %2463 = vmatmul.mubr.bf16.gmra.mxu1 %v4994_v53  ;;  %v1770_v21 = vadd.f32 %v1769_v49, %v5082_v17  ;;  %2341 = vmatprep.mubr.bf16.mxu0 %v4844_v45 }
 0x15a   : > { %2472 = vmatprep.mubr.bf16.mxu1 %v4996_v25  ;;  %v1771_v34 = vpop.f32.mrf.mxu0 }
 0x15b   : > { %v1902_v62 = vpop.f32.mrf.mxu1  ;;  %v5092_v44 = vadd.f32 %v1900_v51, %v1770_v21  ;;  %v1772_v0 = vadd.f32 %v1771_v34, %v5085_v20 }
 0x15c   : > { %v1773_v36 = vpop.f32.mrf.mxu0 }
 0x15d   : > { %v1904_v22 = vpop.f32.mrf.mxu1  ;;  %v5095_v16 = vadd.f32 %v1902_v62, %v1772_v0  ;;  %v1774_v43 = vadd.f32 %v1773_v36, %v5082_v17 }
 0x15e   : > { %v1775_v53 = vpop.f32.mrf.mxu0 }
 0x15f   : > { %v1906_v23 = vpop.f32.mrf.mxu1  ;;  %v5098_v45 = vadd.f32 %v1904_v22, %v1774_v43  ;;  %v1776_v25 = vadd.f32 %v1775_v53, %v5085_v20 }
 0x160   : > { %v1779_v2 = vpop.f32.mrf.mxu0  ;;  %2342 = vmatmul.mubr.bf16.gmra.mxu0 %v4860_v5 }
 0x161   : > { %v1910_v6 = vpop.f32.mrf.mxu1  ;;  %2473 = vmatmul.mubr.bf16.gmra.mxu1 %v5006_v57  ;;  %v5103_v27 = vadd.f32 %v1906_v23, %v1776_v25  ;;  %v1780_v38 = vadd.f32 %v1779_v2, %v5082_v17  ;;  %2351 = vmatprep.mubr.bf16.mxu0 %v4864_v7  ;;  %v4423_v25 = vld [vmem:[#allocation7 + $0x88] sm:$0xff]  }
 0x162   : > { %2482 = vmatprep.mubr.bf16.mxu1 %v5008_v61  ;;  %v1781_v46 = vpop.f32.mrf.mxu0 }
 0x163   : > { %v1912_v28 = vpop.f32.mrf.mxu1  ;;  %v5108_v52 = vadd.f32 %v1910_v6, %v1780_v38  ;;  %v1782_v54 = vadd.f32 %v1781_v46, %v5085_v20 }
 0x164   : > { %v1783_v24 = vpop.f32.mrf.mxu0 }
 0x165   : > { %v1914_v5 = vpop.f32.mrf.mxu1  ;;  %v5111_v1 = vadd.f32 %v1912_v28, %v1782_v54  ;;  %v1784_v57 = vadd.f32 %v1783_v24, %v5082_v17 }
 0x166   : > { %v1785_v13 = vpop.f32.mrf.mxu0 }
 0x167   : > { %v1916_v29 = vpop.f32.mrf.mxu1  ;;  %v5114_v7 = vadd.f32 %v1914_v5, %v1784_v57  ;;  %v1786_v61 = vadd.f32 %v1785_v13, %v5085_v20 }
 0x168   : > { %v1789_v14 = vpop.f32.mrf.mxu0  ;;  %2352 = vmatmul.mubr.bf16.gmra.mxu0 %v4880_v33 }
 0x169   : > { %v1920_v37 = vpop.f32.mrf.mxu1  ;;  %2483 = vmatmul.mubr.bf16.gmra.mxu1 %v5018_v26  ;;  %v5119_v41 = vadd.f32 %v1916_v29, %v1786_v61  ;;  %v1790_v30 = vadd.f32 %v1789_v14, %v5082_v17  ;;  %2361 = vmatprep.mubr.bf16.mxu0 %v4884_v35  ;;  %v4420_v26 = vld [vmem:[#allocation7 + $0xd0] sm:$0xff]  }
 0x16a   : > { %2492 = vmatprep.mubr.bf16.mxu1 %v5020_v4  ;;  %v1791_v31 = vpop.f32.mrf.mxu0  ;;  %v4421_v35 = vld [vmem:[#allocation7 + $0x90] sm:$0xff]   ;;  %3900 = vmatprep.subr.bf16.mxu1 %v4420_v26 }
 0x16b   : > { %v1922_v58 = vpop.f32.mrf.mxu1  ;;  %v5124_v59 = vadd.f32 %v1920_v37, %v1790_v30  ;;  %v1792_v63 = vadd.f32 %v1791_v31, %v5085_v20  ;;  %3901 = vmatpush3.bf16.msra.mxu1 %v4421_v35  ;;  %v4424_v37 = vld [vmem:[#allocation7 + $0xc0] sm:$0xff]  }
 0x16c   : > { %v1793_v12 = vpop.f32.mrf.mxu0 }
 0x16d   : > { %v1924_v50 = vpop.f32.mrf.mxu1  ;;  %v5127_v42 = vadd.f32 %v1922_v58, %v1792_v63  ;;  %v1794_v33 = vadd.f32 %v1793_v12, %v5082_v17  ;;  %v4425_v58 = vld [vmem:[#allocation7 + $0x80] sm:$0xff]  }
 0x16e   : > { %v5130_v49 = vpop.f32.mrf.mxu0 }
 0x16f   : > { %v5132_v51 = vpop.f32.mrf.mxu1  ;;  %v5134_v21 = vadd.f32 %v1924_v50, %v1794_v33 }
 0x170   : > { %v1799_v4 = vpop.f32.mrf.mxu0  ;;  %2362 = vmatmul.mubr.bf16.gmra.mxu0 %v4900_v3 }
 0x171   : > { %v1930_v34 = vpop.f32.mrf.mxu1  ;;  %2493 = vmatmul.mubr.bf16.gmra.mxu1 %v5030_v60  ;;  %v1800_v62 = vadd.f32 %v1799_v4, %v5082_v17  ;;  %2371 = vmatprep.mubr.bf16.mxu0 %v4904_v9 }
 0x172   : > { %2502 = vmatprep.mubr.bf16.mxu1 %v5032_v32  ;;  %v1801_v0 = vpop.f32.mrf.mxu0  ;;  %v4422_v32 = vld [vmem:[#allocation7 + $0xc8] sm:$0xff]  }
 0x173   : > { %v1932_v10 = vpop.f32.mrf.mxu1  ;;  %v5141_v11 = vadd.f32 %v1930_v34, %v1800_v62  ;;  %v1802_v36 = vadd.f32 %v1801_v0, %v5085_v20  ;;  %3902 = vmatprep.subr.bf16.mxu1 %v4422_v32 }
 0x174   : > { %v1803_v22 = vpop.f32.mrf.mxu0  ;;  %3903 = vmatpush3.bf16.msra.mxu1 %v4423_v25 }
 0x175   : > { %v1934_v43 = vpop.f32.mrf.mxu1  ;;  %v5144_v53 = vadd.f32 %v1932_v10, %v1802_v36  ;;  %v1804_v3 = vadd.f32 %v1803_v22, %v5082_v17  ;;  %3904 = vmatprep.subr.bf16.mxu1 %v4424_v37 }
 0x176   : > { %v5147_v60 = vpop.f32.mrf.mxu0 }
 0x177   : > { %v5149_v23 = vpop.f32.mrf.mxu1  ;;  %v5151_v9 = vadd.f32 %v1934_v43, %v1804_v3 }
 0x178   : > { %v1809_v2 = vpop.f32.mrf.mxu0  ;;  %2372 = vmatmul.mubr.bf16.gmra.mxu0 %v4918_v39  ;;  %3905 = vmatpush3.bf16.msra.mxu1 %v4425_v58 }
 0x179   : > { %v1940_v6 = vpop.f32.mrf.mxu1  ;;  %2503 = vmatmul.mubr.bf16.gmra.mxu1 %v5041_v40  ;;  %v1810_v38 = vadd.f32 %v1809_v2, %v5082_v17  ;;  %2381 = vmatprep.mubr.bf16.mxu0 %v4922_v47 }
 0x17a   : > { %2512 = vmatprep.mubr.bf16.mxu1 %v5043_v19  ;;  %v1811_v46 = vpop.f32.mrf.mxu0 }
 0x17b   : > { %v1942_v28 = vpop.f32.mrf.mxu1  ;;  %v5158_v54 = vadd.f32 %v1940_v6, %v1810_v38  ;;  %v1812_v56 = vadd.f32 %v1811_v46, %v5085_v20 }
 0x17c   : > { %v1813_v15 = vpop.f32.mrf.mxu0 }
 0x17d   : > { %v1944_v24 = vpop.f32.mrf.mxu1  ;;  %v5161_v5 = vadd.f32 %v1942_v28, %v1812_v56  ;;  %v1814_v39 = vadd.f32 %v1813_v15, %v5082_v17 }
 0x17e   : > { %v5164_v40 = vpop.f32.mrf.mxu0 }
 0x17f   : > { %v5166_v57 = vpop.f32.mrf.mxu1  ;;  %v5168_v47 = vadd.f32 %v1944_v24, %v1814_v39 }
 0x180   : > { %v1819_v19 = vpop.f32.mrf.mxu0  ;;  %2382 = vmatmul.mubr.bf16.gmra.mxu0 %v4934_v55 }
 0x181   : > { %v1950_v13 = vpop.f32.mrf.mxu1  ;;  %2513 = vmatmul.mubr.bf16.gmra.mxu1 %v5050_v8  ;;  %v1820_v29 = vadd.f32 %v1819_v19, %v5082_v17 }
 0x182   : > { %v1821_v61 = vpop.f32.mrf.mxu0 }
 0x183   : > { %v1952_v14 = vpop.f32.mrf.mxu1  ;;  %v5173_v30 = vadd.f32 %v1950_v13, %v1820_v29  ;;  %v1822_v31 = vadd.f32 %v1821_v61, %v5085_v20 }
 0x184   : > { %v1823_v63 = vpop.f32.mrf.mxu0 }
 0x185   : > { %v1954_v12 = vpop.f32.mrf.mxu1  ;;  %v5176_v50 = vadd.f32 %v1952_v14, %v1822_v31  ;;  %v1824_v33 = vadd.f32 %v1823_v63, %v5082_v17 }
 0x186   : > { %v5179_v55 = vpop.f32.mrf.mxu0 }
 0x187   : > { %v5181_v8 = vpop.f32.mrf.mxu1  ;;  %v5183_v26 = vadd.f32 %v1954_v12, %v1824_v33 }
 0x188   : > { %v1829_v35 = vpop.f32.mrf.mxu0 }
 0x189   : > { %v1960_v4 = vpop.f32.mrf.mxu1  ;;  %v1830_v34 = vadd.f32 %v1829_v35, %v5082_v17 }
 0x18a   : > { %v1831_v62 = vpop.f32.mrf.mxu0 }
 0x18b   : > { %v1962_v0 = vpop.f32.mrf.mxu1  ;;  %v5186_v10 = vadd.f32 %v1960_v4, %v1830_v34  ;;  %v1832_v36 = vadd.f32 %v1831_v62, %v5085_v20 }
 0x18c   : > { %v1833_v22 = vpop.f32.mrf.mxu0 }
 0x18d   : > { %v1964_v43 = vpop.f32.mrf.mxu1  ;;  %v5189_v3 = vadd.f32 %v1962_v0, %v1832_v36  ;;  %v1834_v32 = vadd.f32 %v1833_v22, %v5082_v17 }
 0x18e   : > { %v5192_v25 = vpop.f32.mrf.mxu0 }
 0x18f   : > { %v5194_v2 = vpop.f32.mrf.mxu1  ;;  %v5196_v6 = vadd.f32 %v1964_v43, %v1834_v32 }
 0x190   : > { %v1839_v38 = vpop.f32.mrf.mxu0 }
 0x191   : > { %v1970_v46 = vpop.f32.mrf.mxu1  ;;  %v1840_v28 = vadd.f32 %v1839_v38, %v5082_v17 }
 0x192   : > { %v1841_v56 = vpop.f32.mrf.mxu0 }
 0x193   : > { %v1972_v15 = vpop.f32.mrf.mxu1  ;;  %v5199_v24 = vadd.f32 %v1970_v46, %v1840_v28  ;;  %v1842_v39 = vadd.f32 %v1841_v56, %v5085_v20 }
 0x194   : > { %v1843_v19 = vpop.f32.mrf.mxu0 }
 0x195   : > { %v1974_v13 = vpop.f32.mrf.mxu1  ;;  %v5202_v29 = vadd.f32 %v1972_v15, %v1842_v39  ;;  %v1844_v61 = vadd.f32 %v1843_v19, %v5082_v17 }
 0x196   : > { %v5205_v14 = vpop.f32.mrf.mxu0 }
 0x197   : > { %v5207_v37 = vpop.f32.mrf.mxu1  ;;  %v5209_v31 = vadd.f32 %v1974_v13, %v1844_v61 }
 0x198   : > { %v1849_v58 = vpop.f32.mrf.mxu0 }
 0x199   : > { %v1980_v63 = vpop.f32.mrf.mxu1  ;;  %v1850_v12 = vadd.f32 %v1849_v58, %v5082_v17 }
 0x19a   : > { %v1851_v33 = vpop.f32.mrf.mxu0 }
 0x19b   : > { %v1982_v35 = vpop.f32.mrf.mxu1  ;;  %v5212_v4 = vadd.f32 %v1980_v63, %v1850_v12  ;;  %v1852_v34 = vadd.f32 %v1851_v33, %v5085_v20 }
 0x19c   : > { %v1853_v62 = vpop.f32.mrf.mxu0 }
 0x19d   : > { %v1984_v0 = vpop.f32.mrf.mxu1  ;;  %v5215_v36 = vadd.f32 %v1982_v35, %v1852_v34  ;;  %v1854_v22 = vadd.f32 %v1853_v62, %v5082_v17 }
 0x19e   : > { %v5218_v43 = vpop.f32.mrf.mxu0 }
 0x19f   : > { %v5220_v32 = vpop.f32.mrf.mxu1  ;;  %v5222_v38 = vadd.f32 %v1984_v0, %v1854_v22 }
 0x1a0   : > { %v1859_v46 = vpop.f32.mrf.mxu0 }
 0x1a1   : > { %v1990_v28 = vpop.f32.mrf.mxu1  ;;  %v1860_v56 = vadd.f32 %v1859_v46, %v5082_v17 }
 0x1a2   : > { %v1861_v15 = vpop.f32.mrf.mxu0 }
 0x1a3   : > { %v1992_v39 = vpop.f32.mrf.mxu1  ;;  %v5225_v19 = vadd.f32 %v1990_v28, %v1860_v56  ;;  %v1862_v13 = vadd.f32 %v1861_v15, %v5085_v20 }
 0x1a4   : > { %v1863_v61 = vpop.f32.mrf.mxu0 }
 0x1a5   : > { %5688 = vst [vmem:[#allocation10_spill] sm:$0xff] %v5225_v19  ;;  %v1994_v58 = vpop.f32.mrf.mxu1  ;;  %v5228_v63 = vadd.f32 %v1992_v39, %v1862_v13 }
 0x1a6   : > { %v1864_v12 = vpop.f32.mrf.mxu0 }
 0x1a7   : > { %v1995_v33 = vpop.f32.mrf.mxu1 }
 0x1a8   : > { %v2031_v35 = vpop.f32.mrf.mxu0 }
 0x1a9   : > { %v5230_v34 = vpop.f32.mrf.mxu1  ;;  %v2032_v17 = vadd.f32 %v2031_v35, %v5092_v44 }
 0x1aa   : > { %5689 = vst [vmem:[#allocation11_spill] sm:$0xff] %v5230_v34  ;;  %v2033_v62 = vpop.f32.mrf.mxu0 }
 0x1ab   : > { %v5232_v0 = vpop.f32.mrf.mxu1  ;;  %v2034_v28 = vadd.f32 %v2033_v62, %v5095_v16  ;;  %v2521_v13 = vmax.f32 %v2032_v17, 0.0 }
 0x1ac   : > { %5690 = vst [vmem:[#allocation12_spill] sm:$0xff] %v5232_v0  ;;  %v2035_v22 = vpop.f32.mrf.mxu0 }
 0x1ad   : > { %v5235_v46 = vpop.f32.mrf.mxu1  ;;  %v2036_v56 = vadd.f32 %v2035_v22, %v5098_v45  ;;  %v2522_v0 = vmax.f32 %v2034_v28, 0.0 }
 0x1ae   : > { %v2037_v15 = vpop.f32.mrf.mxu0 }
 0x1af   : > { %v5239_v39 = vpop.f32.mrf.mxu1  ;;  %v2525_v61 = vmax.f32 %v2036_v56, 0.0  ;;  %v2038_v58 = vadd.f32 %v2037_v15, %v5103_v27 }
 0x1b0   : > { %v2041_v12 = vpop.f32.mrf.mxu0 }
 0x1b1   : > { %v5242_v33 = vpop.f32.mrf.mxu1  ;;  %v2597_v34 = vpack.c.bf16 %v2525_v61, %v2521_v13  ;;  %v2526_v44 = vmax.f32 %v2038_v58, 0.0  ;;  %v2042_v16 = vadd.f32 %v2041_v12, %v5108_v52  ;;  %v1796_v52 = vadd.f32 %v5130_v49, %v5085_v20 }
 0x1b2   : > { %v2043_v35 = vpop.f32.mrf.mxu0 }
 0x1b3   : > { %v5244_v19 = vpop.f32.mrf.mxu1  ;;  %v2598_v62 = vpack.c.bf16 %v2526_v44, %v2522_v0  ;;  %v2044_v17 = vadd.f32 %v2043_v35, %v5111_v1  ;;  %v2529_v28 = vmax.f32 %v2042_v16, 0.0 }
 0x1b4   : > { %5691 = vst [vmem:[#allocation13_spill] sm:$0xff] %v5244_v19  ;;  %v2045_v45 = vpop.f32.mrf.mxu0 }
 0x1b5   : > { %v5247_v22 = vpop.f32.mrf.mxu1  ;;  %v2046_v56 = vadd.f32 %v2045_v45, %v5114_v7  ;;  %2932 = vmatprep.mubr.bf16.mxu0 %v2598_v62  ;;  %v2530_v0 = vmax.f32 %v2044_v17, 0.0 }
 0x1b6   : > { %v2047_v27 = vpop.f32.mrf.mxu0  ;;  %2933 = vmatmul.mubr.bf16.vlgmr.msra.gmra.mxu0 %v2597_v34 }
 0x1b7   : > { %v5251_v15 = vpop.f32.mrf.mxu1  ;;  %v2533_v13 = vmax.f32 %v2046_v56, 0.0  ;;  %v2048_v61 = vadd.f32 %v2047_v27, %v5119_v41  ;;  %v1927_v41 = vadd.f32 %v5132_v51, %v1796_v52 }
 0x1b8   : > { %v2051_v58 = vpop.f32.mrf.mxu0 }
 0x1b9   : > { %v5254_v19 = vpop.f32.mrf.mxu1  ;;  %v2601_v12 = vpack.c.bf16 %v2533_v13, %v2529_v28  ;;  %v2534_v1 = vmax.f32 %v2048_v61, 0.0  ;;  %v2052_v35 = vadd.f32 %v2051_v58, %v5124_v59  ;;  %v1806_v58 = vadd.f32 %v5147_v60, %v5085_v20 }
 0x1ba   : > { %v2053_v44 = vpop.f32.mrf.mxu0 }
 0x1bb   : > { %v5258_v7 = vpop.f32.mrf.mxu1  ;;  %v2602_v62 = vpack.c.bf16 %v2534_v1, %v2530_v0  ;;  %v2054_v45 = vadd.f32 %v2053_v44, %v5127_v42  ;;  %v2537_v27 = vmax.f32 %v2052_v35, 0.0  ;;  %v1937_v35 = vadd.f32 %v5149_v23, %v1806_v58 }
 0x1bc   : > { %v2055_v34 = vpop.f32.mrf.mxu0 }
 0x1bd   : > { %v5261_v16 = vpop.f32.mrf.mxu1  ;;  %v2056_v56 = vadd.f32 %v2055_v34, %v5134_v21  ;;  %2940 = vmatprep.mubr.bf16.mxu0 %v2602_v62  ;;  %v2538_v0 = vmax.f32 %v2054_v45, 0.0 }
 0x1be   : > { %v2057_v49 = vpop.f32.mrf.mxu0  ;;  %2941 = vmatmul.mubr.bf16.gmra.mxu0 %v2601_v12 }
 0x1bf   : > { %v5266_v17 = vpop.f32.mrf.mxu1  ;;  %v2541_v28 = vmax.f32 %v2056_v56, 0.0  ;;  %v2058_v13 = vadd.f32 %v2057_v49, %v1927_v41 }
 0x1c0   : > { %v2061_v61 = vpop.f32.mrf.mxu0 }
 0x1c1   : > { %v5268_v59 = vpop.f32.mrf.mxu1  ;;  %v2605_v51 = vpack.c.bf16 %v2541_v28, %v2537_v27  ;;  %v2542_v52 = vmax.f32 %v2058_v13, 0.0  ;;  %v2062_v21 = vadd.f32 %v2061_v61, %v5141_v11  ;;  %v1816_v13 = vadd.f32 %v5164_v40, %v5085_v20 }
 0x1c2   : > { %v2063_v42 = vpop.f32.mrf.mxu0 }
 0x1c3   : > { %v5272_v1 = vpop.f32.mrf.mxu1  ;;  %v2606_v44 = vpack.c.bf16 %v2542_v52, %v2538_v0  ;;  %v2064_v34 = vadd.f32 %v2063_v42, %v5144_v53  ;;  %v2545_v56 = vmax.f32 %v2062_v21, 0.0  ;;  %v1947_v21 = vadd.f32 %v5166_v57, %v1816_v13 }
 0x1c4   : > { %v2065_v62 = vpop.f32.mrf.mxu0 }
 0x1c5   : > { %v5275_v12 = vpop.f32.mrf.mxu1  ;;  %v2066_v41 = vadd.f32 %v2065_v62, %v5151_v9  ;;  %2948 = vmatprep.mubr.bf16.mxu0 %v2606_v44  ;;  %v2546_v61 = vmax.f32 %v2064_v34, 0.0 }
 0x1c6   : > { %v2067_v60 = vpop.f32.mrf.mxu0  ;;  %2949 = vmatmul.mubr.bf16.gmra.mxu0 %v2605_v51 }
 0x1c7   : > { %v5280_v45 = vpop.f32.mrf.mxu1  ;;  %v2549_v49 = vmax.f32 %v2066_v41, 0.0  ;;  %v2068_v27 = vadd.f32 %v2067_v60, %v1937_v35 }
 0x1c8   : > { %v2071_v28 = vpop.f32.mrf.mxu0 }
 0x1c9   : > { %v5282_v11 = vpop.f32.mrf.mxu1  ;;  %v2609_v23 = vpack.c.bf16 %v2549_v49, %v2545_v56  ;;  %v2550_v58 = vmax.f32 %v2068_v27, 0.0  ;;  %v2072_v9 = vadd.f32 %v2071_v28, %v5158_v54  ;;  %v1826_v49 = vadd.f32 %v5179_v55, %v5085_v20 }
 0x1ca   : > { %v2073_v53 = vpop.f32.mrf.mxu0 }
 0x1cb   : > { %v5286_v0 = vpop.f32.mrf.mxu1  ;;  %v2610_v52 = vpack.c.bf16 %v2550_v58, %v2546_v61  ;;  %v2074_v44 = vadd.f32 %v2073_v53, %v5161_v5  ;;  %v2553_v34 = vmax.f32 %v2072_v9, 0.0  ;;  %v1957_v53 = vadd.f32 %v5181_v8, %v1826_v49 }
 0x1cc   : > { %v2075_v42 = vpop.f32.mrf.mxu0 }
 0x1cd   : > { %v5289_v51 = vpop.f32.mrf.mxu1  ;;  %v2076_v62 = vadd.f32 %v2075_v42, %v5168_v47  ;;  %2956 = vmatprep.mubr.bf16.mxu0 %v2610_v52  ;;  %v2554_v27 = vmax.f32 %v2074_v44, 0.0 }
 0x1ce   : > { %v2077_v40 = vpop.f32.mrf.mxu0  ;;  %2957 = vmatmul.mubr.bf16.gmra.mxu0 %v2609_v23 }
 0x1cf   : > { %v5294_v35 = vpop.f32.mrf.mxu1  ;;  %v2557_v41 = vmax.f32 %v2076_v62, 0.0  ;;  %v2078_v60 = vadd.f32 %v2077_v40, %v1947_v21 }
 0x1d0   : > { %v2081_v56 = vpop.f32.mrf.mxu0 }
 0x1d1   : > { %v5296_v54 = vpop.f32.mrf.mxu1  ;;  %v2613_v57 = vpack.c.bf16 %v2557_v41, %v2553_v34  ;;  %v2558_v28 = vmax.f32 %v2078_v60, 0.0  ;;  %v2082_v47 = vadd.f32 %v2081_v56, %v5173_v30  ;;  %v1836_v34 = vadd.f32 %v5192_v25, %v5085_v20 }
 0x1d2   : > { %v2083_v5 = vpop.f32.mrf.mxu0 }
 0x1d3   : > { %v5300_v13 = vpop.f32.mrf.mxu1  ;;  %v2614_v61 = vpack.c.bf16 %v2558_v28, %v2554_v27  ;;  %v2084_v9 = vadd.f32 %v2083_v5, %v5176_v50  ;;  %v2561_v21 = vmax.f32 %v2082_v47, 0.0  ;;  %v1967_v28 = vadd.f32 %v5194_v2, %v1836_v34 }
 0x1d4   : > { %v2085_v58 = vpop.f32.mrf.mxu0 }
 0x1d5   : > { %v5303_v23 = vpop.f32.mrf.mxu1  ;;  %v2086_v52 = vadd.f32 %v2085_v58, %v5183_v26  ;;  %2964 = vmatprep.mubr.bf16.mxu0 %v2614_v61  ;;  %v2562_v41 = vmax.f32 %v2084_v9, 0.0 }
 0x1d6   : > { %v2087_v55 = vpop.f32.mrf.mxu0  ;;  %2965 = vmatmul.mubr.bf16.gmra.mxu0 %v2613_v57 }
 0x1d7   : > { %v5308_v42 = vpop.f32.mrf.mxu1  ;;  %v2565_v44 = vmax.f32 %v2086_v52, 0.0  ;;  %v2088_v62 = vadd.f32 %v2087_v55, %v1957_v53 }
 0x1d8   : > { %v2091_v40 = vpop.f32.mrf.mxu0 }
 0x1d9   : > { %v5310_v30 = vpop.f32.mrf.mxu1  ;;  %v2617_v8 = vpack.c.bf16 %v2565_v44, %v2561_v21  ;;  %v2566_v60 = vmax.f32 %v2088_v62, 0.0  ;;  %v2092_v49 = vadd.f32 %v2091_v40, %v5186_v10  ;;  %v1846_v10 = vadd.f32 %v5205_v14, %v5085_v20 }
 0x1da   : > { %v2093_v50 = vpop.f32.mrf.mxu0 }
 0x1db   : > { %v5314_v56 = vpop.f32.mrf.mxu1  ;;  %v2618_v26 = vpack.c.bf16 %v2566_v60, %v2562_v41  ;;  %v2094_v5 = vadd.f32 %v2093_v50, %v5189_v3  ;;  %v2569_v58 = vmax.f32 %v2092_v49, 0.0 }
 0x1dc   : > { %v2095_v27 = vpop.f32.mrf.mxu0 }
 0x1dd   : > { %v5317_v57 = vpop.f32.mrf.mxu1  ;;  %v2096_v47 = vadd.f32 %v2095_v27, %v5196_v6  ;;  %2972 = vmatprep.mubr.bf16.mxu0 %v2618_v26  ;;  %v2570_v21 = vmax.f32 %v2094_v5, 0.0 }
 0x1de   : > { %v2097_v25 = vpop.f32.mrf.mxu0  ;;  %2973 = vmatmul.mubr.bf16.gmra.mxu0 %v2617_v8  ;;  %v1977_v8 = vadd.f32 %v5207_v37, %v1846_v10 }
 0x1df   : > { %v5322_v61 = vpop.f32.mrf.mxu1  ;;  %v2573_v53 = vmax.f32 %v2096_v47, 0.0  ;;  %v2098_v9 = vadd.f32 %v2097_v25, %v1967_v28 }
 0x1e0   : > { %v2101_v52 = vpop.f32.mrf.mxu0 }
 0x1e1   : > { %v5324_v55 = vpop.f32.mrf.mxu1  ;;  %v2621_v2 = vpack.c.bf16 %v2573_v53, %v2569_v58  ;;  %v2574_v44 = vmax.f32 %v2098_v9, 0.0  ;;  %v2102_v40 = vadd.f32 %v2101_v52, %v5199_v24  ;;  %v1856_v24 = vadd.f32 %v5218_v43, %v5085_v20 }
 0x1e2   : > { %v2103_v3 = vpop.f32.mrf.mxu0 }
 0x1e3   : > { %v5328_v62 = vpop.f32.mrf.mxu1  ;;  %v2622_v6 = vpack.c.bf16 %v2574_v44, %v2570_v21  ;;  %v2104_v60 = vadd.f32 %v2103_v3, %v5202_v29  ;;  %v2577_v49 = vmax.f32 %v2102_v40, 0.0  ;;  %v1987_v21 = vadd.f32 %v5220_v32, %v1856_v24 }
 0x1e4   : > { %v2105_v34 = vpop.f32.mrf.mxu0  ;;  %v765_v3 = vsub.s32 2, %v5068_v48 }
 0x1e5   : > { %v5331_v41 = vpop.f32.mrf.mxu1  ;;  %v2106_v50 = vadd.f32 %v2105_v34, %v5209_v31  ;;  %2980 = vmatprep.mubr.bf16.mxu0 %v2622_v6  ;;  %v2578_v25 = vmax.f32 %v2104_v60, 0.0  ;;  %v769_v60 = vsub.s32 3, %v5068_v48 }
 0x1e6   : > { %v2107_v14 = vpop.f32.mrf.mxu0  ;;  %2981 = vmatmul.mubr.bf16.gmra.mxu0 %v2621_v2 }
 0x1e7   : > { %v5336_v26 = vpop.f32.mrf.mxu1  ;;  %v2581_v27 = vmax.f32 %v2106_v50, 0.0  ;;  %v2108_v28 = vadd.f32 %v2107_v14, %v1977_v8 }
 0x1e8   : > { %v2111_v5 = vpop.f32.mrf.mxu0 }
 0x1e9   : > { %v5338_v47 = vpop.f32.mrf.mxu1  ;;  %v2625_v37 = vpack.c.bf16 %v2581_v27, %v2577_v49  ;;  %v2582_v58 = vmax.f32 %v2108_v28, 0.0  ;;  %v2112_v9 = vadd.f32 %v2111_v5, %v5212_v4  ;;  %v5359_v49 = vrot.slane %v5078_v18, %v765_v3  ;;  %v5692_v5 = vld [vmem:[#allocation10_spill] sm:$0xff] }
 0x1ea   : > { %v2113_v29 = vpop.f32.mrf.mxu0 }
 0x1eb   : > { %v5342_v53 = vpop.f32.mrf.mxu1  ;;  %v2626_v31 = vpack.c.bf16 %v2582_v58, %v2578_v25  ;;  %v2114_v2 = vadd.f32 %v2113_v29, %v5215_v36  ;;  %v2585_v6 = vmax.f32 %v2112_v9, 0.0  ;;  %v5364_v58 = vrot.slane %v5078_v18, %v769_v60  ;;  %v5693_v9 = vld [vmem:[#allocation11_spill] sm:$0xff] }
 0x1ec   : > { %v2115_v52 = vpop.f32.mrf.mxu0 }
 0x1ed   : > { %v5345_v10 = vpop.f32.mrf.mxu1  ;;  %v2116_v44 = vadd.f32 %v2115_v52, %v5222_v38  ;;  %2988 = vmatprep.mubr.bf16.mxu0 %v2626_v31  ;;  %v2586_v32 = vmax.f32 %v2114_v2, 0.0  ;;  %v2163_v52 = vadd.f32 %v5693_v9, %v5359_v49 }
 0x1ee   : > { %v2117_v20 = vpop.f32.mrf.mxu0  ;;  %2989 = vmatmul.mubr.bf16.gmra.mxu0 %v2625_v37 }
 0x1ef   : > { %v5350_v43 = vpop.f32.mrf.mxu1  ;;  %v2589_v40 = vmax.f32 %v2116_v44, 0.0  ;;  %v2118_v34 = vadd.f32 %v2117_v20, %v1987_v21 }
 0x1f0   : > { %v2121_v4 = vpop.f32.mrf.mxu0 }
 0x1f1   : > { %v5353_v8 = vpop.f32.mrf.mxu1  ;;  %v2629_v50 = vpack.c.bf16 %v2589_v40, %v2585_v6  ;;  %v2590_v36 = vmax.f32 %v2118_v34, 0.0  ;;  %v2122_v24 = vadd.f32 %v2121_v4, %v5692_v5  ;;  %v2167_v34 = vadd.f32 %v5235_v46, %v5359_v49  ;;  %v5695_v46 = vld [vmem:[#allocation13_spill] sm:$0xff] }
 0x1f2   : > { %v2123_v14 = vpop.f32.mrf.mxu0 }
 0x1f3   : > { %v5356_v38 = vpop.f32.mrf.mxu1  ;;  %v2630_v27 = vpack.c.bf16 %v2590_v36, %v2586_v32  ;;  %v2124_v28 = vadd.f32 %v2123_v14, %v5228_v63  ;;  %v2593_v2 = vmax.f32 %v2122_v24, 0.0  ;;  %v5694_v63 = vld [vmem:[#allocation12_spill] sm:$0xff]  ;;  %v2169_v36 = vadd.f32 %v5239_v39, %v5364_v58 }
 0x1f4   : > { %v2125_v25 = vpop.f32.mrf.mxu0  ;;  %v2165_v3 = vadd.f32 %v5694_v63, %v5364_v58  ;;  %v2173_v24 = vadd.f32 %v5242_v33, %v5359_v49 }
 0x1f5   : > { %v2256_v37 = vpop.f32.mrf.mxu1  ;;  %v2594_v48 = vmax.f32 %v2124_v28, 0.0  ;;  %2996 = vmatprep.mubr.bf16.mxu0 %v2630_v27  ;;  %v2633_v60 = vpack.c.bf16 %v2593_v2, %v2593_v2 }
 0x1f6   : > { %v2126_v29 = vpop.f32.mrf.mxu0  ;;  %2997 = vmatmul.mubr.bf16.gmra.mxu0 %v2629_v50 }
 0x1f7   : > { %v2257_v31 = vpop.f32.mrf.mxu1  ;;  %v2634_v21 = vpack.c.bf16 %v2594_v48, %v2594_v48  ;;  %v2175_v29 = vadd.f32 %v5695_v46, %v5364_v58 }
 0x1f8   : > { %v2293_v44 = vpop.f32.mrf.mxu0 }
 0x1f9   : > { %v2424_v20 = vpop.f32.mrf.mxu1  ;;  %v2294_v6 = vadd.f32 %v2293_v44, %v2163_v52  ;;  %3004 = vmatprep.mubr.bf16.mxu0 %v2634_v21  ;;  %v2177_v44 = vadd.f32 %v5247_v22, %v5359_v49 }
 0x1fa   : > { %v2295_v40 = vpop.f32.mrf.mxu0 }
 0x1fb   : > { %v2426_v18 = vpop.f32.mrf.mxu1  ;;  %v2296_v4 = vadd.f32 %v2295_v40, %v2165_v3  ;;  %v2425_v14 = vadd.f32 %v2424_v20, %v2294_v6 }
 0x1fc   : > { %v2297_v32 = vpop.f32.mrf.mxu0 }
 0x1fd   : > { %v2428_v50 = vpop.f32.mrf.mxu1  ;;  %v2298_v27 = vadd.f32 %v2297_v32, %v2167_v34  ;;  %v2427_v25 = vadd.f32 %v2426_v18, %v2296_v4  ;;  %v2523_v52 = vmax.f32 %v2425_v14, 0.0  ;;  %v2179_v4 = vadd.f32 %v5251_v15, %v5364_v58 }
 0x1fe   : > { %v2299_v28 = vpop.f32.mrf.mxu0  ;;  %3005 = vmatmul.mubr.bf16.gmra.mxu0 %v2633_v60 }
 0x1ff   : > { %v2430_v5 = vpop.f32.mrf.mxu1  ;;  %v2429_v37 = vadd.f32 %v2428_v50, %v2298_v27  ;;  %v2300_v48 = vadd.f32 %v2299_v28, %v2169_v36  ;;  %v2524_v3 = vmax.f32 %v2427_v25, 0.0  ;;  %v2183_v27 = vadd.f32 %v5254_v19, %v5359_v49 }
 0x200   : > { %v2303_v31 = vpop.f32.mrf.mxu0 }
 0x201   : > { %v2434_v9 = vpop.f32.mrf.mxu1  ;;  %v2527_v21 = vmax.f32 %v2429_v37, 0.0  ;;  %v2431_v2 = vadd.f32 %v2430_v5, %v2300_v48  ;;  %v2304_v39 = vadd.f32 %v2303_v31, %v2173_v24  ;;  %v2185_v24 = vadd.f32 %v5258_v7, %v5364_v58 }
 0x202   : > { %v2305_v20 = vpop.f32.mrf.mxu0  ;;  %v2187_v31 = vadd.f32 %v5261_v16, %v5359_v49  ;;  %v2189_v7 = vadd.f32 %v5266_v17, %v5364_v58 }
 0x203   : > { %v2436_v63 = vpop.f32.mrf.mxu1  ;;  %v2599_v6 = vpack.c.bf16 %v2527_v21, %v2523_v52  ;;  %v2528_v33 = vmax.f32 %v2431_v2, 0.0  ;;  %v2306_v40 = vadd.f32 %v2305_v20, %v2175_v29  ;;  %v2435_v32 = vadd.f32 %v2434_v9, %v2304_v39 }
 0x204   : > { %v2307_v18 = vpop.f32.mrf.mxu0 }
 0x205   : > { %v2438_v34 = vpop.f32.mrf.mxu1  ;;  %v2600_v60 = vpack.c.bf16 %v2528_v33, %v2524_v3  ;;  %v2308_v50 = vadd.f32 %v2307_v18, %v2177_v44  ;;  %v2437_v22 = vadd.f32 %v2436_v63, %v2306_v40  ;;  %v2531_v48 = vmax.f32 %v2435_v32, 0.0 }
 0x206   : > { %v2309_v36 = vpop.f32.mrf.mxu0  ;;  %v2193_v18 = vadd.f32 %v5268_v59, %v5359_v49 }
 0x207   : > { %v2440_v14 = vpop.f32.mrf.mxu1  ;;  %v2439_v28 = vadd.f32 %v2438_v34, %v2308_v50  ;;  %v2310_v5 = vadd.f32 %v2309_v36, %v2179_v4  ;;  %3044 = vmatprep.mubr.bf16.mxu1 %v2600_v60  ;;  %v2532_v19 = vmax.f32 %v2437_v22, 0.0  ;;  %v2195_v60 = vadd.f32 %v5272_v1, %v5364_v58 }
 0x208   : > { %v2313_v25 = vpop.f32.mrf.mxu0  ;;  %3045 = vmatmul.mubr.bf16.vlgmr.msra.gmra.mxu1 %v2599_v6  ;;  %v2197_v22 = vadd.f32 %v5275_v12, %v5359_v49  ;;  %v2199_v1 = vadd.f32 %v5280_v45, %v5364_v58 }
 0x209   : > { %v2444_v37 = vpop.f32.mrf.mxu1  ;;  %v2535_v15 = vmax.f32 %v2439_v28, 0.0  ;;  %v2441_v46 = vadd.f32 %v2440_v14, %v2310_v5  ;;  %v2314_v29 = vadd.f32 %v2313_v25, %v2183_v27 }
 0x20a   : > { %v2315_v9 = vpop.f32.mrf.mxu0 }
 0x20b   : > { %v2446_v52 = vpop.f32.mrf.mxu1  ;;  %v2603_v21 = vpack.c.bf16 %v2535_v15, %v2531_v48  ;;  %v2536_v2 = vmax.f32 %v2441_v46, 0.0  ;;  %v2316_v39 = vadd.f32 %v2315_v9, %v2185_v24  ;;  %v2445_v3 = vadd.f32 %v2444_v37, %v2314_v29 }
 0x20c   : > { %v2317_v44 = vpop.f32.mrf.mxu0 }
 0x20d   : > { %v2448_v20 = vpop.f32.mrf.mxu1  ;;  %v2604_v63 = vpack.c.bf16 %v2536_v2, %v2532_v19  ;;  %v2318_v6 = vadd.f32 %v2317_v44, %v2187_v31  ;;  %v2447_v16 = vadd.f32 %v2446_v52, %v2316_v39  ;;  %v2539_v36 = vmax.f32 %v2445_v3, 0.0 }
 0x20e   : > { %v2319_v33 = vpop.f32.mrf.mxu0  ;;  %v2203_v19 = vadd.f32 %v5282_v11, %v5359_v49  ;;  %v2205_v39 = vadd.f32 %v5286_v0, %v5364_v58  ;;  %v2209_v0 = vadd.f32 %v5294_v35, %v5364_v58 }
 0x20f   : > { %v2450_v40 = vpop.f32.mrf.mxu1  ;;  %v2449_v34 = vadd.f32 %v2448_v20, %v2318_v6  ;;  %v2320_v4 = vadd.f32 %v2319_v33, %v2189_v7  ;;  %3052 = vmatprep.mubr.bf16.mxu1 %v2604_v63  ;;  %v2540_v59 = vmax.f32 %v2447_v16, 0.0  ;;  %v2207_v6 = vadd.f32 %v5289_v51, %v5359_v49 }
 0x210   : > { %v2323_v32 = vpop.f32.mrf.mxu0  ;;  %3053 = vmatmul.mubr.bf16.gmra.mxu1 %v2603_v21 }
 0x211   : > { %v2454_v50 = vpop.f32.mrf.mxu1  ;;  %v2543_v17 = vmax.f32 %v2449_v34, 0.0  ;;  %v2451_v14 = vadd.f32 %v2450_v40, %v2320_v4  ;;  %v2324_v27 = vadd.f32 %v2323_v32, %v2193_v18 }
 0x212   : > { %v2325_v28 = vpop.f32.mrf.mxu0 }
 0x213   : > { %v2456_v5 = vpop.f32.mrf.mxu1  ;;  %v2607_v24 = vpack.c.bf16 %v2543_v17, %v2539_v36  ;;  %v2544_v25 = vmax.f32 %v2451_v14, 0.0  ;;  %v2326_v37 = vadd.f32 %v2325_v28, %v2195_v60  ;;  %v2455_v29 = vadd.f32 %v2454_v50, %v2324_v27 }
 0x214   : > { %v2327_v48 = vpop.f32.mrf.mxu0  ;;  %v2213_v27 = vadd.f32 %v5296_v54, %v5359_v49 }
 0x215   : > { %v2458_v15 = vpop.f32.mrf.mxu1  ;;  %v2608_v46 = vpack.c.bf16 %v2544_v25, %v2540_v59  ;;  %v2328_v31 = vadd.f32 %v2327_v48, %v2197_v22  ;;  %v2457_v12 = vadd.f32 %v2456_v5, %v2326_v37  ;;  %v2547_v7 = vmax.f32 %v2455_v29, 0.0 }
 0x216   : > { %v2329_v9 = vpop.f32.mrf.mxu0  ;;  %v2215_v5 = vadd.f32 %v5300_v13, %v5364_v58  ;;  %v2219_v13 = vadd.f32 %v5308_v42, %v5364_v58 }
 0x217   : > { %v2460_v52 = vpop.f32.mrf.mxu1  ;;  %v2459_v21 = vadd.f32 %v2458_v15, %v2328_v31  ;;  %v2330_v2 = vadd.f32 %v2329_v9, %v2199_v1  ;;  %3060 = vmatprep.mubr.bf16.mxu1 %v2608_v46  ;;  %v2548_v11 = vmax.f32 %v2457_v12, 0.0  ;;  %v2217_v15 = vadd.f32 %v5303_v23, %v5359_v49 }
 0x218   : > { %v2333_v44 = vpop.f32.mrf.mxu0  ;;  %3061 = vmatmul.mubr.bf16.gmra.mxu1 %v2607_v24 }
 0x219   : > { %v2464_v20 = vpop.f32.mrf.mxu1  ;;  %v2551_v45 = vmax.f32 %v2459_v21, 0.0  ;;  %v2461_v63 = vadd.f32 %v2460_v52, %v2330_v2  ;;  %v2334_v3 = vadd.f32 %v2333_v44, %v2203_v19 }
 0x21a   : > { %v2335_v33 = vpop.f32.mrf.mxu0 }
 0x21b   : > { %v2466_v40 = vpop.f32.mrf.mxu1  ;;  %v2611_v18 = vpack.c.bf16 %v2551_v45, %v2547_v7  ;;  %v2552_v16 = vmax.f32 %v2461_v63, 0.0  ;;  %v2336_v34 = vadd.f32 %v2335_v33, %v2205_v39  ;;  %v2465_v50 = vadd.f32 %v2464_v20, %v2334_v3 }
 0x21c   : > { %v2337_v4 = vpop.f32.mrf.mxu0  ;;  %v2223_v20 = vadd.f32 %v5310_v30, %v5359_v49  ;;  %v2225_v63 = vadd.f32 %v5314_v56, %v5364_v58  ;;  %v4426_v56 = vld [vmem:[%s5671_s5 + $0x38] sm:$0xff]  }
 0x21d   : > { %v2468_v60 = vpop.f32.mrf.mxu1  ;;  %v2612_v32 = vpack.c.bf16 %v2552_v16, %v2548_v11  ;;  %v2338_v36 = vadd.f32 %v2337_v4, %v2207_v6  ;;  %v2467_v51 = vadd.f32 %v2466_v40, %v2336_v34  ;;  %v2555_v25 = vmax.f32 %v2465_v50, 0.0  ;;  %3984 = vmatprep.subr.bf16.mxu0 %v4426_v56  ;;  %4020 = vmatprep.subr.bf16.mxu1 %v4426_v56 }
 0x21e   : > { %v2339_v17 = vpop.f32.mrf.mxu0  ;;  %3985 = vmatpush3.bf16.msra.mxu0 %v4426_v56  ;;  %4028 = vmatpush3.bf16.msra.mxu1 %v4426_v56 }
 0x21f   : > { %v2470_v14 = vpop.f32.mrf.mxu1  ;;  %v2469_v22 = vadd.f32 %v2468_v60, %v2338_v36  ;;  %v2340_v28 = vadd.f32 %v2339_v17, %v2209_v0  ;;  %3068 = vmatprep.mubr.bf16.mxu1 %v2612_v32  ;;  %v2556_v54 = vmax.f32 %v2467_v51, 0.0  ;;  %v2229_v32 = vadd.f32 %v5322_v61, %v5364_v58 }
 0x220   : > { %v2343_v59 = vpop.f32.mrf.mxu0  ;;  %3069 = vmatmul.mubr.bf16.gmra.mxu1 %v2611_v18  ;;  %v2227_v18 = vadd.f32 %v5317_v57, %v5359_v49  ;;  %v2235_v61 = vadd.f32 %v5328_v62, %v5364_v58  ;;  %v2239_v62 = vadd.f32 %v5336_v26, %v5364_v58 }
 0x221   : > { %v2474_v24 = vpop.f32.mrf.mxu1  ;;  %v2559_v35 = vmax.f32 %v2469_v22, 0.0  ;;  %v2471_v37 = vadd.f32 %v2470_v14, %v2340_v28  ;;  %v2344_v48 = vadd.f32 %v2343_v59, %v2213_v27  ;;  %v2233_v22 = vadd.f32 %v5324_v55, %v5359_v49 }
 0x222   : > { %v2345_v1 = vpop.f32.mrf.mxu0 }
 0x223   : > { %v2476_v46 = vpop.f32.mrf.mxu1  ;;  %v2615_v29 = vpack.c.bf16 %v2559_v35, %v2555_v25  ;;  %v2560_v31 = vmax.f32 %v2471_v37, 0.0  ;;  %v2346_v9 = vadd.f32 %v2345_v1, %v2215_v5  ;;  %v2475_v21 = vadd.f32 %v2474_v24, %v2344_v48 }
 0x224   : > { %v2347_v52 = vpop.f32.mrf.mxu0  ;;  %v2237_v1 = vadd.f32 %v5331_v41, %v5359_v49 }
 0x225   : > { %v2478_v19 = vpop.f32.mrf.mxu1  ;;  %v2616_v12 = vpack.c.bf16 %v2560_v31, %v2556_v54  ;;  %v2348_v2 = vadd.f32 %v2347_v52, %v2217_v15  ;;  %v2477_v23 = vadd.f32 %v2476_v46, %v2346_v9  ;;  %v2563_v33 = vmax.f32 %v2475_v21, 0.0 }
 0x226   : > { %v2349_v39 = vpop.f32.mrf.mxu0 }
 0x227   : > { %v2480_v44 = vpop.f32.mrf.mxu1  ;;  %v2479_v7 = vadd.f32 %v2478_v19, %v2348_v2  ;;  %v2350_v45 = vadd.f32 %v2349_v39, %v2219_v13  ;;  %3076 = vmatprep.mubr.bf16.mxu1 %v2616_v12  ;;  %v2564_v30 = vmax.f32 %v2477_v23, 0.0 }
 0x228   : > { %v2353_v3 = vpop.f32.mrf.mxu0  ;;  %3077 = vmatmul.mubr.bf16.gmra.mxu1 %v2615_v29 }
 0x229   : > { %v2484_v6 = vpop.f32.mrf.mxu1  ;;  %v2567_v42 = vmax.f32 %v2479_v7, 0.0  ;;  %v2481_v40 = vadd.f32 %v2480_v44, %v2350_v45  ;;  %v2354_v11 = vadd.f32 %v2353_v3, %v2223_v20  ;;  %v2243_v44 = vadd.f32 %v5338_v47, %v5359_v49  ;;  %v4427_v7 = vld [vmem:[%s5671_s5 + $0x30] sm:$0xff]  }
 0x22a   : > { %v2355_v16 = vpop.f32.mrf.mxu0  ;;  %v2245_v45 = vadd.f32 %v5342_v53, %v5364_v58  ;;  %3986 = vmatprep.subr.bf16.mxu0 %v4427_v7  ;;  %4021 = vmatprep.subr.bf16.mxu1 %v4427_v7  ;;  %v2247_v47 = vadd.f32 %v5345_v10, %v5359_v49 }
 0x22b   : > { %v2486_v34 = vpop.f32.mrf.mxu1  ;;  %v2619_v4 = vpack.c.bf16 %v2567_v42, %v2563_v33  ;;  %v2568_v60 = vmax.f32 %v2481_v40, 0.0  ;;  %v2356_v0 = vadd.f32 %v2355_v16, %v2225_v63  ;;  %v2485_v14 = vadd.f32 %v2484_v6, %v2354_v11  ;;  %3987 = vmatpush3.bf16.msra.mxu0 %v4427_v7  ;;  %4029 = vmatpush3.bf16.msra.mxu1 %v4427_v7 }
 0x22c   : > { %v2357_v50 = vpop.f32.mrf.mxu0 }
 0x22d   : > { %v2488_v36 = vpop.f32.mrf.mxu1  ;;  %v2620_v17 = vpack.c.bf16 %v2568_v60, %v2564_v30  ;;  %v2358_v27 = vadd.f32 %v2357_v50, %v2227_v18  ;;  %v2487_v28 = vadd.f32 %v2486_v34, %v2356_v0  ;;  %v2571_v35 = vmax.f32 %v2485_v14, 0.0 }
 0x22e   : > { %v2359_v57 = vpop.f32.mrf.mxu0  ;;  %v2249_v60 = vadd.f32 %v5350_v43, %v5364_v58  ;;  %v2255_v43 = vadd.f32 %v5356_v38, %v5364_v58 }
 0x22f   : > { %v2490_v51 = vpop.f32.mrf.mxu1  ;;  %v2489_v5 = vadd.f32 %v2488_v36, %v2358_v27  ;;  %v2360_v59 = vadd.f32 %v2359_v57, %v2229_v32  ;;  %3084 = vmatprep.mubr.bf16.mxu1 %v2620_v17  ;;  %v2572_v55 = vmax.f32 %v2487_v28, 0.0  ;;  %v4428_v27 = vld [vmem:[%s5671_s5 + $0x28] sm:$0xff]   ;;  %v2253_v57 = vadd.f32 %v5353_v8, %v5359_v49 }
 0x230   : > { %v2363_v24 = vpop.f32.mrf.mxu0  ;;  %3085 = vmatmul.mubr.bf16.gmra.mxu1 %v2619_v4  ;;  %3988 = vmatprep.subr.bf16.mxu0 %v4428_v27 }
 0x231   : > { %v2494_v25 = vpop.f32.mrf.mxu1  ;;  %v2575_v37 = vmax.f32 %v2489_v5, 0.0  ;;  %v2491_v48 = vadd.f32 %v2490_v51, %v2360_v59  ;;  %v2364_v15 = vadd.f32 %v2363_v24, %v2233_v22  ;;  %4022 = vmatprep.subr.bf16.mxu1 %v4428_v27  ;;  %3989 = vmatpush3.bf16.msra.mxu0 %v4428_v27 }
 0x232   : > { %v2365_v46 = vpop.f32.mrf.mxu0  ;;  %4030 = vmatpush3.bf16.msra.mxu1 %v4428_v27 }
 0x233   : > { %v2496_v54 = vpop.f32.mrf.mxu1  ;;  %v2623_v29 = vpack.c.bf16 %v2575_v37, %v2571_v35  ;;  %v2576_v31 = vmax.f32 %v2491_v48, 0.0  ;;  %v2366_v9 = vadd.f32 %v2365_v46, %v2235_v61  ;;  %v2495_v12 = vadd.f32 %v2494_v25, %v2364_v15 }
 0x234   : > { %v2367_v52 = vpop.f32.mrf.mxu0 }
 0x235   : > { %v2498_v19 = vpop.f32.mrf.mxu1  ;;  %v2624_v13 = vpack.c.bf16 %v2576_v31, %v2572_v55  ;;  %v2368_v21 = vadd.f32 %v2367_v52, %v2237_v1  ;;  %v2497_v41 = vadd.f32 %v2496_v54, %v2366_v9  ;;  %v2579_v3 = vmax.f32 %v2495_v12, 0.0  ;;  %v4430_v52 = vld [vmem:[%s5671_s5 + $0x18] sm:$0xff]   ;;  %v4433_v12 = vld [vmem:[%s5671_s5] sm:$0xff]  }
 0x236   : > { %v2369_v2 = vpop.f32.mrf.mxu0 }
 0x237   : > { %v2500_v39 = vpop.f32.mrf.mxu1  ;;  %v2499_v20 = vadd.f32 %v2498_v19, %v2368_v21  ;;  %v2370_v23 = vadd.f32 %v2369_v2, %v2239_v62  ;;  %3092 = vmatprep.mubr.bf16.mxu1 %v2624_v13  ;;  %v2580_v18 = vmax.f32 %v2497_v41, 0.0  ;;  %v4431_v62 = vld [vmem:[%s5671_s5 + $0x10] sm:$0xff]   ;;  %v4432_v13 = vld [vmem:[%s5671_s5 + $0x8] sm:$0xff]  }
 0x238   : > { %v2373_v26 = vpop.f32.mrf.mxu0  ;;  %3093 = vmatmul.mubr.bf16.gmra.mxu1 %v2623_v29  ;;  %v4429_v29 = vld [vmem:[%s5671_s5 + $0x20] sm:$0xff]  }
 0x239   : > { %v2504_v63 = vpop.f32.mrf.mxu1  ;;  %v2583_v6 = vmax.f32 %v2499_v20, 0.0  ;;  %v2501_v33 = vadd.f32 %v2500_v39, %v2370_v23  ;;  %v2374_v42 = vadd.f32 %v2373_v26, %v2243_v44  ;;  %3990 = vmatprep.subr.bf16.mxu0 %v4429_v29  ;;  %4023 = vmatprep.subr.bf16.mxu1 %v4429_v29 }
 0x23a   : > { %v2375_v40 = vpop.f32.mrf.mxu0  ;;  %3991 = vmatpush3.bf16.msra.mxu0 %v4429_v29  ;;  %4031 = vmatpush3.bf16.msra.mxu1 %v4429_v29 }
 0x23b   : > { %v2506_v11 = vpop.f32.mrf.mxu1  ;;  %v2627_v16 = vpack.c.bf16 %v2583_v6, %v2579_v3  ;;  %v2584_v34 = vmax.f32 %v2501_v33, 0.0  ;;  %v2376_v53 = vadd.f32 %v2375_v40, %v2245_v45  ;;  %v2505_v56 = vadd.f32 %v2504_v63, %v2374_v42  ;;  %3992 = vmatprep.subr.bf16.mxu0 %v4430_v52  ;;  %4024 = vmatprep.subr.bf16.mxu1 %v4430_v52 }
 0x23c   : > { %v2377_v30 = vpop.f32.mrf.mxu0 }
 0x23d   : > { %v2508_v4 = vpop.f32.mrf.mxu1  ;;  %v2628_v0 = vpack.c.bf16 %v2584_v34, %v2580_v18  ;;  %v2378_v32 = vadd.f32 %v2377_v30, %v2247_v47  ;;  %v2507_v17 = vadd.f32 %v2506_v11, %v2376_v53  ;;  %v2587_v28 = vmax.f32 %v2505_v56, 0.0 }
 0x23e   : > { %v2379_v50 = vpop.f32.mrf.mxu0  ;;  %3993 = vmatpush3.bf16.msra.mxu0 %v4430_v52  ;;  %4032 = vmatpush3.bf16.msra.mxu1 %v4430_v52 }
 0x23f   : > { %v2510_v36 = vpop.f32.mrf.mxu1  ;;  %v2509_v10 = vadd.f32 %v2508_v4, %v2378_v32  ;;  %v2380_v14 = vadd.f32 %v2379_v50, %v2249_v60  ;;  %3100 = vmatprep.mubr.bf16.mxu1 %v2628_v0  ;;  %v2588_v35 = vmax.f32 %v2507_v17, 0.0  ;;  %3994 = vmatprep.subr.bf16.mxu0 %v4431_v62 }
 0x240   : > { %v2383_v51 = vpop.f32.mrf.mxu0  ;;  %3101 = vmatmul.mubr.bf16.gmra.mxu1 %v2627_v16  ;;  %4025 = vmatprep.subr.bf16.mxu1 %v4431_v62 }
 0x241   : > { %v2514_v22 = vpop.f32.mrf.mxu1  ;;  %v2591_v5 = vmax.f32 %v2509_v10, 0.0  ;;  %v2511_v59 = vadd.f32 %v2510_v36, %v2380_v14  ;;  %v2384_v61 = vadd.f32 %v2383_v51, %v2253_v57 }
 0x242   : > { %v2385_v24 = vpop.f32.mrf.mxu0  ;;  %3995 = vmatpush3.bf16.msra.mxu0 %v4431_v62  ;;  %4033 = vmatpush3.bf16.msra.mxu1 %v4431_v62 }
 0x243   : > { %v2516_v25 = vpop.f32.mrf.mxu1  ;;  %v2631_v37 = vpack.c.bf16 %v2591_v5, %v2587_v28  ;;  %v2592_v48 = vmax.f32 %v2511_v59, 0.0  ;;  %v2386_v8 = vadd.f32 %v2385_v24, %v2255_v43  ;;  %v2515_v54 = vadd.f32 %v2514_v22, %v2384_v61  ;;  %3996 = vmatprep.subr.bf16.mxu0 %v4432_v13  ;;  %4026 = vmatprep.subr.bf16.mxu1 %v4432_v13 }
 0x244   : > { %v2387_v49 = vpop.f32.mrf.mxu0 }
 0x245   : > { %v2518_v15 = vpop.f32.mrf.mxu1  ;;  %v2632_v1 = vpack.c.bf16 %v2592_v48, %v2588_v35  ;;  %v2517_v46 = vadd.f32 %v2516_v25, %v2386_v8  ;;  %v2595_v9 = vmax.f32 %v2515_v54, 0.0 }
 0x246   : > { %v2388_v38 = vpop.f32.mrf.mxu0  ;;  %3997 = vmatpush3.bf16.msra.mxu0 %v4432_v13  ;;  %4034 = vmatpush3.bf16.msra.mxu1 %v4432_v13 }
 0x247   : > { %v2519_v58 = vpop.f32.mrf.mxu1  ;;  %v2596_v55 = vmax.f32 %v2517_v46, 0.0  ;;  %3108 = vmatprep.mubr.bf16.mxu1 %v2632_v1  ;;  %v2635_v19 = vpack.c.bf16 %v2595_v9, %v2595_v9  ;;  %3998 = vmatprep.subr.bf16.mxu0 %v4433_v12 }
 0x248   : > { %3109 = vmatmul.mubr.bf16.gmra.mxu1 %v2631_v37  ;;  %4027 = vmatprep.subr.bf16.mxu1 %v4433_v12 }
 0x249   : > { %v2636_v31 = vpack.c.bf16 %v2596_v55, %v2596_v55 }
 0x24a   : > { %3999 = vmatpush3.bf16.msra.mxu0 %v4433_v12  ;;  %4035 = vmatpush3.bf16.msra.mxu1 %v4433_v12 }
 0x24b   : > { %3116 = vmatprep.mubr.bf16.mxu1 %v2636_v31 }
 0x250   : > { %3117 = vmatmul.mubr.bf16.gmra.mxu1 %v2635_v19  ;;  %v5503_v19 = vld [vmem:[%s5670_s4] ss:$0 sm:$0xff] }
 0x276   : > { %v3830_v21 = vpop.f32.mrf.mxu0 }
 0x278   : > { %v3831_v2 = vpop.f32.mrf.mxu0 }
 0x279   : > { %v3832_v39 = vadd.f32 %v3831_v2, %v3830_v21 }
 0x27a   : > { %v3833_v44 = vpop.f32.mrf.mxu0 }
 0x27b   : > { %v2935_v21 = vadd.f32 %v3832_v39, %v5503_v19 }
 0x27c   : > { %v3834_v41 = vpop.f32.mrf.mxu0 }
 0x27d   : > { %v3835_v20 = vadd.f32 %v3834_v41, %v3833_v44 }
 0x27e   : > { %v3836_v23 = vpop.f32.mrf.mxu0 }
 0x27f   : > { %v2938_v44 = vadd.f32 %v3835_v20, %v5503_v19 }
 0x280   : > { %v3837_v7 = vpop.f32.mrf.mxu0 }
 0x281   : > { %v5466_v45 = vadd.f32 %v3837_v7, %v3836_v23 }
 0x282   : > { %v3839_v26 = vpop.f32.mrf.mxu0 }
 0x284   : > { %v3840_v63 = vpop.f32.mrf.mxu0 }
 0x285   : > { %v5468_v3 = vadd.f32 %v3840_v63, %v3839_v26 }
 0x286   : > { %v3842_v6 = vpop.f32.mrf.mxu0 }
 0x287   : > { %v2946_v39 = vadd.f32 %v5468_v3, %v5503_v19 }
 0x288   : > { %v3843_v33 = vpop.f32.mrf.mxu0 }
 0x289   : > { %v5470_v42 = vadd.f32 %v3843_v33, %v3842_v6 }
 0x28a   : > { %v3845_v47 = vpop.f32.mrf.mxu0 }
 0x28c   : > { %v3846_v40 = vpop.f32.mrf.mxu0 }
 0x28d   : > { %v5472_v11 = vadd.f32 %v3846_v40, %v3845_v47 }
 0x28e   : > { %v3848_v18 = vpop.f32.mrf.mxu0 }
 0x290   : > { %v3849_v16 = vpop.f32.mrf.mxu0 }
 0x291   : > { %v5474_v34 = vadd.f32 %v3849_v16, %v3848_v18  ;;  %v2943_v18 = vadd.f32 %v5466_v45, %v5503_v19 }
 0x292   : > { %v3851_v53 = vpop.f32.mrf.mxu0 }
 0x294   : > { %v3852_v30 = vpop.f32.mrf.mxu0 }
 0x295   : > { %v5476_v4 = vadd.f32 %v3852_v30, %v3851_v53 }
 0x296   : > { %v3854_v60 = vpop.f32.mrf.mxu0 }
 0x298   : > { %v3855_v0 = vpop.f32.mrf.mxu0 }
 0x299   : > { %v5478_v56 = vadd.f32 %v3855_v0, %v3854_v60 }
 0x29a   : > { %v3857_v32 = vpop.f32.mrf.mxu0 }
 0x29c   : > { %v3858_v50 = vpop.f32.mrf.mxu0 }
 0x29d   : > { %v5480_v36 = vadd.f32 %v3858_v50, %v3857_v32 }
 0x29e   : > { %v3860_v17 = vpop.f32.mrf.mxu0 }
 0x2a0   : > { %v3861_v10 = vpop.f32.mrf.mxu0 }
 0x2a1   : > { %v5482_v14 = vadd.f32 %v3861_v10, %v3860_v17 }
 0x2a2   : > { %v3863_v27 = vpop.f32.mrf.mxu0 }
 0x2a4   : > { %v3864_v57 = vpop.f32.mrf.mxu0 }
 0x2a5   : > { %v5484_v51 = vadd.f32 %v3864_v57, %v3863_v27  ;;  %v2951_v57 = vadd.f32 %v5470_v42, %v5503_v19 }
 0x2a6   : > { %v3866_v22 = vpop.f32.mrf.mxu0 }
 0x2a8   : > { %v3867_v43 = vpop.f32.mrf.mxu0 }
 0x2a9   : > { %v5486_v28 = vadd.f32 %v3867_v43, %v3866_v22  ;;  %v2954_v43 = vadd.f32 %v5472_v11, %v5503_v19 }
 0x2aa   : > { %v3869_v5 = vpop.f32.mrf.mxu0 }
 0x2ac   : > { %v3870_v59 = vpop.f32.mrf.mxu0 }
 0x2ad   : > { %v5488_v61 = vadd.f32 %v3870_v59, %v3869_v5 }
 0x2ae   : > { %v3872_v24 = vpop.f32.mrf.mxu0 }
 0x2b0   : > { %v3873_v25 = vpop.f32.mrf.mxu0 }
 0x2b1   : > { %v5490_v35 = vadd.f32 %v3873_v25, %v3872_v24 }
 0x2b2   : > { %v3875_v37 = vpop.f32.mrf.mxu0 }
 0x2b4   : > { %v3876_v48 = vpop.f32.mrf.mxu0 }
 0x2b5   : > { %v5492_v8 = vadd.f32 %v3876_v48, %v3875_v37 }
 0x2b6   : > { %v3878_v49 = vpop.f32.mrf.mxu0 }
 0x2b8   : > { %v3879_v15 = vpop.f32.mrf.mxu0 }
 0x2b9   : > { %v5494_v1 = vadd.f32 %v3879_v15, %v3878_v49 }
 0x2ba   : > { %v3881_v46 = vpop.f32.mrf.mxu0 }
 0x2bc   : > { %v3882_v54 = vpop.f32.mrf.mxu0 }
 0x2bd   : > { %v5496_v38 = vadd.f32 %v3882_v54, %v3881_v46  ;;  %v2959_v46 = vadd.f32 %v5474_v34, %v5503_v19 }
 0x2be   : > { %v3884_v58 = vpop.f32.mrf.mxu0 }
 0x2c0   : > { %v3885_v55 = vpop.f32.mrf.mxu0 }
 0x2c1   : > { %v5498_v29 = vadd.f32 %v3885_v55, %v3884_v58  ;;  %v2962_v58 = vadd.f32 %v5476_v4, %v5503_v19 }
 0x2c2   : > { %v3887_v31 = vpop.f32.mrf.mxu0 }
 0x2c4   : > { %v3888_v9 = vpop.f32.mrf.mxu0 }
 0x2c8   : > { %v3906_v52 = vpop.f32.mrf.mxu1 }
 0x2ca   : > { %v3907_v62 = vpop.f32.mrf.mxu1 }
 0x2cb   : > { %v3908_v13 = vadd.f32 %v3907_v62, %v3906_v52 }
 0x2cc   : > { %v3909_v12 = vpop.f32.mrf.mxu1 }
 0x2cd   : > { %v3047_v41 = vadd.f32 %v3908_v13, %v2935_v21 }
 0x2ce   : > { %v3910_v2 = vpop.f32.mrf.mxu1 }
 0x2cf   : > { %v3911_v23 = vadd.f32 %v3910_v2, %v3909_v12  ;;  %v3124_v6 = vmax.f32 %v3047_v41, 0.0  ;;  %v2967_v2 = vadd.f32 %v5478_v56, %v5503_v19  ;;  %v2970_v41 = vadd.f32 %v5480_v36, %v5503_v19 }
 0x2d0   : > { %v3912_v7 = vpop.f32.mrf.mxu1 }
 0x2d1   : > { %v3050_v26 = vadd.f32 %v3911_v23, %v2938_v44 }
 0x2d2   : > { %v3913_v63 = vpop.f32.mrf.mxu1 }
 0x2d3   : > { %v3125_v33 = vmax.f32 %v3050_v26, 0.0  ;;  %v3914_v47 = vadd.f32 %v3913_v63, %v3912_v7 }
 0x2d4   : > { %v3915_v40 = vpop.f32.mrf.mxu1 }
 0x2d5   : > { %v3143_v16 = vpack.c.bf16 %v3125_v33, %v3124_v6  ;;  %v3055_v30 = vadd.f32 %v3914_v47, %v2943_v18  ;;  %v2975_v18 = vadd.f32 %v5482_v14, %v5503_v19 }
 0x2d6   : > { %v3916_v53 = vpop.f32.mrf.mxu1 }
 0x2d7   : > { %v3917_v60 = vadd.f32 %v3916_v53, %v3915_v40  ;;  %4000 = vmatprep.mubr.bf16.mxu0 %v3143_v16  ;;  %v3126_v50 = vmax.f32 %v3055_v30, 0.0  ;;  %v2978_v53 = vadd.f32 %v5484_v51, %v5503_v19 }
 0x2d8   : > { %v3918_v20 = vpop.f32.mrf.mxu1 }
 0x2d9   : > { %v3058_v0 = vadd.f32 %v3917_v60, %v2946_v39 }
 0x2da   : > { %v3919_v32 = vpop.f32.mrf.mxu1 }
 0x2db   : > { %v3127_v17 = vmax.f32 %v3058_v0, 0.0  ;;  %v3920_v10 = vadd.f32 %v3919_v32, %v3918_v20 }
 0x2dc   : > { %v3921_v27 = vpop.f32.mrf.mxu1 }
 0x2dd   : > { %v3144_v22 = vpack.c.bf16 %v3127_v17, %v3126_v50  ;;  %v3063_v5 = vadd.f32 %v3920_v10, %v2951_v57  ;;  %v2983_v10 = vadd.f32 %v5486_v28, %v5503_v19  ;;  %v2986_v57 = vadd.f32 %v5488_v61, %v5503_v19 }
 0x2de   : > { %v3922_v45 = vpop.f32.mrf.mxu1 }
 0x2df   : > { %v3923_v3 = vadd.f32 %v3922_v45, %v3921_v27  ;;  %4001 = vmatmul.mubr.bf16.vlgmr.msra.gmra.mxu0 %v3144_v22  ;;  %v3128_v37 = vmax.f32 %v3063_v5, 0.0 }
 0x2e0   : > { %v3924_v59 = vpop.f32.mrf.mxu1 }
 0x2e1   : > { %v3066_v24 = vadd.f32 %v3923_v3, %v2954_v43 }
 0x2e2   : > { %v3925_v25 = vpop.f32.mrf.mxu1 }
 0x2e3   : > { %v3129_v48 = vmax.f32 %v3066_v24, 0.0  ;;  %v3926_v49 = vadd.f32 %v3925_v25, %v3924_v59 }
 0x2e4   : > { %v3927_v15 = vpop.f32.mrf.mxu1 }
 0x2e5   : > { %v3145_v54 = vpack.c.bf16 %v3129_v48, %v3128_v37  ;;  %v3071_v55 = vadd.f32 %v3926_v49, %v2959_v46  ;;  %v2991_v37 = vadd.f32 %v5490_v35, %v5503_v19  ;;  %v2994_v49 = vadd.f32 %v5492_v8, %v5503_v19 }
 0x2e6   : > { %v3928_v42 = vpop.f32.mrf.mxu1 }
 0x2e7   : > { %v3929_v11 = vadd.f32 %v3928_v42, %v3927_v15  ;;  %4004 = vmatprep.mubr.bf16.mxu0 %v3145_v54  ;;  %v3130_v62 = vmax.f32 %v3071_v55, 0.0 }
 0x2e8   : > { %v3930_v31 = vpop.f32.mrf.mxu1 }
 0x2e9   : > { %v3074_v9 = vadd.f32 %v3929_v11, %v2962_v58 }
 0x2ea   : > { %v3931_v52 = vpop.f32.mrf.mxu1 }
 0x2eb   : > { %v3131_v13 = vmax.f32 %v3074_v9, 0.0  ;;  %v3932_v12 = vadd.f32 %v3931_v52, %v3930_v31  ;;  %v2999_v9 = vadd.f32 %v5494_v1, %v5503_v19 }
 0x2ec   : > { %v3933_v21 = vpop.f32.mrf.mxu1 }
 0x2ed   : > { %v3146_v44 = vpack.c.bf16 %v3131_v13, %v3130_v62  ;;  %v3079_v23 = vadd.f32 %v3932_v12, %v2967_v2  ;;  %v3002_v62 = vadd.f32 %v5496_v38, %v5503_v19  ;;  %v5544_v38 = vld [vmem:[%s5672_s6] ss:$0 sm:$0xff] }
 0x2ee   : > { %v3934_v34 = vpop.f32.mrf.mxu1 }
 0x2ef   : > { %v3935_v4 = vadd.f32 %v3934_v34, %v3933_v21  ;;  %4005 = vmatmul.mubr.bf16.gmra.mxu0 %v3146_v44  ;;  %v3132_v6 = vmax.f32 %v3079_v23, 0.0  ;;  %v3007_v44 = vadd.f32 %v5498_v29, %v5503_v19  ;;  %v5550_v19 = vld [vmem:[%s5673_s7] ss:$0 sm:$0xff] }
 0x2f0   : > { %v3936_v7 = vpop.f32.mrf.mxu1 }
 0x2f1   : > { %v3082_v26 = vadd.f32 %v3935_v4, %v2970_v41 }
 0x2f2   : > { %v3937_v63 = vpop.f32.mrf.mxu1 }
 0x2f3   : > { %v3133_v33 = vmax.f32 %v3082_v26, 0.0  ;;  %v3938_v47 = vadd.f32 %v3937_v63, %v3936_v7 }
 0x2f4   : > { %v3939_v40 = vpop.f32.mrf.mxu1 }
 0x2f5   : > { %v3147_v16 = vpack.c.bf16 %v3133_v33, %v3132_v6  ;;  %v3087_v39 = vadd.f32 %v3938_v47, %v2975_v18 }
 0x2f6   : > { %v3940_v56 = vpop.f32.mrf.mxu1 }
 0x2f7   : > { %v3941_v36 = vadd.f32 %v3940_v56, %v3939_v40  ;;  %4008 = vmatprep.mubr.bf16.mxu0 %v3147_v16  ;;  %v3134_v0 = vmax.f32 %v3087_v39, 0.0 }
 0x2f8   : > { %v3942_v30 = vpop.f32.mrf.mxu1 }
 0x2f9   : > { %v3090_v60 = vadd.f32 %v3941_v36, %v2978_v53 }
 0x2fa   : > { %v3943_v20 = vpop.f32.mrf.mxu1 }
 0x2fb   : > { %v3135_v32 = vmax.f32 %v3090_v60, 0.0  ;;  %v3944_v50 = vadd.f32 %v3943_v20, %v3942_v30 }
 0x2fc   : > { %v3945_v17 = vpop.f32.mrf.mxu1 }
 0x2fd   : > { %v3148_v27 = vpack.c.bf16 %v3135_v32, %v3134_v0  ;;  %v3095_v22 = vadd.f32 %v3944_v50, %v2983_v10 }
 0x2fe   : > { %v3946_v14 = vpop.f32.mrf.mxu1 }
 0x2ff   : > { %v3947_v51 = vadd.f32 %v3946_v14, %v3945_v17  ;;  %4009 = vmatmul.mubr.bf16.gmra.mxu0 %v3148_v27  ;;  %v3136_v3 = vmax.f32 %v3095_v22, 0.0 }
 0x300   : > { %v3948_v45 = vpop.f32.mrf.mxu1 }
 0x301   : > { %v3098_v43 = vadd.f32 %v3947_v51, %v2986_v57 }
 0x302   : > { %v3949_v5 = vpop.f32.mrf.mxu1 }
 0x303   : > { %v3137_v59 = vmax.f32 %v3098_v43, 0.0  ;;  %v3950_v24 = vadd.f32 %v3949_v5, %v3948_v45 }
 0x304   : > { %v3951_v25 = vpop.f32.mrf.mxu1 }
 0x305   : > { %v3149_v48 = vpack.c.bf16 %v3137_v59, %v3136_v3  ;;  %v3103_v15 = vadd.f32 %v3950_v24, %v2991_v37 }
 0x306   : > { %v3952_v28 = vpop.f32.mrf.mxu1 }
 0x307   : > { %v3953_v61 = vadd.f32 %v3952_v28, %v3951_v25  ;;  %4012 = vmatprep.mubr.bf16.mxu1 %v3149_v48  ;;  %v3138_v58 = vmax.f32 %v3103_v15, 0.0 }
 0x308   : > { %v3954_v46 = vpop.f32.mrf.mxu1 }
 0x309   : > { %v3106_v54 = vadd.f32 %v3953_v61, %v2994_v49 }
 0x30a   : > { %v3955_v42 = vpop.f32.mrf.mxu1 }
 0x30b   : > { %v3139_v55 = vmax.f32 %v3106_v54, 0.0  ;;  %v3956_v11 = vadd.f32 %v3955_v42, %v3954_v46 }
 0x30c   : > { %v3957_v31 = vpop.f32.mrf.mxu1 }
 0x30d   : > { %v3150_v52 = vpack.c.bf16 %v3139_v55, %v3138_v58  ;;  %v3111_v13 = vadd.f32 %v3956_v11, %v2999_v9 }
 0x30e   : > { %v3958_v35 = vpop.f32.mrf.mxu1 }
 0x30f   : > { %v3959_v8 = vadd.f32 %v3958_v35, %v3957_v31  ;;  %4013 = vmatmul.mubr.bf16.vlgmr.msra.gmra.mxu1 %v3150_v52  ;;  %v3140_v34 = vmax.f32 %v3111_v13, 0.0 }
 0x310   : > { %v3960_v12 = vpop.f32.mrf.mxu1 }
 0x311   : > { %v3114_v21 = vadd.f32 %v3959_v8, %v3002_v62 }
 0x312   : > { %v3961_v2 = vpop.f32.mrf.mxu1 }
 0x313   : > { %v3141_v41 = vmax.f32 %v3114_v21, 0.0  ;;  %v3962_v23 = vadd.f32 %v3961_v2, %v3960_v12 }
 0x314   : > { %v3963_v4 = vpop.f32.mrf.mxu1 }
 0x315   : > { %v3119_v7 = vadd.f32 %v3962_v23, %v3007_v44  ;;  %v3151_v1 = vpack.c.bf16 %v3141_v41, %v3140_v34 }
 0x316   : > { %v3964_v26 = vpop.f32.mrf.mxu1 }
 0x317   : > { %v3142_v63 = vmax.f32 %v3119_v7, 0.0  ;;  %4016 = vmatprep.mubr.bf16.mxu1 %v3151_v1 }
 0x319   : > { %v3152_v6 = vpack.c.bf16 %v3142_v63, %v3142_v63 }
 0x31b   : > { %4017 = vmatmul.mubr.bf16.gmra.mxu1 %v3152_v6 }
 0x39f   : > { %v4002_v33 = vpop.f32.mrf.mxu0 }
 0x3a0   : > { %v3267_v47 = vadd.f32 %v4002_v33, %v5544_v38 }
 0x3a1   : > { %v3258_v29 = vpop.f32.mrf.mxu0 }
 0x3a2   : > { %v3338_v40 = vmax.f32 %v3267_v47, 0.0  ;;  %v3259_v18 = vadd.f32 %v5544_v38, %v3258_v29 }
 0x3a3   : > { %v4003_v16 = vpop.f32.mrf.mxu0 }
 0x3a4   : > { %v3336_v56 = vmax.f32 %v3259_v18, 0.0  ;;  %v3270_v53 = vadd.f32 %v4003_v16, %v5544_v38  ;;  %v3364_v39 = vmul.f32 %v5550_v19, %v3338_v40 }
 0x3a5   : > { %v3261_v36 = vpop.f32.mrf.mxu0 }
 0x3a6   : > { %v3339_v30 = vmax.f32 %v3270_v53, 0.0  ;;  %v3262_v60 = vadd.f32 %v5544_v38, %v3261_v36  ;;  %v3388_v20 = vsel %vm3381_vm0, %v3364_v39, 0.0  ;;  %v3362_v0 = vmul.f32 %v5550_v19, %v3336_v56 }
 0x3a7   : > { %3389 = vadd.xlane.f32.xlu1 %v3388_v20 }
 0x3a8   : > { %v3337_v32 = vmax.f32 %v3262_v60, 0.0  ;;  %v3382_v50 = vsel %vm3381_vm0, %v3362_v0, 0.0  ;;  %v3365_v17 = vmul.f32 %v5550_v19, %v3339_v30 }
 0x3a9   : > { %3383 = vadd.xlane.f32.xlu0 %v3382_v50 }
 0x3aa   : > { %v3391_v10 = vsel %vm3381_vm0, %v3365_v17, 0.0  ;;  %v3363_v27 = vmul.f32 %v5550_v19, %v3337_v32 }
 0x3ab   : > { %3392 = vadd.xlane.f32.xlu1 %v3391_v10 }
 0x3ac   : > { %v3385_v14 = vsel %vm3381_vm0, %v3363_v27, 0.0 }
 0x3ad   : > { %3386 = vadd.xlane.f32.xlu0 %v3385_v14 }
 0x3af   : > { %v4006_v57 = vpop.f32.mrf.mxu0 }
 0x3b0   : > { %v3283_v22 = vadd.f32 %v4006_v57, %v5544_v38 }
 0x3b1   : > { %v3274_v51 = vpop.f32.mrf.mxu0 }
 0x3b2   : > { %v3342_v45 = vmax.f32 %v3283_v22, 0.0  ;;  %v3275_v43 = vadd.f32 %v5544_v38, %v3274_v51 }
 0x3b3   : > { %v4007_v5 = vpop.f32.mrf.mxu0 }
 0x3b4   : > { %v3340_v3 = vmax.f32 %v3275_v43, 0.0  ;;  %v3286_v59 = vadd.f32 %v4007_v5, %v5544_v38  ;;  %v3368_v24 = vmul.f32 %v5550_v19, %v3342_v45 }
 0x3b5   : > { %v3277_v25 = vpop.f32.mrf.mxu0 }
 0x3b6   : > { %v3343_v37 = vmax.f32 %v3286_v59, 0.0  ;;  %v3278_v48 = vadd.f32 %v5544_v38, %v3277_v25  ;;  %v3400_v28 = vsel %vm3381_vm0, %v3368_v24, 0.0  ;;  %v3366_v49 = vmul.f32 %v5550_v19, %v3340_v3 }
 0x3b7   : > { %3401 = vadd.xlane.f32.xlu0 %v3400_v28 }
 0x3b8   : > { %v3341_v15 = vmax.f32 %v3278_v48, 0.0  ;;  %v3369_v61 = vmul.f32 %v5550_v19, %v3343_v37  ;;  %v3394_v54 = vsel %vm3381_vm0, %v3366_v49, 0.0 }
 0x3ba   : > { %v3403_v46 = vsel %vm3381_vm0, %v3369_v61, 0.0  ;;  %v3367_v42 = vmul.f32 %v5550_v19, %v3341_v15 }
 0x3bb   : > { %3404 = vadd.xlane.f32.xlu1 %v3403_v46  ;;  %3395 = vadd.xlane.f32.xlu0 %v3394_v54 }
 0x3bc   : > { %v3397_v58 = vsel %vm3381_vm0, %v3367_v42, 0.0 }
 0x3bf   : > { %v4010_v55 = vpop.f32.mrf.mxu0  ;;  %3398 = vadd.xlane.f32.xlu1 %v3397_v58 }
 0x3c0   : > { %v3299_v11 = vadd.f32 %v4010_v55, %v5544_v38 }
 0x3c1   : > { %v3290_v31 = vpop.f32.mrf.mxu0 }
 0x3c2   : > { %v3346_v9 = vmax.f32 %v3299_v11, 0.0  ;;  %v3291_v52 = vadd.f32 %v5544_v38, %v3290_v31 }
 0x3c3   : > { %v4011_v35 = vpop.f32.mrf.mxu0 }
 0x3c4   : > { %v3344_v62 = vmax.f32 %v3291_v52, 0.0  ;;  %v3302_v13 = vadd.f32 %v4011_v35, %v5544_v38  ;;  %v3372_v8 = vmul.f32 %v5550_v19, %v3346_v9 }
 0x3c5   : > { %v3293_v12 = vpop.f32.mrf.mxu0 }
 0x3c6   : > { %v3347_v21 = vmax.f32 %v3302_v13, 0.0  ;;  %v3294_v2 = vadd.f32 %v5544_v38, %v3293_v12  ;;  %v3412_v44 = vsel %vm3381_vm0, %v3372_v8, 0.0  ;;  %v3370_v34 = vmul.f32 %v5550_v19, %v3344_v62 }
 0x3c7   : > { %3413 = vadd.xlane.f32.xlu0 %v3412_v44 }
 0x3c8   : > { %v3345_v41 = vmax.f32 %v3294_v2, 0.0  ;;  %v3373_v23 = vmul.f32 %v5550_v19, %v3347_v21  ;;  %v3406_v7 = vsel %vm3381_vm0, %v3370_v34, 0.0 }
 0x3ca   : > { %v3415_v4 = vsel %vm3381_vm0, %v3373_v23, 0.0  ;;  %v3371_v1 = vmul.f32 %v5550_v19, %v3345_v41 }
 0x3cb   : > { %3416 = vadd.xlane.f32.xlu1 %v3415_v4  ;;  %3407 = vadd.xlane.f32.xlu0 %v3406_v7 }
 0x3cc   : > { %v3409_v26 = vsel %vm3381_vm0, %v3371_v1, 0.0 }
 0x3cf   : > { %v4014_v63 = vpop.f32.mrf.mxu1  ;;  %3410 = vadd.xlane.f32.xlu1 %v3409_v26 }
 0x3d0   : > { %v3315_v6 = vadd.f32 %v4014_v63, %v5544_v38 }
 0x3d1   : > { %v3306_v33 = vpop.f32.mrf.mxu1 }
 0x3d2   : > { %v3350_v47 = vmax.f32 %v3315_v6, 0.0  ;;  %v3307_v29 = vadd.f32 %v5544_v38, %v3306_v33 }
 0x3d3   : > { %v4015_v40 = vpop.f32.mrf.mxu1 }
 0x3d4   : > { %v3348_v18 = vmax.f32 %v3307_v29, 0.0  ;;  %v3318_v16 = vadd.f32 %v4015_v40, %v5544_v38  ;;  %v3376_v56 = vmul.f32 %v5550_v19, %v3350_v47 }
 0x3d5   : > { %v3309_v53 = vpop.f32.mrf.mxu1 }
 0x3d6   : > { %v3351_v39 = vmax.f32 %v3318_v16, 0.0  ;;  %v3310_v36 = vadd.f32 %v5544_v38, %v3309_v53  ;;  %v3424_v30 = vsel %vm3381_vm0, %v3376_v56, 0.0  ;;  %v3374_v60 = vmul.f32 %v5550_v19, %v3348_v18 }
 0x3d7   : > { %3425 = vadd.xlane.f32.xlu0 %v3424_v30 }
 0x3d8   : > { %v3349_v20 = vmax.f32 %v3310_v36, 0.0  ;;  %v3377_v0 = vmul.f32 %v5550_v19, %v3351_v39  ;;  %v3418_v50 = vsel %vm3381_vm0, %v3374_v60, 0.0 }
 0x3da   : > { %v3427_v32 = vsel %vm3381_vm0, %v3377_v0, 0.0  ;;  %v3375_v17 = vmul.f32 %v5550_v19, %v3349_v20 }
 0x3db   : > { %v4018_v10 = vpop.f32.mrf.mxu1  ;;  %3428 = vadd.xlane.f32.xlu1 %v3427_v32  ;;  %3419 = vadd.xlane.f32.xlu0 %v3418_v50 }
 0x3dc   : > { %v3331_v27 = vadd.f32 %v4018_v10, %v5544_v38  ;;  %v3421_v22 = vsel %vm3381_vm0, %v3375_v17, 0.0 }
 0x3dd   : > { %v3322_v14 = vpop.f32.mrf.mxu1 }
 0x3de   : > { %v3323_v57 = vadd.f32 %v5544_v38, %v3322_v14  ;;  %v3354_v45 = vmax.f32 %v3331_v27, 0.0 }
 0x3df   : > { %v4019_v51 = vpop.f32.mrf.mxu1  ;;  %3422 = vadd.xlane.f32.xlu1 %v3421_v22 }
 0x3e0   : > { %v3352_v43 = vmax.f32 %v3323_v57, 0.0  ;;  %v3380_v37 = vmul.f32 %v5550_v19, %v3354_v45 }
 0x3e1   : > { %v3325_v5 = vpop.f32.mrf.mxu1 }
 0x3e2   : > { %v3326_v3 = vadd.f32 %v5544_v38, %v3325_v5  ;;  %v3378_v59 = vmul.f32 %v5550_v19, %v3352_v43  ;;  %v3436_v49 = vsel %vm3381_vm0, %v3380_v37, 0.0  ;;  %v3440_v38 = vstv %s3439_s19 }
 0x3e4   : > { %v3353_v24 = vmax.f32 %v3326_v3, 0.0  ;;  %v3430_v25 = vsel %vm3381_vm0, %v3378_v59, 0.0 }
 0x3e5   : > { %3431 = vadd.xlane.f32.xlu0 %v3430_v25 }
 0x3e6   : > { %v3379_v48 = vmul.f32 %v5550_v19, %v3353_v24 }
 0x3e8   : > { %v3433_v28 = vsel %vm3381_vm0, %v3379_v48, 0.0 }
 0x3e9   : > { %3434 = vadd.xlane.f32.xlu1 %v3433_v28  ;;  %3437 = vadd.xlane.f32.xlu0 %v3436_v49 }
 0x430   : > { %v3390_v19 = vpop.xlane.xlu1 %3389 }
 0x431   : > { %v3443_v15 = vadd.f32 %v3440_v38, %v3390_v19 }
 0x432   : > { %v3384_v61 = vpop.xlane.xlu0 %3383 }
 0x433   : > { %3463 = vst.msk [vmem:[%s5613_s22 + $0x10] sm:$0xff] %vm3460_vm1, %v3443_v15  ;;  %v3441_v46 = vadd.f32 %v3440_v38, %v3384_v61 }
 0x434   : > { %v3393_v54 = vpop.xlane.xlu1 %3392 }
 0x435   : > { %3461 = vst.msk [vmem:[%s5613_s22] sm:$0xff] %vm3460_vm1, %v3441_v46  ;;  %v3444_v42 = vadd.f32 %v3440_v38, %v3393_v54 }
 0x436   : > { %v3387_v58 = vpop.xlane.xlu0 %3386 }
 0x437   : > { %3464 = vst.msk [vmem:[%s5613_s22 + $0x18] sm:$0xff] %vm3460_vm1, %v3444_v42  ;;  %v3442_v55 = vadd.f32 %v3440_v38, %v3387_v58 }
 0x439   : > { %3462 = vst.msk [vmem:[%s5613_s22 + $0x8] sm:$0xff] %vm3460_vm1, %v3442_v55 }
 0x440   : > { %v3402_v11 = vpop.xlane.xlu0 %3401 }
 0x441   : > { %v3447_v31 = vadd.f32 %v3440_v38, %v3402_v11 }
 0x443   : > { %3467 = vst.msk [vmem:[%s5613_s22 + $0x30] sm:$0xff] %vm3460_vm1, %v3447_v31 }
 0x444   : > { %v3405_v9 = vpop.xlane.xlu1 %3404  ;;  %v3396_v52 = vpop.xlane.xlu0 %3395 }
 0x445   : > { %v3448_v35 = vadd.f32 %v3440_v38, %v3405_v9  ;;  %v3445_v62 = vadd.f32 %v3440_v38, %v3396_v52 }
 0x447   : > { %3468 = vst.msk [vmem:[%s5613_s22 + $0x38] sm:$0xff] %vm3460_vm1, %v3448_v35  ;;  %3465 = vst.msk [vmem:[%s5613_s22 + $0x20] sm:$0xff] %vm3460_vm1, %v3445_v62 }
 0x448   : > { %v3399_v13 = vpop.xlane.xlu1 %3398 }
 0x449   : > { %v3446_v8 = vadd.f32 %v3440_v38, %v3399_v13 }
 0x44b   : > { %3466 = vst.msk [vmem:[%s5613_s22 + $0x28] sm:$0xff] %vm3460_vm1, %v3446_v8 }
 0x450   : > { %v3414_v12 = vpop.xlane.xlu0 %3413 }
 0x451   : > { %v3451_v21 = vadd.f32 %v3440_v38, %v3414_v12 }
 0x453   : > { %3471 = vst.msk [vmem:[%s5613_s22 + $0x50] sm:$0xff] %vm3460_vm1, %v3451_v21 }
 0x454   : > { %v3417_v2 = vpop.xlane.xlu1 %3416  ;;  %v3408_v44 = vpop.xlane.xlu0 %3407 }
 0x455   : > { %v3452_v34 = vadd.f32 %v3440_v38, %v3417_v2  ;;  %v3449_v41 = vadd.f32 %v3440_v38, %v3408_v44 }
 0x457   : > { %3472 = vst.msk [vmem:[%s5613_s22 + $0x58] sm:$0xff] %vm3460_vm1, %v3452_v34  ;;  %3469 = vst.msk [vmem:[%s5613_s22 + $0x40] sm:$0xff] %vm3460_vm1, %v3449_v41 }
 0x458   : > { %v3411_v23 = vpop.xlane.xlu1 %3410 }
 0x459   : > { %v3450_v4 = vadd.f32 %v3440_v38, %v3411_v23 }
 0x45b   : > { %3470 = vst.msk [vmem:[%s5613_s22 + $0x48] sm:$0xff] %vm3460_vm1, %v3450_v4 }
 0x460   : > { %v3426_v7 = vpop.xlane.xlu0 %3425 }
 0x461   : > { %v3455_v1 = vadd.f32 %v3440_v38, %v3426_v7 }
 0x463   : > { %3475 = vst.msk [vmem:[%s5613_s22 + $0x70] sm:$0xff] %vm3460_vm1, %v3455_v1 }
 0x464   : > { %v3429_v26 = vpop.xlane.xlu1 %3428  ;;  %v3420_v63 = vpop.xlane.xlu0 %3419 }
 0x465   : > { %v3456_v6 = vadd.f32 %v3440_v38, %v3429_v26  ;;  %v3453_v33 = vadd.f32 %v3440_v38, %v3420_v63 }
 0x467   : > { %3476 = vst.msk [vmem:[%s5613_s22 + $0x78] sm:$0xff] %vm3460_vm1, %v3456_v6  ;;  %3473 = vst.msk [vmem:[%s5613_s22 + $0x60] sm:$0xff] %vm3460_vm1, %v3453_v33 }
 0x468   : > { %v3423_v47 = vpop.xlane.xlu1 %3422 }
 0x469   : > { %v3454_v29 = vadd.f32 %v3440_v38, %v3423_v47 }
 0x46b   : > { %3474 = vst.msk [vmem:[%s5613_s22 + $0x68] sm:$0xff] %vm3460_vm1, %v3454_v29 }
 0x46e   : > { %v3432_v40 = vpop.xlane.xlu0 %3431 }
 0x46f   : > { %v3457_v18 = vadd.f32 %v3440_v38, %v3432_v40 }
 0x471   : > { %3477 = vst.msk [vmem:[%s5613_s22 + $0x80] sm:$0xff] %vm3460_vm1, %v3457_v18 }
 0x472   : > { %v3435_v16 = vpop.xlane.xlu1 %3434  ;;  %v3438_v56 = vpop.xlane.xlu0 %3437 }
 0x473   : > { %v3458_v53 = vadd.f32 %v3440_v38, %v3435_v16  ;;  %v3459_v39 = vadd.f32 %v3440_v38, %v3438_v56 }
 0x475   : > { %3478 = vst.msk [vmem:[%s5613_s22 + $0x88] sm:$0xff] %vm3460_vm1, %v3458_v53  ;;  %3479 = vst.msk [vmem:[%s5613_s22 + $0x90] sm:$0xff] %vm3460_vm1, %v3459_v39 }
 0x476 PF: > { %p21_p10 = scmp.ge.s32.totalorder %s4681_s18, 4   ;;  %s5696_s11 = smov %s4544_s12 }
 0x477   : > { %s5697_s12 = smov %s4548_s13  ;;  %s5698_s13 = smov %s4691_s23 }
 0x478   : > { %s5699_s14 = smov %s4681_s18  ;;  %23 = sbr.rel (!%p21_p10) target bundleno = 6 (0x6), region = 104 }
 0x47d   :  { %3502 = vsyncpa [#allocation4], 1 }
 0x47e   :  { %3504 = vsyncpa [#allocation4 + $0x1], 1 }
 0x47f   :  { %3505 = vsyncpa [#allocation6], 1 }

</bundles_post_ra>
